<compile_context>
chip_gen: v6e
topology: v6e:2x2x1
jax: 0.10.0
libtpu: 0.0.40
codegen_flags: <defaults>
</compile_context>

<pallas_src>
import math
import numpy as np
import jax
import jax.numpy as jnp
from jax import lax
from jax.experimental import pallas as pl
from jax.experimental.pallas import tpu as pltpu

H = 156                 # spatial size implied by the module (conv2d(156 -> 78))
HALF = H // 2           # 78 concentric windows
DIM = 4
NUM_HEADS = 2
HEAD_DIM = DIM // NUM_HEADS
NEG = np.float32(-3.0e38)


def _prefix_max_rows(t):
    """Log-depth (Hillis-Steele) prefix max along axis 0 of an (R, W) tile."""
    n = t.shape[0]
    d = 1
    while d < n:
        pad = jnp.full((d, t.shape[1]), NEG, dtype=t.dtype)
        t = jnp.maximum(t, jnp.concatenate([pad, t[:n - d, :]], axis=0))
        d *= 2
    return t


def _size_tcp_kernel(x_ref, pre_ref, mT_ref, mB_ref, addT_ref, addB_ref,
                     invc_ref, flip_ref, cen_ref,
                     w2d_ref, b2d_ref, a_ref, u_ref, bproj_ref,
                     wc1_ref, bc1_ref, w1_ref, b1_ref, w2_ref, b2_ref,
                     out_ref):
    f32 = jnp.float32
    x = x_ref[0]                                   # (H, H)
    mT = mT_ref[...]                               # (HALF, H) 0/1 column masks
    mB = mB_ref[...]

    # ---- nested AdaptiveAvgPool2d((2,2)): two aligned row-sum matmuls (MXU),
    #      then masked lane reductions for the 4 quadrants. ----
    yT = jnp.dot(mT, x, preferred_element_type=f32)                # (HALF, H)
    yB = jnp.dot(mB, x, preferred_element_type=f32)                # (HALF, H)
    tl = jnp.sum(yT * mT, axis=1, keepdims=True)
    tr = jnp.sum(yT * mB, axis=1, keepdims=True)
    bl = jnp.sum(yB * mT, axis=1, keepdims=True)
    br = jnp.sum(yB * mB, axis=1, keepdims=True)
    pool_avg = jnp.concatenate([tl, tr, bl, br], axis=1) * invc_ref[...]   # (HALF, 4)

    # ---- nested AdaptiveMaxPool2d((2,2)): log-depth row scans + additive masks ----
    # Top half: reverse rows via exchange-matrix matmul so a prefix scan lands
    # in window order; row j then covers x rows (77-j)..77.
    x_top_rev = jnp.dot(flip_ref[...], x[0:HALF, :], preferred_element_type=f32)
    center = x[HALF:HALF + 1, :]                                   # centre row 78
    p_top = _prefix_max_rows(x_top_rev)
    # cen_ref: 0 everywhere except -3e38 on the last row (the clipped even-split
    # window excludes the centre row).
    rT = jnp.maximum(p_top, center + cen_ref[...])                 # (HALF, H)
    # Bottom half: natural prefix scan; window j needs rows 78..78+(j+1)
    # (clamped for the last, clipped window).
    p_bot = _prefix_max_rows(x[HALF:H, :])
    rB = jnp.concatenate([p_bot[1:HALF, :], p_bot[HALF - 1:HALF, :]], axis=0)
    addT = addT_ref[...]                                           # additive 0 / -3e38
    addB = addB_ref[...]
    tlm = jnp.max(rT + addT, axis=1, keepdims=True)
    trm = jnp.max(rT + addB, axis=1, keepdims=True)
    blm = jnp.max(rB + addT, axis=1, keepdims=True)
    brm = jnp.max(rB + addB, axis=1, keepdims=True)
    pool_max = jnp.concatenate([tlm, trm, blm, brm], axis=1)       # (HALF, 4)

    pool_x = jnp.concatenate([pool_avg, pool_max], axis=0)         # (2*HALF, 4)

    # ---- 1x1 Conv2d(156 -> 78) + ReLU ----
    cinfo = jnp.maximum(
        jnp.dot(w2d_ref[...], pool_x, preferred_element_type=f32) + b2d_ref[...], 0.0)  # (HALF, 4)

    # ---- Size_Cross_Atten(dim=4), heads fused along sublanes.
    # a_ref = [(q_h * scale) @ Wk_h] stacked over heads (q, v come from the constant
    # clen ramp, folded host-side); u_ref = [v_h @ Wproj_h] stacked along lanes.
    s = lax.dot_general(a_ref[...], cinfo, (((1,), (1,)), ((), ())),
                        preferred_element_type=f32)                # (2*HALF, HALF)
    s = s - jnp.max(s, axis=-1, keepdims=True)
    e = jnp.exp(s)
    p = e * pl.reciprocal(jnp.sum(e, axis=-1, keepdims=True), approx=True)
    attn = (jnp.dot(p[0:HALF, :], u_ref[:, 0:DIM], preferred_element_type=f32)
            + jnp.dot(p[HALF:2 * HALF, :], u_ref[:, DIM:2 * DIM],
                      preferred_element_type=f32)
            + bproj_ref[...])                                      # (HALF, 4)

    # ---- 1x1 Conv1d(78 -> 64) + ReLU ----
    feat = jnp.maximum(
        jnp.dot(wc1_ref[...], attn, preferred_element_type=f32) + bc1_ref[...], 0.0)    # (64, 4)

    # ---- pre2w: Linear(1,2) -> Tanh -> Linear(2,4) -> Tanh (tiny, elementwise) ----
    pp = pre_ref[0]                                                # (1, 1)
    h1 = jnp.tanh(pp * w1_ref[...] + b1_ref[...])                  # (1, 2)
    g = jnp.tanh(h1[:, 0:1] * w2_ref[0:1, :] +
                 h1[:, 1:2] * w2_ref[1:2, :] + b2_ref[...])        # (1, 4)

    out_ref[0] = feat * g                                          # (64, 4)


def _build_pool_constants():
    c = HALF
    mT = np.zeros((HALF, H), np.float32)
    mB = np.zeros((HALF, H), np.float32)
    cnt = np.zeros((HALF, 1), np.float32)
    for j in range(HALF):
        i = j + 1
        if i < HALF:                       # odd window, halves overlap at the centre
            mT[j, c - i:c + 1] = 1.0
            mB[j, c:c + i + 1] = 1.0
            cnt[j, 0] = float((i + 1) ** 2)
        else:                              # clipped window, even split (no overlap)
            mT[j, 0:c] = 1.0
            mB[j, c:H] = 1.0
            cnt[j, 0] = float(c * c)
    addT = np.where(mT > 0, np.float32(0.0), NEG).astype(np.float32)
    addB = np.where(mB > 0, np.float32(0.0), NEG).astype(np.float32)
    flip = np.zeros((HALF, HALF), np.float32)                      # exchange matrix
    flip[np.arange(HALF), HALF - 1 - np.arange(HALF)] = 1.0
    cen = np.zeros((HALF, 1), np.float32)
    cen[HALF - 1, 0] = NEG
    inv_cnt = (1.0 / cnt).astype(np.float32)
    return mT, mB, addT, addB, inv_cnt, flip, cen


def _fold_attention_constants(params):
    # clen is a constant ramp -> q, v (and their head-wise products with Wk / Wproj)
    # are data-independent and folded host-side.
    clen = ((np.arange(1, HALF + 1, dtype=np.float64) * 2.7 - 2.7)
            / (HALF * 2.7 - 2.7)).astype(np.float32)
    clen4 = jnp.asarray(np.tile(clen[:, None], (1, DIM)))          # (HALF, 4)
    wqvT = params["wqv"].astype(jnp.float32).T                     # (4, 8)
    wk = params["wk"].astype(jnp.float32)                          # (4, 4)
    wprojT = params["wproj"].astype(jnp.float32).T                 # (4, 4)
    q = clen4 @ wqvT[:, 0:DIM]
    v = clen4 @ wqvT[:, DIM:2 * DIM]
    scale = jnp.float32(HEAD_DIM ** -0.5)
    a_parts, u_parts = [], []
    for h in range(NUM_HEADS):
        lo, hi = HEAD_DIM * h, HEAD_DIM * (h + 1)
        a_parts.append((q[:, lo:hi] * scale) @ wk[lo:hi, :])       # (HALF, 4)
        u_parts.append(v[:, lo:hi] @ wprojT[lo:hi, :])             # (HALF, 4)
    a_const = jnp.concatenate(a_parts, axis=0)                     # (2*HALF, 4)
    u_const = jnp.concatenate(u_parts, axis=1)                     # (HALF, 8)
    return a_const, u_const


def size_tcp_forward(cloud_top, pre, params):
    b = cloud_top.shape[0]
    mT, mB, addT, addB, inv_cnt, flip, cen = _build_pool_constants()
    a_const, u_const = _fold_attention_constants(params)
    pre3 = pre.reshape(b, 1, 1).astype(jnp.float32)

    operands = (
        cloud_top.astype(jnp.float32), pre3,
        jnp.asarray(mT), jnp.asarray(mB),
        jnp.asarray(addT), jnp.asarray(addB), jnp.asarray(inv_cnt),
        jnp.asarray(flip), jnp.asarray(cen),
        params["w2d"].astype(jnp.float32),
        params["b2d"].reshape(HALF, 1).astype(jnp.float32),
        a_const, u_const, params["bproj"].reshape(1, DIM).astype(jnp.float32),
        params["wc1"].astype(jnp.float32),
        params["bc1"].reshape(64, 1).astype(jnp.float32),
        params["w1"].T.astype(jnp.float32), params["b1"].reshape(1, 2).astype(jnp.float32),
        params["w2"].T.astype(jnp.float32), params["b2"].reshape(1, DIM).astype(jnp.float32),
    )

    def const2d(shape):
        return pl.BlockSpec(shape, lambda i: (0, 0))

    in_specs = [
        pl.BlockSpec((1, H, H), lambda i: (i, 0, 0)),     # cloud_top (per batch)
        pl.BlockSpec((1, 1, 1), lambda i: (i, 0, 0)),     # pre (per batch)
        const2d((HALF, H)), const2d((HALF, H)),                           # mT, mB
        const2d((HALF, H)), const2d((HALF, H)), const2d((HALF, 1)),       # addT, addB, inv_cnt
        const2d((HALF, HALF)), const2d((HALF, 1)),                        # flip, cen
        const2d((HALF, 2 * HALF)), const2d((HALF, 1)),                    # conv2d W, b
        const2d((2 * HALF, DIM)), const2d((HALF, 2 * DIM)), const2d((1, DIM)),  # A, U, bproj
        const2d((64, HALF)), const2d((64, 1)),                            # conv1d W, b
        const2d((1, 2)), const2d((1, 2)),                                 # pre2w L1
        const2d((2, DIM)), const2d((1, DIM)),                             # pre2w L2
    ]

    out = pl.pallas_call(
        _size_tcp_kernel,
        out_shape=jax.ShapeDtypeStruct((b, 64, DIM), jnp.float32),
        grid=(b,),
        in_specs=in_specs,
        out_specs=pl.BlockSpec((1, 64, DIM), lambda i: (i, 0, 0)),
        compiler_params=pltpu.CompilerParams(dimension_semantics=("parallel",)),
    )(*operands)
    return out.reshape(b, 64, 2, 2)


# ---------- pure-JAX reference (mirrors the PyTorch module) ----------
def size_tcp_reference(cloud_top, pre, params):
    b = cloud_top.shape[0]
    x = cloud_top[:, None, :, :].astype(jnp.float32)
    c = HALF
    pool_avg, pool_max = [], []
    for i in range(1, c + 1):
        r0, r1 = c - i, min(c + i + 1, H)
        win = x[:, :, r0:r1, r0:r1]
        L = win.shape[2]
        bounds = [(0, (L + 1) // 2), (L // 2, L)]
        avg_q, max_q = [], []
        for (a0, a1) in bounds:
            for (b0, b1) in bounds:
                patch = win[:, :, a0:a1, b0:b1]
                avg_q.append(jnp.mean(patch, axis=(2, 3)))
                max_q.append(jnp.max(patch, axis=(2, 3)))
        pool_avg.append(jnp.stack(avg_q, axis=-1))   # (b,1,4)
        pool_max.append(jnp.stack(max_q, axis=-1))
    pool_avg = jnp.concatenate(pool_avg, axis=1)
    pool_max = jnp.concatenate(pool_max, axis=1)
    pool_x = jnp.concatenate([pool_avg, pool_max], axis=1)            # (b,156,4)
    conv = jnp.einsum("oc,bcp->bop", params["w2d"], pool_x) + params["b2d"][None, :, None]
    cinfo = jax.nn.relu(conv)
    clen = (jnp.arange(1, c + 1, dtype=jnp.float32) * 2.7 - 2.7) / (c * 2.7 - 2.7)
    clen = jnp.broadcast_to(clen[None, :, None], (b, c, DIM))
    kk = jnp.einsum("bnc,dc->bnd", cinfo, params["wk"])
    qv = jnp.einsum("bnc,dc->bnd", clen, params["wqv"])
    scale = HEAD_DIM ** -0.5
    heads = []
    for h in range(NUM_HEADS):
        qh = qv[:, :, HEAD_DIM * h:HEAD_DIM * (h + 1)]
        vh = qv[:, :, DIM + HEAD_DIM * h:DIM + HEAD_DIM * (h + 1)]
        kh = kk[:, :, HEAD_DIM * h:HEAD_DIM * (h + 1)]
        s = jnp.einsum("bnd,bmd->bnm", qh, kh) * scale
        p = jax.nn.softmax(s, axis=-1)
        heads.append(jnp.einsum("bnm,bmd->bnd", p, vh))
    att = jnp.concatenate(heads, axis=-1)
    att = jnp.einsum("bnc,dc->bnd", att, params["wproj"]) + params["bproj"][None, None, :]
    feat = jax.nn.relu(jnp.einsum("oc,bcl->bol", params["wc1"], att) + params["bc1"][None, :, None])
    h1 = jnp.tanh(pre @ params["w1"].T + params["b1"][None, :])
    g = jnp.tanh(h1 @ params["w2"].T + params["b2"][None, :])
    out = feat * g[:, None, :]
    return out.reshape(b, 64, 2, 2)


if __name__ == "__main__":
    key = jax.random.PRNGKey(0)
    ks = jax.random.split(key, 14)

    def u(k, shape, fan_in):
        bound = 1.0 / math.sqrt(fan_in)
        return jax.random.uniform(k, shape, jnp.float32, -bound, bound)

    # deterministic synthetic parameters (shapes from the module __init__)
    params = {
        "w2d":   u(ks[0], (HALF, 2 * HALF), 2 * HALF),   # Conv2d(156,78,1)
        "b2d":   u(ks[1], (HALF,), 2 * HALF),
        "wk":    u(ks[2], (DIM, DIM), DIM),              # Linear(4,4), no bias
        "wqv":   u(ks[3], (2 * DIM, DIM), DIM),          # Linear(4,8), no bias
        "wproj": u(ks[4], (DIM, DIM), DIM),              # Linear(4,4)
        "bproj": u(ks[5], (DIM,), DIM),
        "wc1":   u(ks[6], (64, HALF), HALF),             # Conv1d(78,64,1)
        "bc1":   u(ks[7], (64,), HALF),
        "w1":    u(ks[8], (2, 1), 1),                    # Linear(1,2)
        "b1":    u(ks[9], (2,), 1),
        "w2":    u(ks[10], (DIM, 2), 2),                 # Linear(2,4)
        "b2":    u(ks[11], (DIM,), 2),
    }

    b = 2
    cloud_top = jax.random.normal(ks[12], (b, H, H), jnp.float32)
    pre = jax.random.normal(ks[13], (b, 1), jnp.float32)

    out = jax.block_until_ready(size_tcp_forward(cloud_top, pre, params))
    ref = jax.block_until_ready(size_tcp_reference(cloud_top, pre, params))
    np.testing.assert_allclose(np.asarray(out), np.asarray(ref), rtol=2e-2, atol=2e-2)
    print("KERNEL_OK")
</pallas_src>

<mosaic_0001>
module attributes {stable_mosaic.version = 11 : i64} {
  func.func @_size_tcp_kernel(%arg0: i32, %arg1: memref<1x156x156xf32, #tpu.memory_space<vmem>>, %arg2: memref<1x1x1xf32, #tpu.memory_space<vmem>>, %arg3: memref<78x156xf32, #tpu.memory_space<vmem>>, %arg4: memref<78x156xf32, #tpu.memory_space<vmem>>, %arg5: memref<78x156xf32, #tpu.memory_space<vmem>>, %arg6: memref<78x156xf32, #tpu.memory_space<vmem>>, %arg7: memref<78x1xf32, #tpu.memory_space<vmem>>, %arg8: memref<78x78xf32, #tpu.memory_space<vmem>>, %arg9: memref<78x1xf32, #tpu.memory_space<vmem>>, %arg10: memref<78x156xf32, #tpu.memory_space<vmem>>, %arg11: memref<78x1xf32, #tpu.memory_space<vmem>>, %arg12: memref<156x4xf32, #tpu.memory_space<vmem>>, %arg13: memref<78x8xf32, #tpu.memory_space<vmem>>, %arg14: memref<1x4xf32, #tpu.memory_space<vmem>>, %arg15: memref<64x78xf32, #tpu.memory_space<vmem>>, %arg16: memref<64x1xf32, #tpu.memory_space<vmem>>, %arg17: memref<1x2xf32, #tpu.memory_space<vmem>>, %arg18: memref<1x2xf32, #tpu.memory_space<vmem>>, %arg19: memref<2x4xf32, #tpu.memory_space<vmem>>, %arg20: memref<1x4xf32, #tpu.memory_space<vmem>>, %arg21: memref<1x64x4xf32, #tpu.memory_space<vmem>>) attributes {dimension_semantics = [#tpu.dimension_semantics<parallel>], iteration_bounds = array<i64: 2>, scalar_prefetch = 0 : i64, scratch_operands = 0 : i64, tpu.core_type = #tpu.core_type<tc>, window_params = [{transform_indices = @transform_0, window_bounds = array<i64: 1, 156, 156>}, {transform_indices = @transform_1, window_bounds = array<i64: 1, 1, 1>}, {pipeline_mode = #tpu.pipeline_mode<synchronous>, transform_indices = @transform_2, window_bounds = array<i64: 78, 156>}, {pipeline_mode = #tpu.pipeline_mode<synchronous>, transform_indices = @transform_3, window_bounds = array<i64: 78, 156>}, {pipeline_mode = #tpu.pipeline_mode<synchronous>, transform_indices = @transform_4, window_bounds = array<i64: 78, 156>}, {pipeline_mode = #tpu.pipeline_mode<synchronous>, transform_indices = @transform_5, window_bounds = array<i64: 78, 156>}, {pipeline_mode = #tpu.pipeline_mode<synchronous>, transform_indices = @transform_6, window_bounds = array<i64: 78, 1>}, {pipeline_mode = #tpu.pipeline_mode<synchronous>, transform_indices = @transform_7, window_bounds = array<i64: 78, 78>}, {pipeline_mode = #tpu.pipeline_mode<synchronous>, transform_indices = @transform_8, window_bounds = array<i64: 78, 1>}, {pipeline_mode = #tpu.pipeline_mode<synchronous>, transform_indices = @transform_9, window_bounds = array<i64: 78, 156>}, {pipeline_mode = #tpu.pipeline_mode<synchronous>, transform_indices = @transform_10, window_bounds = array<i64: 78, 1>}, {pipeline_mode = #tpu.pipeline_mode<synchronous>, transform_indices = @transform_11, window_bounds = array<i64: 156, 4>}, {pipeline_mode = #tpu.pipeline_mode<synchronous>, transform_indices = @transform_12, window_bounds = array<i64: 78, 8>}, {pipeline_mode = #tpu.pipeline_mode<synchronous>, transform_indices = @transform_13, window_bounds = array<i64: 1, 4>}, {pipeline_mode = #tpu.pipeline_mode<synchronous>, transform_indices = @transform_14, window_bounds = array<i64: 64, 78>}, {pipeline_mode = #tpu.pipeline_mode<synchronous>, transform_indices = @transform_15, window_bounds = array<i64: 64, 1>}, {pipeline_mode = #tpu.pipeline_mode<synchronous>, transform_indices = @transform_16, window_bounds = array<i64: 1, 2>}, {pipeline_mode = #tpu.pipeline_mode<synchronous>, transform_indices = @transform_17, window_bounds = array<i64: 1, 2>}, {pipeline_mode = #tpu.pipeline_mode<synchronous>, transform_indices = @transform_18, window_bounds = array<i64: 2, 4>}, {pipeline_mode = #tpu.pipeline_mode<synchronous>, transform_indices = @transform_19, window_bounds = array<i64: 1, 4>}, {transform_indices = @transform_20, window_bounds = array<i64: 1, 64, 4>}]} {
    %c0 = arith.constant 0 : index
    %c0_0 = arith.constant 0 : index
    %c0_1 = arith.constant 0 : index
    %0 = vector.load %arg1[%c0, %c0_0, %c0_1] : memref<1x156x156xf32, #tpu.memory_space<vmem>>, vector<1x156x156xf32>
    %1 = vector.shape_cast %0 : vector<1x156x156xf32> to vector<156x156xf32>
    %c0_2 = arith.constant 0 : index
    %c0_3 = arith.constant 0 : index
    %2 = vector.load %arg3[%c0_2, %c0_3] : memref<78x156xf32, #tpu.memory_space<vmem>>, vector<78x156xf32>
    %c0_4 = arith.constant 0 : index
    %c0_5 = arith.constant 0 : index
    %3 = vector.load %arg4[%c0_4, %c0_5] : memref<78x156xf32, #tpu.memory_space<vmem>>, vector<78x156xf32>
    %cst = arith.constant dense<0.000000e+00> : vector<78x156xf32>
    %4 = tpu.matmul %2, %1, %cst {dimension_numbers = #tpu.dot_dimension_numbers<[1], [0], [0], [1], [0, 0, 1, 1], [], []>} : vector<78x156xf32>, vector<156x156xf32>, vector<78x156xf32> -> vector<78x156xf32>
    %cst_6 = arith.constant dense<0.000000e+00> : vector<78x156xf32>
    %5 = tpu.matmul %3, %1, %cst_6 {dimension_numbers = #tpu.dot_dimension_numbers<[1], [0], [0], [1], [0, 0, 1, 1], [], []>} : vector<78x156xf32>, vector<156x156xf32>, vector<78x156xf32> -> vector<78x156xf32>
    %6 = arith.mulf %4, %2 : vector<78x156xf32>
    %cst_7 = arith.constant dense<0.000000e+00> : vector<78xf32>
    %7 = vector.multi_reduction <add>, %6, %cst_7 [1] : vector<78x156xf32> to vector<78xf32>
    %8 = vector.shape_cast %7 : vector<78xf32> to vector<78x1xf32>
    %9 = arith.mulf %4, %3 : vector<78x156xf32>
    %cst_8 = arith.constant dense<0.000000e+00> : vector<78xf32>
    %10 = vector.multi_reduction <add>, %9, %cst_8 [1] : vector<78x156xf32> to vector<78xf32>
    %11 = vector.shape_cast %10 : vector<78xf32> to vector<78x1xf32>
    %12 = arith.mulf %5, %2 : vector<78x156xf32>
    %cst_9 = arith.constant dense<0.000000e+00> : vector<78xf32>
    %13 = vector.multi_reduction <add>, %12, %cst_9 [1] : vector<78x156xf32> to vector<78xf32>
    %14 = vector.shape_cast %13 : vector<78xf32> to vector<78x1xf32>
    %15 = arith.mulf %5, %3 : vector<78x156xf32>
    %cst_10 = arith.constant dense<0.000000e+00> : vector<78xf32>
    %16 = vector.multi_reduction <add>, %15, %cst_10 [1] : vector<78x156xf32> to vector<78xf32>
    %17 = vector.shape_cast %16 : vector<78xf32> to vector<78x1xf32>
    %18 = tpu.concatenate %8, %11, %14, %17 in 1 : vector<78x1xf32>, vector<78x1xf32>, vector<78x1xf32>, vector<78x1xf32> -> vector<78x4xf32>
    %c0_11 = arith.constant 0 : index
    %c0_12 = arith.constant 0 : index
    %19 = vector.load %arg7[%c0_11, %c0_12] : memref<78x1xf32, #tpu.memory_space<vmem>>, vector<78x1xf32>
    %20 = vector.broadcast %19 : vector<78x1xf32> to vector<78x4xf32>
    %21 = arith.mulf %18, %20 : vector<78x4xf32>
    %c0_13 = arith.constant 0 : index
    %c0_14 = arith.constant 0 : index
    %22 = vector.load %arg8[%c0_13, %c0_14] : memref<78x78xf32, #tpu.memory_space<vmem>>, vector<78x78xf32>
    %23 = vector.extract_strided_slice %1 {offsets = [0, 0], sizes = [78, 156], strides = [1, 1]} : vector<156x156xf32> to vector<78x156xf32>
    %cst_15 = arith.constant dense<0.000000e+00> : vector<78x156xf32>
    %24 = tpu.matmul %22, %23, %cst_15 {dimension_numbers = #tpu.dot_dimension_numbers<[1], [0], [0], [1], [0, 0, 1, 1], [], []>} : vector<78x78xf32>, vector<78x156xf32>, vector<78x156xf32> -> vector<78x156xf32>
    %25 = vector.extract_strided_slice %1 {offsets = [78, 0], sizes = [1, 156], strides = [1, 1]} : vector<156x156xf32> to vector<1x156xf32>
    %cst_16 = arith.constant -3.000000e+38 : f32
    %26 = vector.broadcast %cst_16 : f32 to vector<1x156xf32>
    %27 = vector.extract_strided_slice %24 {offsets = [0, 0], sizes = [77, 156], strides = [1, 1]} : vector<78x156xf32> to vector<77x156xf32>
    %28 = tpu.concatenate %26, %27 in 0 : vector<1x156xf32>, vector<77x156xf32> -> vector<78x156xf32>
    %29 = arith.maximumf %24, %28 : vector<78x156xf32>
    %cst_17 = arith.constant -3.000000e+38 : f32
    %30 = vector.broadcast %cst_17 : f32 to vector<2x156xf32>
    %31 = vector.extract_strided_slice %29 {offsets = [0, 0], sizes = [76, 156], strides = [1, 1]} : vector<78x156xf32> to vector<76x156xf32>
    %32 = tpu.concatenate %30, %31 in 0 : vector<2x156xf32>, vector<76x156xf32> -> vector<78x156xf32>
    %33 = arith.maximumf %29, %32 : vector<78x156xf32>
    %cst_18 = arith.constant -3.000000e+38 : f32
    %34 = vector.broadcast %cst_18 : f32 to vector<4x156xf32>
    %35 = vector.extract_strided_slice %33 {offsets = [0, 0], sizes = [74, 156], strides = [1, 1]} : vector<78x156xf32> to vector<74x156xf32>
    %36 = tpu.concatenate %34, %35 in 0 : vector<4x156xf32>, vector<74x156xf32> -> vector<78x156xf32>
    %37 = arith.maximumf %33, %36 : vector<78x156xf32>
    %cst_19 = arith.constant -3.000000e+38 : f32
    %38 = vector.broadcast %cst_19 : f32 to vector<8x156xf32>
    %39 = vector.extract_strided_slice %37 {offsets = [0, 0], sizes = [70, 156], strides = [1, 1]} : vector<78x156xf32> to vector<70x156xf32>
    %40 = tpu.concatenate %38, %39 in 0 : vector<8x156xf32>, vector<70x156xf32> -> vector<78x156xf32>
    %41 = arith.maximumf %37, %40 : vector<78x156xf32>
    %cst_20 = arith.constant -3.000000e+38 : f32
    %42 = vector.broadcast %cst_20 : f32 to vector<16x156xf32>
    %43 = vector.extract_strided_slice %41 {offsets = [0, 0], sizes = [62, 156], strides = [1, 1]} : vector<78x156xf32> to vector<62x156xf32>
    %44 = tpu.concatenate %42, %43 in 0 : vector<16x156xf32>, vector<62x156xf32> -> vector<78x156xf32>
    %45 = arith.maximumf %41, %44 : vector<78x156xf32>
    %cst_21 = arith.constant -3.000000e+38 : f32
    %46 = vector.broadcast %cst_21 : f32 to vector<32x156xf32>
    %47 = vector.extract_strided_slice %45 {offsets = [0, 0], sizes = [46, 156], strides = [1, 1]} : vector<78x156xf32> to vector<46x156xf32>
    %48 = tpu.concatenate %46, %47 in 0 : vector<32x156xf32>, vector<46x156xf32> -> vector<78x156xf32>
    %49 = arith.maximumf %45, %48 : vector<78x156xf32>
    %cst_22 = arith.constant -3.000000e+38 : f32
    %50 = vector.broadcast %cst_22 : f32 to vector<64x156xf32>
    %51 = vector.extract_strided_slice %49 {offsets = [0, 0], sizes = [14, 156], strides = [1, 1]} : vector<78x156xf32> to vector<14x156xf32>
    %52 = tpu.concatenate %50, %51 in 0 : vector<64x156xf32>, vector<14x156xf32> -> vector<78x156xf32>
    %53 = arith.maximumf %49, %52 : vector<78x156xf32>
    %c0_23 = arith.constant 0 : index
    %c0_24 = arith.constant 0 : index
    %54 = vector.load %arg9[%c0_23, %c0_24] : memref<78x1xf32, #tpu.memory_space<vmem>>, vector<78x1xf32>
    %55 = vector.broadcast %25 : vector<1x156xf32> to vector<78x156xf32>
    %56 = vector.broadcast %54 : vector<78x1xf32> to vector<78x156xf32>
    %57 = arith.addf %55, %56 : vector<78x156xf32>
    %58 = arith.maximumf %53, %57 : vector<78x156xf32>
    %59 = vector.extract_strided_slice %1 {offsets = [78, 0], sizes = [78, 156], strides = [1, 1]} : vector<156x156xf32> to vector<78x156xf32>
    %cst_25 = arith.constant -3.000000e+38 : f32
    %60 = vector.broadcast %cst_25 : f32 to vector<1x156xf32>
    %61 = vector.extract_strided_slice %59 {offsets = [0, 0], sizes = [77, 156], strides = [1, 1]} : vector<78x156xf32> to vector<77x156xf32>
    %62 = tpu.concatenate %60, %61 in 0 : vector<1x156xf32>, vector<77x156xf32> -> vector<78x156xf32>
    %63 = arith.maximumf %59, %62 : vector<78x156xf32>
    %cst_26 = arith.constant -3.000000e+38 : f32
    %64 = vector.broadcast %cst_26 : f32 to vector<2x156xf32>
    %65 = vector.extract_strided_slice %63 {offsets = [0, 0], sizes = [76, 156], strides = [1, 1]} : vector<78x156xf32> to vector<76x156xf32>
    %66 = tpu.concatenate %64, %65 in 0 : vector<2x156xf32>, vector<76x156xf32> -> vector<78x156xf32>
    %67 = arith.maximumf %63, %66 : vector<78x156xf32>
    %cst_27 = arith.constant -3.000000e+38 : f32
    %68 = vector.broadcast %cst_27 : f32 to vector<4x156xf32>
    %69 = vector.extract_strided_slice %67 {offsets = [0, 0], sizes = [74, 156], strides = [1, 1]} : vector<78x156xf32> to vector<74x156xf32>
    %70 = tpu.concatenate %68, %69 in 0 : vector<4x156xf32>, vector<74x156xf32> -> vector<78x156xf32>
    %71 = arith.maximumf %67, %70 : vector<78x156xf32>
    %cst_28 = arith.constant -3.000000e+38 : f32
    %72 = vector.broadcast %cst_28 : f32 to vector<8x156xf32>
    %73 = vector.extract_strided_slice %71 {offsets = [0, 0], sizes = [70, 156], strides = [1, 1]} : vector<78x156xf32> to vector<70x156xf32>
    %74 = tpu.concatenate %72, %73 in 0 : vector<8x156xf32>, vector<70x156xf32> -> vector<78x156xf32>
    %75 = arith.maximumf %71, %74 : vector<78x156xf32>
    %cst_29 = arith.constant -3.000000e+38 : f32
    %76 = vector.broadcast %cst_29 : f32 to vector<16x156xf32>
    %77 = vector.extract_strided_slice %75 {offsets = [0, 0], sizes = [62, 156], strides = [1, 1]} : vector<78x156xf32> to vector<62x156xf32>
    %78 = tpu.concatenate %76, %77 in 0 : vector<16x156xf32>, vector<62x156xf32> -> vector<78x156xf32>
    %79 = arith.maximumf %75, %78 : vector<78x156xf32>
    %cst_30 = arith.constant -3.000000e+38 : f32
    %80 = vector.broadcast %cst_30 : f32 to vector<32x156xf32>
    %81 = vector.extract_strided_slice %79 {offsets = [0, 0], sizes = [46, 156], strides = [1, 1]} : vector<78x156xf32> to vector<46x156xf32>
    %82 = tpu.concatenate %80, %81 in 0 : vector<32x156xf32>, vector<46x156xf32> -> vector<78x156xf32>
    %83 = arith.maximumf %79, %82 : vector<78x156xf32>
    %cst_31 = arith.constant -3.000000e+38 : f32
    %84 = vector.broadcast %cst_31 : f32 to vector<64x156xf32>
    %85 = vector.extract_strided_slice %83 {offsets = [0, 0], sizes = [14, 156], strides = [1, 1]} : vector<78x156xf32> to vector<14x156xf32>
    %86 = tpu.concatenate %84, %85 in 0 : vector<64x156xf32>, vector<14x156xf32> -> vector<78x156xf32>
    %87 = arith.maximumf %83, %86 : vector<78x156xf32>
    %88 = vector.extract_strided_slice %87 {offsets = [1, 0], sizes = [77, 156], strides = [1, 1]} : vector<78x156xf32> to vector<77x156xf32>
    %89 = vector.extract_strided_slice %87 {offsets = [77, 0], sizes = [1, 156], strides = [1, 1]} : vector<78x156xf32> to vector<1x156xf32>
    %90 = tpu.concatenate %88, %89 in 0 : vector<77x156xf32>, vector<1x156xf32> -> vector<78x156xf32>
    %c0_32 = arith.constant 0 : index
    %c0_33 = arith.constant 0 : index
    %91 = vector.load %arg5[%c0_32, %c0_33] : memref<78x156xf32, #tpu.memory_space<vmem>>, vector<78x156xf32>
    %c0_34 = arith.constant 0 : index
    %c0_35 = arith.constant 0 : index
    %92 = vector.load %arg6[%c0_34, %c0_35] : memref<78x156xf32, #tpu.memory_space<vmem>>, vector<78x156xf32>
    %93 = arith.addf %58, %91 : vector<78x156xf32>
    %cst_36 = arith.constant dense<0xFF800000> : vector<78xf32>
    %94 = vector.multi_reduction <maximumf>, %93, %cst_36 [1] : vector<78x156xf32> to vector<78xf32>
    %95 = vector.shape_cast %94 : vector<78xf32> to vector<78x1xf32>
    %96 = arith.addf %58, %92 : vector<78x156xf32>
    %cst_37 = arith.constant dense<0xFF800000> : vector<78xf32>
    %97 = vector.multi_reduction <maximumf>, %96, %cst_37 [1] : vector<78x156xf32> to vector<78xf32>
    %98 = vector.shape_cast %97 : vector<78xf32> to vector<78x1xf32>
    %99 = arith.addf %90, %91 : vector<78x156xf32>
    %cst_38 = arith.constant dense<0xFF800000> : vector<78xf32>
    %100 = vector.multi_reduction <maximumf>, %99, %cst_38 [1] : vector<78x156xf32> to vector<78xf32>
    %101 = vector.shape_cast %100 : vector<78xf32> to vector<78x1xf32>
    %102 = arith.addf %90, %92 : vector<78x156xf32>
    %cst_39 = arith.constant dense<0xFF800000> : vector<78xf32>
    %103 = vector.multi_reduction <maximumf>, %102, %cst_39 [1] : vector<78x156xf32> to vector<78xf32>
    %104 = vector.shape_cast %103 : vector<78xf32> to vector<78x1xf32>
    %105 = tpu.concatenate %95, %98, %101, %104 in 1 : vector<78x1xf32>, vector<78x1xf32>, vector<78x1xf32>, vector<78x1xf32> -> vector<78x4xf32>
    %106 = tpu.concatenate %21, %105 in 0 : vector<78x4xf32>, vector<78x4xf32> -> vector<156x4xf32>
    %c0_40 = arith.constant 0 : index
    %c0_41 = arith.constant 0 : index
    %107 = vector.load %arg10[%c0_40, %c0_41] : memref<78x156xf32, #tpu.memory_space<vmem>>, vector<78x156xf32>
    %cst_42 = arith.constant dense<0.000000e+00> : vector<78x4xf32>
    %108 = tpu.matmul %107, %106, %cst_42 {dimension_numbers = #tpu.dot_dimension_numbers<[1], [0], [0], [1], [0, 0, 1, 1], [], []>} : vector<78x156xf32>, vector<156x4xf32>, vector<78x4xf32> -> vector<78x4xf32>
    %c0_43 = arith.constant 0 : index
    %c0_44 = arith.constant 0 : index
    %109 = vector.load %arg11[%c0_43, %c0_44] : memref<78x1xf32, #tpu.memory_space<vmem>>, vector<78x1xf32>
    %110 = vector.broadcast %109 : vector<78x1xf32> to vector<78x4xf32>
    %111 = arith.addf %108, %110 : vector<78x4xf32>
    %cst_45 = arith.constant 0.000000e+00 : f32
    %112 = vector.broadcast %cst_45 : f32 to vector<78x4xf32>
    %113 = arith.maximumf %111, %112 : vector<78x4xf32>
    %c0_46 = arith.constant 0 : index
    %c0_47 = arith.constant 0 : index
    %114 = vector.load %arg12[%c0_46, %c0_47] : memref<156x4xf32, #tpu.memory_space<vmem>>, vector<156x4xf32>
    %cst_48 = arith.constant dense<0.000000e+00> : vector<156x78xf32>
    %115 = tpu.matmul %114, %113, %cst_48 {dimension_numbers = #tpu.dot_dimension_numbers<[1], [1], [0], [0], [0, 0, 1, 0], [], []>} : vector<156x4xf32>, vector<78x4xf32>, vector<156x78xf32> -> vector<156x78xf32>
    %cst_49 = arith.constant dense<0xFF800000> : vector<156xf32>
    %116 = vector.multi_reduction <maximumf>, %115, %cst_49 [1] : vector<156x78xf32> to vector<156xf32>
    %117 = vector.shape_cast %116 : vector<156xf32> to vector<156x1xf32>
    %118 = vector.broadcast %117 : vector<156x1xf32> to vector<156x78xf32>
    %119 = arith.subf %115, %118 : vector<156x78xf32>
    %120 = math.exp %119 : vector<156x78xf32>
    %cst_50 = arith.constant dense<0.000000e+00> : vector<156xf32>
    %121 = vector.multi_reduction <add>, %120, %cst_50 [1] : vector<156x78xf32> to vector<156xf32>
    %122 = vector.shape_cast %121 : vector<156xf32> to vector<156x1xf32>
    %123 = tpu.reciprocal %122 {approx = true} : vector<156x1xf32> -> vector<156x1xf32>
    %124 = vector.broadcast %123 : vector<156x1xf32> to vector<156x78xf32>
    %125 = arith.mulf %120, %124 : vector<156x78xf32>
    %126 = vector.extract_strided_slice %125 {offsets = [0, 0], sizes = [78, 78], strides = [1, 1]} : vector<156x78xf32> to vector<78x78xf32>
    %c0_51 = arith.constant 0 : index
    %c0_52 = arith.constant 0 : index
    %127 = vector.load %arg13[%c0_51, %c0_52] : memref<78x8xf32, #tpu.memory_space<vmem>>, vector<78x4xf32>
    %cst_53 = arith.constant dense<0.000000e+00> : vector<78x4xf32>
    %128 = tpu.matmul %126, %127, %cst_53 {dimension_numbers = #tpu.dot_dimension_numbers<[1], [0], [0], [1], [0, 0, 1, 1], [], []>} : vector<78x78xf32>, vector<78x4xf32>, vector<78x4xf32> -> vector<78x4xf32>
    %129 = vector.extract_strided_slice %125 {offsets = [78, 0], sizes = [78, 78], strides = [1, 1]} : vector<156x78xf32> to vector<78x78xf32>
    %c0_54 = arith.constant 0 : index
    %c4 = arith.constant 4 : index
    %130 = vector.load %arg13[%c0_54, %c4] : memref<78x8xf32, #tpu.memory_space<vmem>>, vector<78x4xf32>
    %cst_55 = arith.constant dense<0.000000e+00> : vector<78x4xf32>
    %131 = tpu.matmul %129, %130, %cst_55 {dimension_numbers = #tpu.dot_dimension_numbers<[1], [0], [0], [1], [0, 0, 1, 1], [], []>} : vector<78x78xf32>, vector<78x4xf32>, vector<78x4xf32> -> vector<78x4xf32>
    %132 = arith.addf %128, %131 : vector<78x4xf32>
    %c0_56 = arith.constant 0 : index
    %c0_57 = arith.constant 0 : index
    %133 = vector.load %arg14[%c0_56, %c0_57] : memref<1x4xf32, #tpu.memory_space<vmem>>, vector<1x4xf32>
    %134 = vector.broadcast %133 : vector<1x4xf32> to vector<78x4xf32>
    %135 = arith.addf %132, %134 : vector<78x4xf32>
    %c0_58 = arith.constant 0 : index
    %c0_59 = arith.constant 0 : index
    %136 = vector.load %arg15[%c0_58, %c0_59] : memref<64x78xf32, #tpu.memory_space<vmem>>, vector<64x78xf32>
    %cst_60 = arith.constant dense<0.000000e+00> : vector<64x4xf32>
    %137 = tpu.matmul %136, %135, %cst_60 {dimension_numbers = #tpu.dot_dimension_numbers<[1], [0], [0], [1], [0, 0, 1, 1], [], []>} : vector<64x78xf32>, vector<78x4xf32>, vector<64x4xf32> -> vector<64x4xf32>
    %c0_61 = arith.constant 0 : index
    %c0_62 = arith.constant 0 : index
    %138 = vector.load %arg16[%c0_61, %c0_62] : memref<64x1xf32, #tpu.memory_space<vmem>>, vector<64x1xf32>
    %139 = vector.broadcast %138 : vector<64x1xf32> to vector<64x4xf32>
    %140 = arith.addf %137, %139 : vector<64x4xf32>
    %cst_63 = arith.constant 0.000000e+00 : f32
    %141 = vector.broadcast %cst_63 : f32 to vector<64x4xf32>
    %142 = arith.maximumf %140, %141 : vector<64x4xf32>
    %c0_64 = arith.constant 0 : index
    %c0_65 = arith.constant 0 : index
    %c0_66 = arith.constant 0 : index
    %143 = vector.load %arg2[%c0_64, %c0_65, %c0_66] : memref<1x1x1xf32, #tpu.memory_space<vmem>>, vector<1x1x1xf32>
    %144 = vector.shape_cast %143 : vector<1x1x1xf32> to vector<1x1xf32>
    %c0_67 = arith.constant 0 : index
    %c0_68 = arith.constant 0 : index
    %145 = vector.load %arg17[%c0_67, %c0_68] : memref<1x2xf32, #tpu.memory_space<vmem>>, vector<1x2xf32>
    %146 = vector.broadcast %144 : vector<1x1xf32> to vector<1x2xf32>
    %147 = arith.mulf %146, %145 : vector<1x2xf32>
    %c0_69 = arith.constant 0 : index
    %c0_70 = arith.constant 0 : index
    %148 = vector.load %arg18[%c0_69, %c0_70] : memref<1x2xf32, #tpu.memory_space<vmem>>, vector<1x2xf32>
    %149 = arith.addf %147, %148 : vector<1x2xf32>
    %150 = math.tanh %149 : vector<1x2xf32>
    %151 = vector.extract_strided_slice %150 {offsets = [0, 0], sizes = [1, 1], strides = [1, 1]} : vector<1x2xf32> to vector<1x1xf32>
    %c0_71 = arith.constant 0 : index
    %c0_72 = arith.constant 0 : index
    %152 = vector.load %arg19[%c0_71, %c0_72] : memref<2x4xf32, #tpu.memory_space<vmem>>, vector<1x4xf32>
    %153 = vector.broadcast %151 : vector<1x1xf32> to vector<1x4xf32>
    %154 = arith.mulf %153, %152 : vector<1x4xf32>
    %155 = vector.extract_strided_slice %150 {offsets = [0, 1], sizes = [1, 1], strides = [1, 1]} : vector<1x2xf32> to vector<1x1xf32>
    %c1 = arith.constant 1 : index
    %c0_73 = arith.constant 0 : index
    %156 = vector.load %arg19[%c1, %c0_73] : memref<2x4xf32, #tpu.memory_space<vmem>>, vector<1x4xf32>
    %157 = vector.broadcast %155 : vector<1x1xf32> to vector<1x4xf32>
    %158 = arith.mulf %157, %156 : vector<1x4xf32>
    %159 = arith.addf %154, %158 : vector<1x4xf32>
    %c0_74 = arith.constant 0 : index
    %c0_75 = arith.constant 0 : index
    %160 = vector.load %arg20[%c0_74, %c0_75] : memref<1x4xf32, #tpu.memory_space<vmem>>, vector<1x4xf32>
    %161 = arith.addf %159, %160 : vector<1x4xf32>
    %162 = math.tanh %161 : vector<1x4xf32>
    %163 = vector.broadcast %162 : vector<1x4xf32> to vector<64x4xf32>
    %164 = arith.mulf %142, %163 : vector<64x4xf32>
    %c0_76 = arith.constant 0 : index
    %c0_77 = arith.constant 0 : index
    %c0_78 = arith.constant 0 : index
    %165 = vector.load %arg21[%c0_76, %c0_77, %c0_78] : memref<1x64x4xf32, #tpu.memory_space<vmem>>, vector<1x64x4xf32>
    %166 = vector.shape_cast %165 : vector<1x64x4xf32> to vector<64x4xf32>
    %167 = vector.shape_cast %164 : vector<64x4xf32> to vector<1x64x4xf32>
    tpu.vector_store %arg21[%c0_76, %c0_77, %c0_78], %167 {strides = array<i32>} : memref<1x64x4xf32, #tpu.memory_space<vmem>>, vector<1x64x4xf32>,
    return
  }
  func.func @transform_0(%arg0: i32) -> (i32, i32, i32) {
    %c0_i32 = arith.constant 0 : i32
    %c0_i32_0 = arith.constant 0 : i32
    %c0_i32_1 = arith.constant 0 : i32
    return %arg0, %c0_i32, %c0_i32_0 : i32, i32, i32
  }
  func.func @transform_1(%arg0: i32) -> (i32, i32, i32) {
    %c0_i32 = arith.constant 0 : i32
    %c0_i32_0 = arith.constant 0 : i32
    %c0_i32_1 = arith.constant 0 : i32
    return %arg0, %c0_i32, %c0_i32_0 : i32, i32, i32
  }
  func.func @transform_2(%arg0: i32) -> (i32, i32) {
    %c0_i32 = arith.constant 0 : i32
    %c0_i32_0 = arith.constant 0 : i32
    %c0_i32_1 = arith.constant 0 : i32
    return %c0_i32, %c0_i32_0 : i32, i32
  }
  func.func @transform_3(%arg0: i32) -> (i32, i32) {
    %c0_i32 = arith.constant 0 : i32
    %c0_i32_0 = arith.constant 0 : i32
    %c0_i32_1 = arith.constant 0 : i32
    return %c0_i32, %c0_i32_0 : i32, i32
  }
  func.func @transform_4(%arg0: i32) -> (i32, i32) {
    %c0_i32 = arith.constant 0 : i32
    %c0_i32_0 = arith.constant 0 : i32
    %c0_i32_1 = arith.constant 0 : i32
    return %c0_i32, %c0_i32_0 : i32, i32
  }
  func.func @transform_5(%arg0: i32) -> (i32, i32) {
    %c0_i32 = arith.constant 0 : i32
    %c0_i32_0 = arith.constant 0 : i32
    %c0_i32_1 = arith.constant 0 : i32
    return %c0_i32, %c0_i32_0 : i32, i32
  }
  func.func @transform_6(%arg0: i32) -> (i32, i32) {
    %c0_i32 = arith.constant 0 : i32
    %c0_i32_0 = arith.constant 0 : i32
    %c0_i32_1 = arith.constant 0 : i32
    return %c0_i32, %c0_i32_0 : i32, i32
  }
  func.func @transform_7(%arg0: i32) -> (i32, i32) {
    %c0_i32 = arith.constant 0 : i32
    %c0_i32_0 = arith.constant 0 : i32
    %c0_i32_1 = arith.constant 0 : i32
    return %c0_i32, %c0_i32_0 : i32, i32
  }
  func.func @transform_8(%arg0: i32) -> (i32, i32) {
    %c0_i32 = arith.constant 0 : i32
    %c0_i32_0 = arith.constant 0 : i32
    %c0_i32_1 = arith.constant 0 : i32
    return %c0_i32, %c0_i32_0 : i32, i32
  }
  func.func @transform_9(%arg0: i32) -> (i32, i32) {
    %c0_i32 = arith.constant 0 : i32
    %c0_i32_0 = arith.constant 0 : i32
    %c0_i32_1 = arith.constant 0 : i32
    return %c0_i32, %c0_i32_0 : i32, i32
  }
  func.func @transform_10(%arg0: i32) -> (i32, i32) {
    %c0_i32 = arith.constant 0 : i32
    %c0_i32_0 = arith.constant 0 : i32
    %c0_i32_1 = arith.constant 0 : i32
    return %c0_i32, %c0_i32_0 : i32, i32
  }
  func.func @transform_11(%arg0: i32) -> (i32, i32) {
    %c0_i32 = arith.constant 0 : i32
    %c0_i32_0 = arith.constant 0 : i32
    %c0_i32_1 = arith.constant 0 : i32
    return %c0_i32, %c0_i32_0 : i32, i32
  }
  func.func @transform_12(%arg0: i32) -> (i32, i32) {
    %c0_i32 = arith.constant 0 : i32
    %c0_i32_0 = arith.constant 0 : i32
    %c0_i32_1 = arith.constant 0 : i32
    return %c0_i32, %c0_i32_0 : i32, i32
  }
  func.func @transform_13(%arg0: i32) -> (i32, i32) {
    %c0_i32 = arith.constant 0 : i32
    %c0_i32_0 = arith.constant 0 : i32
    %c0_i32_1 = arith.constant 0 : i32
    return %c0_i32, %c0_i32_0 : i32, i32
  }
  func.func @transform_14(%arg0: i32) -> (i32, i32) {
    %c0_i32 = arith.constant 0 : i32
    %c0_i32_0 = arith.constant 0 : i32
    %c0_i32_1 = arith.constant 0 : i32
    return %c0_i32, %c0_i32_0 : i32, i32
  }
  func.func @transform_15(%arg0: i32) -> (i32, i32) {
    %c0_i32 = arith.constant 0 : i32
    %c0_i32_0 = arith.constant 0 : i32
    %c0_i32_1 = arith.constant 0 : i32
    return %c0_i32, %c0_i32_0 : i32, i32
  }
  func.func @transform_16(%arg0: i32) -> (i32, i32) {
    %c0_i32 = arith.constant 0 : i32
    %c0_i32_0 = arith.constant 0 : i32
    %c0_i32_1 = arith.constant 0 : i32
    return %c0_i32, %c0_i32_0 : i32, i32
  }
  func.func @transform_17(%arg0: i32) -> (i32, i32) {
    %c0_i32 = arith.constant 0 : i32
    %c0_i32_0 = arith.constant 0 : i32
    %c0_i32_1 = arith.constant 0 : i32
    return %c0_i32, %c0_i32_0 : i32, i32
  }
  func.func @transform_18(%arg0: i32) -> (i32, i32) {
    %c0_i32 = arith.constant 0 : i32
    %c0_i32_0 = arith.constant 0 : i32
    %c0_i32_1 = arith.constant 0 : i32
    return %c0_i32, %c0_i32_0 : i32, i32
  }
  func.func @transform_19(%arg0: i32) -> (i32, i32) {
    %c0_i32 = arith.constant 0 : i32
    %c0_i32_0 = arith.constant 0 : i32
    %c0_i32_1 = arith.constant 0 : i32
    return %c0_i32, %c0_i32_0 : i32, i32
  }
  func.func @transform_20(%arg0: i32) -> (i32, i32, i32) {
    %c0_i32 = arith.constant 0 : i32
    %c0_i32_0 = arith.constant 0 : i32
    %c0_i32_1 = arith.constant 0 : i32
    return %arg0, %c0_i32, %c0_i32_0 : i32, i32, i32
  }
}

</mosaic_0001>

<bundles_post_ra>
// kernel: tpu_custom_call.1
= control target key start
LH: loop header
LB: loop body
LE: loop exit
PB: predicated region body
PF: predicated region fallthrough
CT: control target
= control target key end

     0   :  { %s9026_s0 = inlined_call_operand.vmem [shape: f32[2,156,156], index: 0, kind: input, shape index: {}]   ;;  %s9027_s1 = inlined_call_operand.vmem [shape: f32[2,1,1], index: 1, kind: input, shape index: {}]   ;;  %s9028_s2 = inlined_call_operand.vmem [shape: f32[78,156], index: 2, kind: input, shape index: {}]   ;;  %s9029_s3 = inlined_call_operand.vmem [shape: f32[78,156], index: 3, kind: input, shape index: {}]   ;;  %s9030_s4 = inlined_call_operand.vmem [shape: f32[78,156], index: 4, kind: input, shape index: {}]   ;;  %s9031_s5 = inlined_call_operand.vmem [shape: f32[78,156], index: 5, kind: input, shape index: {}]   ;;  %s9032_s6 = inlined_call_operand.vmem [shape: f32[78,1], index: 6, kind: input, shape index: {}]   ;;  %s9033_s7 = inlined_call_operand.vmem [shape: f32[78,78], index: 7, kind: input, shape index: {}]   ;;  %s9034_s8 = inlined_call_operand.vmem [shape: f32[78,1], index: 8, kind: input, shape index: {}]   ;;  %s9035_s9 = inlined_call_operand.vmem [shape: f32[78,156], index: 9, kind: input, shape index: {}]   ;;  %s9036_s10 = inlined_call_operand.vmem [shape: f32[78,1], index: 10, kind: input, shape index: {}]   ;;  %s9037_s11 = inlined_call_operand.vmem [shape: f32[156,4], index: 11, kind: input, shape index: {}]   ;;  %s9038_s12 = inlined_call_operand.vmem [shape: f32[78,8], index: 12, kind: input, shape index: {}]   ;;  %s9039_s13 = inlined_call_operand.vmem [shape: f32[1,4], index: 13, kind: input, shape index: {}]   ;;  %s9040_s14 = inlined_call_operand.vmem [shape: f32[64,78], index: 14, kind: input, shape index: {}]   ;;  %s9041_s15 = inlined_call_operand.vmem [shape: f32[64,1], index: 15, kind: input, shape index: {}]   ;;  %s9042_s16 = inlined_call_operand.vmem [shape: f32[1,2], index: 16, kind: input, shape index: {}]   ;;  %s9043_s17 = inlined_call_operand.vmem [shape: f32[1,2], index: 17, kind: input, shape index: {}]   ;;  %s9044_s18 = inlined_call_operand.vmem [shape: f32[2,4], index: 18, kind: input, shape index: {}]   ;;  %s9045_s19 = inlined_call_operand.vmem [shape: f32[1,4], index: 19, kind: input, shape index: {}]   ;;  %s9046_s20 = inlined_call_operand.vmem [shape: f32[2,64,4], index: 20, kind: output, shape index: {}]  }
   0x1   :  { %9143 = sst [smem:[#allocation27_spill]] %s9026_s0 }
   0x2   :  { %9144 = sst [smem:[#allocation28_spill]] %s9027_s1  ;;  %s5478_s1 = smov 0  }
   0x3   :  { %9145 = sst [smem:[#allocation29_spill]] %s9028_s2 }
   0x4   :  { %9146 = sst [smem:[#allocation30_spill]] %s9029_s3 }
   0x5   :  { %9147 = sst [smem:[#allocation31_spill]] %s9030_s4 }
   0x6 LB: > { %s4797_s22 = sadd.s32 4294967295, %s5366_s1   ;;  %p4801_p0 = scmp.ge.s32.totalorder %s5366_s1, 1  ;;  %s5366_s1 = sphi %s5478_s1, %s30_s1  }
   0x7   : > { %p570_p1 = scmp.lt.s32.totalorder %s5366_s1, 3 }
   0x9   : > { %p571_p2 = pnand %p4801_p0, %p570_p1 }
   0xb   : > { %574 = sbr.rel (%p571_p2) target bundleno = 1897 (0x769), region = 100 }
  0x10   : > { %p631_p3 = scmp.lt.s32.totalorder %s4797_s22, 1  ;;  %s9148_s2 = sld [smem:[#allocation29_spill]]  ;;  %vm724_vm0 = vcmask 228352   ;;  %v9050_v2 = vmov 0   ;;  %vm2071_vm1 = vcmask 1042432   ;;  %vm1098_vm2 = vcmask 1045504  }
  0x11   : > { %s9149_s26 = sld [smem:[#allocation30_spill]]  ;;  %5192 = vset.pattern.permute.xlu1 %v9050_v2  ;;  %5191 = vset.pattern.permute.xlu0 %v9050_v2  ;;  %vm1583_vm3 = vcmask 1040384   ;;  %vm755_vm4 = vcmask 1043456   ;;  %vm1684_vm5 = vcmask 1041408   ;;  %vm1401_vm6 = vcmask 637952  }
  0x12   : > { %s9401_s22 = smov (!%p631_p3, %s4797_s22), 1  ;;  %s9150_s29 = sld [smem:[#allocation27_spill]]  ;;  %vm3005_vm7 = vcmask 1044480   ;;  %vm1100_vm8 = vcmask 226304   ;;  %vm1288_vm9 = vcmask 7168   ;;  %vm1299_vm10 = vcmask 15360  }
  0x13   : > { %s5177_s27 = smul.u32 320, %s9401_s22  ;;  %s9202_s0 = sld [smem:[#allocation31_spill]]  ;;  %vm1310_vm11 = vcmask 23552   ;;  %vm3619_vm12 = vcmask 31744   ;;  %vm3932_vm13 = vcmask 633856  }
  0x14   : > { %s9397_s23 = sld [smem:[#allocation28_spill]]  ;;  %s4916_s28 = sshll.u32 %s9401_s22, 6 }
  0x15   : > { %s9005_s21 = scalar_lea.vmem %s9046_s20, %s4916_s28 }
  0x16   : > { %v685_v0 = vld [vmem:[%s9148_s2 + $0x8] sm:$0xff] }
  0x17   : > { %v705_v1 = vld [vmem:[%s9149_s26 + $0x8] sm:$0xff]  ;;  %4807 = vmatprep.mubr.msk.f32.mxu0 %vm724_vm0, %v685_v0 }
  0x18   : > { %4819 = vmatprep.mubr.msk.f32.mxu1 %vm724_vm0, %v705_v1  ;;  %s5502_s30 = scalar_lea.vmem %s9150_s29, %s5177_s27  ;;  %s5371_s29 = smov 124  }
  0x19   : > { %v5505_v3 = vld [vmem:[%s5502_s30 + $0xf8] sm:$0xff]  ;;  %v5508_v4 = vld [vmem:[%s5502_s30 + $0xf0] sm:$0xff]  ;;  %v673_v5 = vld [vmem:[%s5502_s30 + $0xe8] sm:$0xff] }
  0x1a   : > { %762 = vmatprep.subr.mxu0 %v5505_v3  ;;  %v9057_v6 = vrot.slane %v5505_v3, 5  ;;  %917 = vmatprep.subr.mxu1 %v5505_v3  ;;  %v9055_v7 = vrot.slane %v5508_v4, 5  ;;  %v2092_v8 = vrot.slane %v673_v5, 5  ;;  %v672_v9 = vld [vmem:[%s5502_s30 + $0xe0] sm:$0xff]  ;;  %v671_v10 = vld [vmem:[%s5502_s30 + $0xd8] sm:$0xff]  ;;  %v670_v11 = vld [vmem:[%s5502_s30 + $0xd0] sm:$0xff]  ;;  %s638_s24 = scalar_lea.vmem %s9397_s23, %s9401_s22 }
  0x1b   : > { %763 = vmatpush1.msra.mxu0 %v5508_v4  ;;  %918 = vmatpush1.msra.mxu1 %v5508_v4  ;;  %v2090_v12 = vrot.slane %v672_v9, 5  ;;  %v2088_v13 = vrot.slane %v671_v10, 5  ;;  %v2086_v14 = vrot.slane %v670_v11, 5  ;;  %v669_v15 = vld [vmem:[%s5502_s30 + $0xc8] sm:$0xff]  ;;  %v5522_v16 = vld [vmem:[%s5502_s30 + $0xc0] sm:$0xff]  ;;  %v5525_v17 = vld [vmem:[%s5502_s30 + $0xb8] sm:$0xff] }
  0x1c   : > { %764 = vmatprep.subr.mxu0 %v673_v5  ;;  %v5530_v18 = vsel %vm2071_vm1, %v2092_v8, %v9057_v6  ;;  %919 = vmatprep.subr.mxu1 %v673_v5  ;;  %v2084_v19 = vrot.slane %v669_v15, 5  ;;  %v2082_v20 = vrot.slane %v5522_v16, 5  ;;  %v2080_v21 = vrot.slane %v5525_v17, 5  ;;  %v5545_v30 = vld [vmem:[%s5502_s30 + $0xb0] sm:$0xff]  ;;  %v5560_v39 = vld [vmem:[%s5502_s30 + $0x98] sm:$0xff]  ;;  %v5570_v43 = vld [vmem:[%s5502_s30 + $0xa8] sm:$0xff] }
  0x1d   : > { %v9056_v22 = vrot.slane %v5530_v18, 2  ;;  %765 = vmatpush1.msra.mxu0 %v672_v9  ;;  %v5538_v23 = vsel %vm2071_vm1, %v2090_v12, %v9055_v7  ;;  %920 = vmatpush1.msra.mxu1 %v672_v9  ;;  %v2093_v24 = vsel %vm2071_vm1, %v2088_v13, %v2092_v8  ;;  %v2091_v25 = vsel %vm2071_vm1, %v2086_v14, %v2090_v12  ;;  %v5581_v49 = vld [vmem:[%s5502_s30 + $0xa0] sm:$0xff]  ;;  %v5601_v57 = vld [vmem:[%s5502_s30 + $0x90] sm:$0xff]  ;;  %v5610_v62 = vld [vmem:[%s5502_s30 + $0x88] sm:$0xff] }
  0x1e   : > { %v9052_v26 = vrot.slane %v5538_v23, 2  ;;  %766 = vmatprep.subr.mxu0 %v671_v10  ;;  %v2136_v27 = vrot.slane %v2093_v24, 2  ;;  %921 = vmatprep.subr.mxu1 %v671_v10  ;;  %v2134_v28 = vrot.slane %v2091_v25, 2  ;;  %v2089_v29 = vsel %vm2071_vm1, %v2084_v19, %v2088_v13  ;;  %v5641_v13 = vld [vmem:[%s5502_s30 + $0x78] sm:$0xff] }
  0x1f   : > { %767 = vmatpush1.msra.mxu0 %v670_v11  ;;  %922 = vmatpush1.msra.mxu1 %v670_v11  ;;  %v2132_v31 = vrot.slane %v2089_v29, 2  ;;  %v2087_v32 = vsel %vm2071_vm1, %v2082_v20, %v2086_v14  ;;  %v5549_v33 = vsel %vm2071_vm1, %v2080_v21, %v2084_v19  ;;  %v2078_v34 = vrot.slane %v5545_v30, 5  ;;  %v5743_v24 = vld [vmem:[%s5502_s30 + $0x38] sm:$0xff] }
  0x20   : > { %v2141_v35 = vsel %vm1098_vm2, %v2136_v27, %v9056_v22  ;;  %v2139_v36 = vsel %vm1098_vm2, %v2134_v28, %v9052_v26  ;;  %768 = vmatprep.subr.mxu0 %v669_v15  ;;  %923 = vmatprep.subr.mxu1 %v669_v15  ;;  %v2130_v37 = vrot.slane %v2087_v32, 2  ;;  %v2128_v38 = vrot.slane %v5549_v33, 2 }
  0x21   : > { %v5562_v40 = vmax.f32 %v673_v5, %v2141_v35  ;;  %v5564_v41 = vmax.f32 %v672_v9, %v2139_v36  ;;  %v2137_v42 = vsel %vm1098_vm2, %v2132_v31, %v2136_v27  ;;  %769 = vmatpush1.msra.mxu0 %v5522_v16  ;;  %924 = vmatpush1.msra.mxu1 %v5522_v16  ;;  %v2075_v44 = vrot.slane %v5560_v39, 5  ;;  %v5623_v9 = vld [vmem:[%s5502_s30 + $0x80] sm:$0xff]  ;;  %v5676_v36 = vld [vmem:[%s5502_s30 + $0x138] sm:$0xf] }
  0x22   : > { %v5573_v45 = vmax.f32 %v671_v10, %v2137_v42  ;;  %v2135_v46 = vsel %vm1098_vm2, %v2130_v37, %v2134_v28  ;;  %770 = vmatprep.subr.mxu0 %v5525_v17  ;;  %v2133_v47 = vsel %vm1098_vm2, %v2128_v38, %v2132_v31  ;;  %925 = vmatprep.subr.mxu1 %v5525_v17  ;;  %v2076_v48 = vrot.slane %v5570_v43, 5  ;;  %v5673_v35 = vld [vmem:[%s5502_s30 + $0x60] sm:$0xff] }
  0x23   : > { %v9054_v50 = vrot.slane %v5562_v40, 4  ;;  %v9051_v51 = vrot.slane %v5564_v41, 4  ;;  %v5585_v52 = vmax.f32 %v670_v11, %v2135_v46  ;;  %v5587_v53 = vmax.f32 %v669_v15, %v2133_v47  ;;  %771 = vmatpush1.msra.mxu0 %v5545_v30  ;;  %926 = vmatpush1.msra.mxu1 %v5545_v30 }
  0x24   : > { %9151 = vst [vmem:[#allocation2_spill] sm:$0xff] %v5573_v45  ;;  %v2240_v54 = vrot.slane %v5573_v45, 4  ;;  %v5595_v55 = vsel %vm2071_vm1, %v2078_v34, %v2082_v20  ;;  %772 = vmatprep.subr.mxu0 %v5570_v43  ;;  %v2077_v56 = vsel %vm2071_vm1, %v2075_v44, %v2076_v48  ;;  %927 = vmatprep.subr.mxu1 %v5570_v43  ;;  %v5369_v5 = vmov -3e+38   ;;  %v5691_v44 = vld [vmem:[%s5502_s30 + $0x50] sm:$0xff] }
  0x25   : > { %9152 = vst [vmem:[#allocation3_spill] sm:$0xff] %v5585_v52  ;;  %9153 = vst [vmem:[#allocation4_spill] sm:$0xff] %v5587_v53  ;;  %v2238_v58 = vrot.slane %v5585_v52, 4  ;;  %v2236_v59 = vrot.slane %v5587_v53, 4  ;;  %v2126_v60 = vrot.slane %v5595_v55, 2  ;;  %v2081_v61 = vsel %vm2071_vm1, %v2076_v48, %v2080_v21  ;;  %773 = vmatpush1.msra.mxu0 %v5581_v49  ;;  %928 = vmatpush1.msra.mxu1 %v5581_v49  ;;  %v5651_v21 = vld [vmem:[%s5502_s30 + $0x70] sm:$0xff] }
  0x26   : > { %v5615_v63 = vsel %vm755_vm4, %v2240_v54, %v9054_v50  ;;  %v2117_v0 = vsel %vm1583_vm3, -3e+38, %v2077_v56  ;;  %v2124_v1 = vrot.slane %v2081_v61, 2  ;;  %v5618_v8 = vrot.slane %v5369_v5, 2  ;;  %774 = vmatprep.subr.mxu0 %v5560_v39  ;;  %929 = vmatprep.subr.mxu1 %v5560_v39  ;;  %v5762_v55 = vld [vmem:[%s5502_s30 + $0x28] sm:$0xff] }
  0x27   : > { %v5628_v10 = vsel %vm755_vm4, %v2238_v58, %v9051_v51  ;;  %v5633_v11 = vsel %vm755_vm4, %v2236_v59, %v2240_v54  ;;  %v2131_v12 = vsel %vm1098_vm2, %v2126_v60, %v2130_v37  ;;  %775 = vmatpush1.msra.mxu0 %v5601_v57  ;;  %930 = vmatpush1.msra.mxu1 %v5601_v57  ;;  %v2121_v20 = vrot.slane %v2117_v0, 2  ;;  %v5703_v54 = vld [vmem:[%s5502_s30 + $0x48] sm:$0xff] }
  0x28   : > { %9154 = vst [vmem:[#allocation5_spill] sm:$0xff] %v5633_v11  ;;  %v5646_v19 = vmax.f32 %v5522_v16, %v2131_v12  ;;  %776 = vmatprep.subr.mxu0 %v5610_v62  ;;  %931 = vmatprep.subr.mxu1 %v5610_v62  ;;  %v2129_v25 = vsel %vm1098_vm2, %v2124_v1, %v2128_v38  ;;  %v2072_v27 = vrot.slane %v5601_v57, 5  ;;  %v2073_v28 = vrot.slane %v5581_v49, 5  ;;  %v5660_v16 = vld [vmem:[%s5502_s30 + $0x68] sm:$0xff] }
  0x29   : > { %777 = vmatpush1.msra.mxu0 %v5623_v9  ;;  %932 = vmatpush1.msra.mxu1 %v5623_v9  ;;  %v2125_v31 = vsel %vm1098_vm2, %v2121_v20, %v2124_v1  ;;  %v5665_v32 = vmax.f32 %v5560_v39, %v2121_v20  ;;  %v5668_v33 = vmax.f32 %v5525_v17, %v2129_v25  ;;  %v5688_v17 = vld [vmem:[%s5502_s30 + $0x58] sm:$0xff]  ;;  %v2112_v46 = vrot.slane %v5676_v36, 5  ;;  %v5715_v12 = vld [vmem:[%s5502_s30 + $0x128] sm:$0xff]  ;;  %v5718_v20 = vld [vmem:[%s5502_s30 + $0x120] sm:$0xff] }
  0x2a   : > { %9155 = vst [vmem:[#allocation6_spill] sm:$0xff] %v5646_v19  ;;  %v2234_v29 = vrot.slane %v5646_v19, 4  ;;  %778 = vmatprep.subr.mxu0 %v5641_v13  ;;  %933 = vmatprep.subr.mxu1 %v5641_v13  ;;  %v5679_v37 = vmax.f32 %v5570_v43, %v2125_v31  ;;  %v2074_v38 = vsel %vm2071_vm1, %v2072_v27, %v2073_v28  ;;  %v5695_v43 = vld [vmem:[%s5502_s30 + $0x130] sm:$0xf]  ;;  %v5721_v25 = vld [vmem:[%s5502_s30 + $0x118] sm:$0xff]  ;;  %v5731_v27 = vld [vmem:[%s5502_s30 + $0x40] sm:$0xff] }
  0x2b   : > { %v2079_v42 = vsel %vm2071_vm1, %v2073_v28, %v2078_v34  ;;  %779 = vmatpush1.msra.mxu0 %v5651_v21  ;;  %934 = vmatpush1.msra.mxu1 %v5651_v21  ;;  %v2227_v47 = vrot.slane %v5665_v32, 4  ;;  %v2232_v48 = vrot.slane %v5668_v33, 4  ;;  %v2116_v34 = vsel %vm1583_vm3, -3e+38, %v2074_v38 }
  0x2c   : > { %780 = vmatprep.subr.mxu0 %v5660_v16  ;;  %935 = vmatprep.subr.mxu1 %v5660_v16  ;;  %v2110_v56 = vrot.slane %v5695_v43, 5  ;;  %v5709_v61 = vsel %vm755_vm4, %v2234_v29, %v2238_v58  ;;  %v2228_v0 = vrot.slane %v5679_v37, 4  ;;  %v2120_v1 = vrot.slane %v2116_v34, 2 }
  0x2d   : > { %v2122_v5 = vrot.slane %v2079_v42, 2  ;;  %781 = vmatpush1.msra.mxu0 %v5673_v35  ;;  %936 = vmatpush1.msra.mxu1 %v5673_v35  ;;  %v5726_v58 = vsel %vm755_vm4, %v2232_v48, %v2236_v59  ;;  %v2108_v28 = vrot.slane %v5715_v12, 5  ;;  %v9058_v31 = vrot.slane %v5718_v20, 5 }
  0x2e   : > { %9156 = vst [vmem:[#allocation7_spill] sm:$0xff] %v5726_v58  ;;  %782 = vmatprep.subr.mxu0 %v5688_v17  ;;  %937 = vmatprep.subr.mxu1 %v5688_v17  ;;  %v9059_v38 = vrot.slane %v5721_v25, 5  ;;  %v2229_v42 = vsel %vm755_vm4, %v2227_v47, %v2228_v0  ;;  %v2233_v34 = vsel %vm755_vm4, %v2228_v0, %v2232_v48  ;;  %v9053_v59 = vrot.slane %v5726_v58, 2  ;;  %v5755_v0 = vld [vmem:[%s5502_s30 + $0x30] sm:$0xff] }
  0x2f   : > { %v2123_v2 = vsel %vm1098_vm2, %v2120_v1, %v2122_v5  ;;  %783 = vmatpush1.msra.mxu0 %v5691_v44  ;;  %938 = vmatpush1.msra.mxu1 %v5691_v44  ;;  %v2269_v15 = vsel %vm1684_vm5, -3e+38, %v2229_v42  ;;  %v2276_v51 = vrot.slane %v2233_v34, 2  ;;  %v2127_v47 = vsel %vm1098_vm2, %v2122_v5, %v2126_v60 }
  0x30   : > { %v5750_v48 = vmax.f32 %v5601_v57, %v2120_v1  ;;  %784 = vmatprep.subr.mxu0 %v5703_v54  ;;  %939 = vmatprep.subr.mxu1 %v5703_v54  ;;  %v2273_v26 = vrot.slane %v2269_v15, 2  ;;  %v2182_v14 = vmax.f32 %v5581_v49, %v2123_v2  ;;  %v2184_v42 = vmax.f32 %v5545_v30, %v2127_v47  ;;  %v5774_v2 = vld [vmem:[%s5502_s30 + $0x20] sm:$0xff] }
  0x31   : > { %785 = vmatpush1.msra.mxu0 %v5731_v27  ;;  %940 = vmatpush1.msra.mxu1 %v5731_v27  ;;  %v5765_v60 = vsel %vm2071_vm1, %v2108_v28, %v2112_v46  ;;  %v2281_v1 = vsel %vm1098_vm2, %v2276_v51, %v9053_v59  ;;  %v5780_v49 = vsel %vm2071_vm1, %v9058_v31, %v2110_v56  ;;  %v5790_v59 = vld [vmem:[%s5502_s30 + $0x18] sm:$0xff]  ;;  %v5824_v31 = vld [vmem:[%s5502_s30] sm:$0xff]  ;;  %v9177_v11 = vrot.slane %v5530_v18, 2 }
  0x32   : > { %v2224_v15 = vrot.slane %v5750_v48, 4  ;;  %786 = vmatprep.subr.mxu0 %v5743_v24  ;;  %941 = vmatprep.subr.mxu1 %v5743_v24  ;;  %v2156_v30 = vrot.slane %v5765_v60, 2  ;;  %v2277_v46 = vsel %vm1098_vm2, %v2273_v26, %v2276_v51  ;;  %v2333_v5 = vmax.f32 %v5665_v32, %v2273_v26  ;;  %v5796_v51 = vld [vmem:[%s5502_s30 + $0x10] sm:$0xff] }
  0x33   : > { %v5785_v34 = vmax.f32 %v5668_v33, %v2281_v1  ;;  %v2225_v47 = vrot.slane %v2182_v14, 4  ;;  %787 = vmatpush1.msra.mxu0 %v5755_v0  ;;  %942 = vmatpush1.msra.mxu1 %v5755_v0  ;;  %v2335_v60 = vmax.f32 %v5679_v37, %v2277_v46  ;;  %v2230_v50 = vrot.slane %v2184_v42, 4  ;;  %v5807_v37 = vld [vmem:[%s5502_s30 + $0x8] sm:$0xff] }
  0x34   : > { %788 = vmatprep.subr.mxu0 %v5762_v55  ;;  %943 = vmatprep.subr.mxu1 %v5762_v55  ;;  %v5799_v26 = vmax.f32 %v5676_v36, %v2156_v30  ;;  %v2377_v33 = vrot.slane %v2333_v5, 2  ;;  %v5812_v46 = vsel %vm2071_vm1, %v9059_v38, %v2108_v28  ;;  %v5863_v38 = vld [vmem:[%s5502_s30 + $0x108] sm:$0xff] }
  0x35   : > { %9157 = vst [vmem:[#allocation8_spill] sm:$0xff] %v5785_v34  ;;  %v2226_v1 = vsel %vm755_vm4, %v2224_v15, %v2225_v47  ;;  %789 = vmatpush1.msra.mxu0 %v5774_v2  ;;  %944 = vmatpush1.msra.mxu1 %v5774_v2  ;;  %v2378_v7 = vrot.slane %v2335_v60, 2  ;;  %v2231_v22 = vsel %vm755_vm4, %v2225_v47, %v2230_v50  ;;  %v9065_v47 = vrot.slane %v5812_v46, 2 }
  0x36   : > { %9158 = vst [vmem:[#allocation9_spill] sm:$0xff] %v5799_v26  ;;  %v5818_v6 = vsel %vm755_vm4, %v2230_v50, %v2234_v29  ;;  %v2268_v15 = vsel %vm1684_vm5, -3e+38, %v2226_v1  ;;  %790 = vmatprep.subr.mxu0 %v5790_v59  ;;  %945 = vmatprep.subr.mxu1 %v5790_v59  ;;  %v2274_v56 = vrot.slane %v2231_v22, 2  ;;  %v9159_v29 = vrot.slane %v5785_v34, 2 }
  0x37   : > { %v2272_v32 = vrot.slane %v2268_v15, 2  ;;  %v9064_v28 = vrot.slane %v5818_v6, 2  ;;  %791 = vmatpush1.msra.mxu0 %v5796_v51  ;;  %946 = vmatpush1.msra.mxu1 %v5796_v51  ;;  %v2379_v50 = vsel %vm1098_vm2, %v2377_v33, %v2378_v7  ;;  %v9161_v22 = vrot.slane %v5780_v49, 2 }
  0x38   : > { %v5834_v1 = vsel %vm1098_vm2, %v2378_v7, %v9159_v29  ;;  %792 = vmatprep.subr.mxu0 %v5807_v37  ;;  %947 = vmatprep.subr.mxu1 %v5807_v37  ;;  %v2415_v33 = vsel %vm755_vm4, -3e+38, %v2379_v50  ;;  %v5860_v50 = vld [vmem:[%s5502_s30 + $0x110] sm:$0xff] }
  0x39   : > { %9160 = vst [vmem:[#allocation10_spill] sm:$0xff] %v5834_v1  ;;  %v5841_v15 = vmax.f32 %v5695_v43, %v9161_v22  ;;  %v2275_v7 = vsel %vm1098_vm2, %v2272_v32, %v2274_v56  ;;  %v2279_v29 = vsel %vm1098_vm2, %v2274_v56, %v9064_v28  ;;  %793 = vmatpush1.msra.mxu0 %v5824_v31  ;;  %v2419_v34 = vrot.slane %v2415_v33, 2 }
  0x3a   : > { %948 = vmatpush1.msra.mxu1 %v5824_v31  ;;  %v2332_v22 = vmax.f32 %v5750_v48, %v2272_v32  ;;  %v2334_v45 = vmax.f32 %v2182_v14, %v2275_v7  ;;  %v5853_v52 = vmax.f32 %v2184_v42, %v2279_v29  ;;  %4805 = vmatprep.subr.msk.mxu0 %vm755_vm4, %v5676_v36  ;;  %v9066_v42 = vrot.slane %v5860_v50, 5  ;;  %v704_v14 = vld [vmem:[%s9149_s26] sm:$0xff] }
  0x3b   : > { %9162 = vst [vmem:[#allocation11_spill] sm:$0xff] %v5841_v15  ;;  %4817 = vmatprep.subr.msk.mxu1 %vm755_vm4, %v5676_v36  ;;  %4806 = vmatpush2.msk.msra.mxu0 %vm755_vm4, %v5695_v43  ;;  %v2157_v48 = vsel %vm1098_vm2, %v9065_v47, %v2156_v30  ;;  %v2100_v36 = vrot.slane %v5863_v38, 5  ;;  %v9164_v32 = vrot.slane %v5834_v1, 2  ;;  %v5878_v33 = vmax.f32 %v2333_v5, %v2419_v34  ;;  %v5906_v47 = vld [vmem:[%s5502_s30 + $0x100] sm:$0xff] }
  0x3c   : > { %9163 = vst [vmem:[#allocation12_spill] sm:$0xff] %v5853_v52  ;;  %4818 = vmatpush2.msk.msra.mxu1 %vm755_vm4, %v5695_v43  ;;  %v2374_v7 = vrot.slane %v2332_v22, 2  ;;  %v2375_v29 = vrot.slane %v2334_v45, 2  ;;  %820 = vmatprep.subr.mxu0 %v5715_v12  ;;  %v9067_v30 = vrot.slane %v5853_v52, 2  ;;  %v5888_v28 = vmax.f32 %v5715_v12, %v2157_v48 }
  0x3d   : > { %v2423_v56 = vsel %vm1098_vm2, %v2419_v34, %v9164_v32  ;;  %975 = vmatprep.subr.mxu1 %v5715_v12  ;;  %821 = vmatpush2.msra.mxu0 %v5718_v20  ;;  %v9166_v5 = vrot.slane %v5718_v20, 5  ;;  %v2523_v32 = vrot.slane %v5878_v33, 6  ;;  %v9167_v12 = vrot.slane %v5505_v3, 5 }
  0x3e   : > { %v5882_v43 = vmax.f32 %v2335_v60, %v2423_v56  ;;  %976 = vmatpush2.msra.mxu1 %v5718_v20  ;;  %9165 = vst [vmem:[#allocation13_spill] sm:$0xff] %v5888_v28  ;;  %v2376_v60 = vsel %vm1098_vm2, %v2374_v7, %v2375_v29  ;;  %822 = vmatprep.subr.mxu0 %v5721_v25  ;;  %v9170_v1 = vrot.slane %v5721_v25, 5  ;;  %v9173_v53 = vrot.slane %v5888_v28, 4 }
  0x3f   : > { %v5895_v34 = vsel %vm2071_vm1, %v9066_v42, %v9166_v5  ;;  %977 = vmatprep.subr.mxu1 %v5721_v25  ;;  %v2101_v48 = vsel %vm2071_vm1, %v9167_v12, %v2100_v36  ;;  %v5912_v5 = vsel %vm1098_vm2, %v2375_v29, %v9067_v30  ;;  %v2414_v7 = vsel %vm755_vm4, -3e+38, %v2376_v60  ;;  %823 = vmatpush2.msra.mxu0 %v5860_v50  ;;  %v684_v12 = vld [vmem:[%s9148_s2] sm:$0xff] }
  0x40   : > { %978 = vmatpush2.msra.mxu1 %v5860_v50  ;;  %v2418_v56 = vrot.slane %v2414_v7, 2  ;;  %v9168_v30 = vrot.slane %v5780_v49, 2  ;;  %v9169_v60 = vrot.slane %v5895_v34, 2  ;;  %824 = vmatprep.subr.mxu0 %v5863_v38  ;;  %v2105_v52 = vsel %vm2071_vm1, %v2100_v36, %v9170_v1  ;;  %v687_v7 = vld [vmem:[%s9148_s2 + $0x18] sm:$0xff] }
  0x41   : > { %979 = vmatprep.subr.mxu1 %v5863_v38  ;;  %v707_v49 = vld [vmem:[%s9149_s26 + $0x18] sm:$0xff]  ;;  %v9171_v29 = vrot.slane %v5882_v43, 6  ;;  %v2144_v19 = vrot.slane %v2101_v48, 2  ;;  %825 = vmatpush2.msra.mxu0 %v5906_v47  ;;  %v9176_v58 = vrot.slane %v5912_v5, 2 }
  0x42   : > { %v2155_v42 = vsel %vm1098_vm2, %v9169_v60, %v9168_v30  ;;  %v9172_v60 = vrot.slane %v5799_v26, 4  ;;  %980 = vmatpush2.msra.mxu1 %v5906_v47  ;;  %827 = vmatmul.mubr.f32.vlgmr.msra.gmra.mxu0 %v684_v12  ;;  %v2148_v26 = vrot.slane %v2105_v52, 2  ;;  %v709_v12 = vld [vmem:[%s9149_s26 + $0x28] sm:$0xff] }
  0x43   : > { %v5944_v30 = vsel %vm1684_vm5, %v2523_v32, %v9171_v29  ;;  %v5954_v36 = vmax.f32 %v5718_v20, %v2155_v42  ;;  %v1949_v32 = vld [vmem:[%s9034_s8 + $0x20] sm:$0xff]  ;;  %982 = vmatmul.mubr.f32.vlgmr.msra.gmra.mxu1 %v704_v14  ;;  %v1950_v20 = vld [vmem:[%s9034_s8 + $0x28] sm:$0xff]  ;;  %v2145_v29 = vsel %vm1098_vm2, %v9177_v11, %v2144_v19  ;;  %4808 = vmatprep.mubr.msk.f32.mxu0 %vm724_vm0, %v687_v7  ;;  %v2098_v11 = vrot.slane %v5906_v47, 5 }
  0x44   : > { %v5951_v1 = vsel %vm755_vm4, %v9173_v53, %v9172_v60  ;;  %v2421_v53 = vsel %vm1098_vm2, %v2418_v56, %v9176_v58  ;;  %v2478_v60 = vmax.f32 %v2332_v22, %v2418_v56  ;;  %v686_v58 = vld [vmem:[%s9148_s2 + $0x10] sm:$0xff]  ;;  %4820 = vmatprep.mubr.msk.f32.mxu1 %vm724_vm0, %v707_v49  ;;  %v9178_v22 = vrot.slane %v5944_v30, 2  ;;  %v689_v56 = vld [vmem:[%s9148_s2 + $0x28] sm:$0xff]  ;;  %4829 = vmatprep.subr.msk.mxu0 %vm1098_vm2, %v5560_v39  ;;  %v1948_v39 = vld [vmem:[%s9034_s8 + $0x18] sm:$0xff] }
  0x45   : > { %9174 = vst [vmem:[#allocation14_spill] sm:$0xff] %v5951_v1  ;;  %9175 = vst [vmem:[#allocation15_spill] sm:$0xff] %v5954_v36  ;;  %v5969_v42 = vmax.f32 %v2334_v45, %v2421_v53  ;;  %v9078_v48 = vrot.slane %v5954_v36, 4  ;;  %v706_v45 = vld [vmem:[%s9149_s26 + $0x10] sm:$0xff]  ;;  %v5988_v52 = vmax.f32 %v5505_v3, %v2145_v29  ;;  %1985 = vperm.xlu1 %5192, %v1949_v32   ;;  %v9179_v3 = vrot.slane %v5841_v15, 4  ;;  %v1953_v15 = vld [vmem:[%s9034_s8 + $0x40] sm:$0xff] }
  0x46   : > { %v2563_v18 = vsel %vm1098_vm2, %v5618_v8, %v9178_v22  ;;  %v2520_v14 = vrot.slane %v2478_v60, 6  ;;  %v2149_v53 = vsel %vm1098_vm2, %v2144_v19, %v2148_v26  ;;  %4830 = vmatpush1.msk.msra.mxu0 %vm1098_vm2, %v5601_v57  ;;  %1990 = vperm.xlu0 %5191, %v1950_v20   ;;  %v9181_v22 = vrot.slane %v5812_v46, 2  ;;  %v1951_v57 = vld [vmem:[%s9034_s8 + $0x30] sm:$0xff] }
  0x47   : > { %v9077_v7 = vrot.slane %v5969_v42, 6  ;;  %v6006_v29 = vsel %vm755_vm4, %v9078_v48, %v9179_v3  ;;  %v6015_v32 = vmax.f32 %v5882_v43, %v2563_v18  ;;  %v6021_v3 = vmax.f32 %v5863_v38, %v2149_v53  ;;  %833 = vmatmul.mubr.f32.gmra.mxu0 %v686_v58  ;;  %988 = vmatmul.mubr.f32.gmra.mxu1 %v706_v45  ;;  %v688_v58 = vld [vmem:[%s9148_s2 + $0x20] sm:$0xff] }
  0x48   : > { %9180 = vst [vmem:[#allocation16_spill] sm:$0xff] %v6006_v29  ;;  %v2153_v49 = vsel %vm1098_vm2, %v2148_v26, %v9181_v22  ;;  %v2248_v19 = vrot.slane %v5988_v52, 4  ;;  %v9182_v38 = vrot.slane %v5508_v4, 5  ;;  %4809 = vmatprep.mubr.msk.f32.mxu0 %vm724_vm0, %v689_v56  ;;  %4821 = vmatprep.mubr.msk.f32.mxu1 %vm724_vm0, %v709_v12  ;;  %v708_v45 = vld [vmem:[%s9149_s26 + $0x20] sm:$0xff]  ;;  %v9184_v56 = vrot.slane %v5860_v50, 5  ;;  %v691_v12 = vld [vmem:[%s9148_s2 + $0x38] sm:$0xff] }
  0x49   : > { %v6030_v20 = vsel %vm1684_vm5, %v2520_v14, %v9077_v7  ;;  %v2197_v26 = vmax.f32 %v5721_v25, %v2153_v49  ;;  %v9183_v25 = vrot.slane %v5562_v40, 4  ;;  %v2252_v53 = vrot.slane %v6021_v3, 4  ;;  %1452 = vmatprep.subr.mxu0 %v5610_v62  ;;  %1980 = vperm.xlu1 %5192, %v1948_v39   ;;  %v1946_v39 = vld [vmem:[%s9034_s8 + $0x8] sm:$0xff] }
  0x4a   : > { %v2099_v18 = vsel %vm2071_vm1, %v9182_v38, %v2098_v11  ;;  %v9079_v14 = vrot.slane %v6030_v20, 2  ;;  %v2103_v22 = vsel %vm2071_vm1, %v2098_v11, %v9184_v56  ;;  %1453 = vmatpush1.msra.mxu0 %v5623_v9  ;;  %1995 = vperm.xlu0 %5191, %v1951_v57   ;;  %v9189_v11 = vrot.slane %v5895_v34, 2 }
  0x4b   : > { %v2249_v49 = vsel %vm755_vm4, %v9183_v25, %v2248_v19  ;;  %v2256_v38 = vrot.slane %v2197_v26, 4  ;;  %v2142_v7 = vrot.slane %v2099_v18, 2  ;;  %v2146_v48 = vrot.slane %v2103_v22, 2  ;;  %v711_v25 = vld [vmem:[%s9149_s26 + $0x38] sm:$0xff]  ;;  %839 = vmatmul.mubr.f32.gmra.mxu0 %v688_v58  ;;  %994 = vmatmul.mubr.f32.gmra.mxu1 %v708_v45  ;;  %v710_v45 = vld [vmem:[%s9149_s26 + $0x30] sm:$0xff] }
  0x4c   : > { %v2292_v46 = vrot.slane %v2249_v49, 2  ;;  %v2561_v56 = vsel %vm1098_vm2, %v5618_v8, %v9079_v14  ;;  %v2253_v62 = vsel %vm755_vm4, %v2248_v19, %v2252_v53  ;;  %v6071_v18 = vmax.f32 %v2478_v60, %v5618_v8  ;;  %4810 = vmatprep.mubr.msk.f32.mxu0 %vm724_vm0, %v691_v12  ;;  %v690_v60 = vld [vmem:[%s9148_s2 + $0x30] sm:$0xff]  ;;  %4822 = vmatprep.mubr.msk.f32.mxu1 %vm724_vm0, %v711_v25  ;;  %v713_v25 = vld [vmem:[%s9149_s26 + $0x48] sm:$0xff] }
  0x4d   : > { %v6074_v9 = vmax.f32 %v5969_v42, %v2561_v56  ;;  %v2257_v57 = vsel %vm755_vm4, %v2252_v53, %v2256_v38  ;;  %v9185_v49 = vrot.slane %v5888_v28, 4  ;;  %v9187_v19 = vrot.slane %v5615_v63, 2  ;;  %1454 = vmatprep.subr.mxu0 %v5641_v13  ;;  %1970 = vperm.xlu1 %5192, %v1946_v39   ;;  %v692_v39 = vld [vmem:[%s9148_s2 + $0x40] sm:$0xff] }
  0x4e   : > { %v2296_v53 = vrot.slane %v2253_v62, 2  ;;  %v2300_v56 = vrot.slane %v2257_v57, 2  ;;  %v2147_v57 = vsel %vm1098_vm2, %v2142_v7, %v2146_v48  ;;  %1455 = vmatpush1.msra.mxu0 %v5651_v21  ;;  %v1954_v21 = vld [vmem:[%s9034_s8 + $0x48] sm:$0x3f] }
  0x4f   : > { %v6080_v22 = vsel %vm755_vm4, %v2256_v38, %v9185_v49  ;;  %v2293_v58 = vsel %vm1098_vm2, %v9187_v19, %v2292_v46  ;;  %v693_v49 = vld [vmem:[%s9148_s2 + $0x48] sm:$0xff]  ;;  %v9188_v19 = vrot.slane %v5538_v23, 2  ;;  %845 = vmatmul.mubr.f32.gmra.mxu0 %v690_v60  ;;  %1000 = vmatmul.mubr.f32.gmra.mxu1 %v710_v45  ;;  %v712_v60 = vld [vmem:[%s9149_s26 + $0x40] sm:$0xff]  ;;  %v2194_v45 = vmax.f32 %v5906_v47, %v2147_v57 }
  0x50   : > { %9186 = vst [vmem:[#allocation17_spill] sm:$0xff] %v6080_v22  ;;  %v9081_v14 = vrot.slane %v6080_v22, 2  ;;  %v6094_v38 = vmax.f32 %v5562_v40, %v2293_v58  ;;  %v2151_v40 = vsel %vm1098_vm2, %v2146_v48, %v9189_v11  ;;  %v2297_v13 = vsel %vm1098_vm2, %v2292_v46, %v2296_v53  ;;  %4811 = vmatprep.mubr.msk.f32.mxu0 %vm724_vm0, %v693_v49  ;;  %v1399_v22 = vld [vmem:[%s9033_s7 + $0x40] sm:$0xff] }
  0x51   : > { %v2143_v62 = vsel %vm1098_vm2, %v9188_v19, %v2142_v7  ;;  %v2301_v58 = vsel %vm1098_vm2, %v2296_v53, %v2300_v56  ;;  %v2345_v34 = vmax.f32 %v5988_v52, %v2297_v13  ;;  %v2196_v52 = vmax.f32 %v5860_v50, %v2151_v40  ;;  %1456 = vmatprep.subr.mxu0 %v5660_v16  ;;  %v715_v50 = vld [vmem:[%s9149_s26 + $0x58] sm:$0xff] }
  0x52   : > { %v2305_v23 = vsel %vm1098_vm2, %v2300_v56, %v9081_v14  ;;  %v9091_v7 = vrot.slane %v6094_v38, 2  ;;  %v2347_v48 = vmax.f32 %v6021_v3, %v2301_v58  ;;  %v2192_v46 = vmax.f32 %v5508_v4, %v2143_v62  ;;  %v695_v3 = vld [vmem:[%s9148_s2 + $0x58] sm:$0xff]  ;;  %4823 = vmatprep.mubr.msk.f32.mxu1 %vm724_vm0, %v713_v25  ;;  %1457 = vmatpush1.msra.mxu0 %v5673_v35  ;;  %v9212_v62 = vld [vmem:[#allocation6_spill] sm:$0xff] }
  0x53   : > { %v6124_v11 = vmax.f32 %v2197_v26, %v2305_v23  ;;  %v6143_v4 = vmax.f32 %v5878_v33, %v5618_v8  ;;  %v2398_v53 = vrot.slane %v2345_v34, 2  ;;  %2010 = vperm.xlu1 %5192, %v1954_v21   ;;  %v2250_v16 = vrot.slane %v2194_v45, 4  ;;  %851 = vmatmul.mubr.f32.gmra.mxu0 %v692_v39  ;;  %v1952_v33 = vld [vmem:[%s9034_s8 + $0x38] sm:$0xff]  ;;  %v694_v23 = vld [vmem:[%s9148_s2 + $0x50] sm:$0xff] }
  0x54   : > { %v2402_v56 = vrot.slane %v2347_v48, 2  ;;  %v2246_v49 = vrot.slane %v2192_v46, 4  ;;  %v2254_v19 = vrot.slane %v2196_v52, 4  ;;  %1006 = vmatmul.mubr.f32.gmra.mxu1 %v712_v60  ;;  %v6157_v57 = vmax.f32 %v6071_v18, %v5618_v8  ;;  %4812 = vmatprep.mubr.msk.f32.mxu0 %vm724_vm0, %v695_v3  ;;  %v702_v26 = vld [vmem:[%s9148_s2 + $0x90] sm:$0x3f] }
  0x55   : > { %9190 = vst [vmem:[#allocation18_spill] sm:$0xff] %v6124_v11  ;;  %v9080_v47 = vrot.slane %v6124_v11, 2  ;;  %v6162_v35 = vsel %vm1098_vm2, %v9091_v7, %v2398_v53  ;;  %v9192_v13 = vrot.slane %v5564_v41, 4  ;;  %1458 = vmatprep.subr.mxu0 %v5688_v17  ;;  %4824 = vmatprep.mubr.msk.f32.mxu1 %vm724_vm0, %v715_v50  ;;  %v3032_v11 = vld [vmem:[%s9031_s5 + $0x20] sm:$0xff] }
  0x56   : > { %v2403_v40 = vsel %vm1098_vm2, %v2398_v53, %v2402_v56  ;;  %v9087_v21 = vrot.slane %v6162_v35, 2  ;;  %v2251_v53 = vsel %vm755_vm4, %v2246_v49, %v2250_v16  ;;  %v2255_v3 = vsel %vm755_vm4, %v2250_v16, %v2254_v19  ;;  %1459 = vmatpush1.msra.mxu0 %v5691_v44 }
  0x57   : > { %v6168_v25 = vsel %vm1098_vm2, %v2402_v56, %v9080_v47  ;;  %v2247_v58 = vsel %vm755_vm4, %v9192_v13, %v2246_v49  ;;  %v2442_v39 = vrot.slane %v2403_v40, 2  ;;  %v697_v56 = vld [vmem:[%s9148_s2 + $0x68] sm:$0xff]  ;;  %v9193_v13 = vrot.slane %v5954_v36, 4  ;;  %2000 = vperm.xlu1 %5192, %v1952_v33   ;;  %857 = vmatmul.mubr.f32.gmra.mxu0 %v694_v23 }
  0x58   : > { %9191 = vst [vmem:[#allocation19_spill] sm:$0xff] %v6168_v25  ;;  %v9083_v60 = vrot.slane %v6168_v25, 2  ;;  %v2290_v40 = vrot.slane %v2247_v58, 2  ;;  %v2294_v14 = vrot.slane %v2251_v53, 2  ;;  %v2298_v50 = vrot.slane %v2255_v3, 2  ;;  %1460 = vmatprep.subr.mxu0 %v5703_v54  ;;  %4813 = vmatprep.mubr.msk.f32.mxu0 %vm724_vm0, %v697_v56  ;;  %v696_v54 = vld [vmem:[%s9148_s2 + $0x60] sm:$0xff] }
  0x59   : > { %v6189_v47 = vsel %vm755_vm4, %v2254_v19, %v9193_v13  ;;  %v2443_v49 = vsel %vm1098_vm2, %v9087_v21, %v2442_v39  ;;  %v714_v19 = vld [vmem:[%s9149_s26 + $0x50] sm:$0xff]  ;;  %v9195_v58 = vrot.slane %v5628_v10, 2  ;;  %v717_v23 = vld [vmem:[%s9149_s26 + $0x68] sm:$0xff]  ;;  %v699_v56 = vld [vmem:[%s9148_s2 + $0x78] sm:$0xff]  ;;  %1461 = vmatpush1.msra.mxu0 %v5731_v27 }
  0x5a   : > { %9194 = vst [vmem:[#allocation20_spill] sm:$0xff] %v6189_v47  ;;  %v2447_v17 = vsel %vm1098_vm2, %v2442_v39, %v9083_v60  ;;  %v9084_v16 = vrot.slane %v6189_v47, 2  ;;  %v6203_v44 = vmax.f32 %v2345_v34, %v2443_v49  ;;  %v2295_v39 = vsel %vm1098_vm2, %v2290_v40, %v2294_v14  ;;  %1462 = vmatprep.subr.mxu0 %v5743_v24  ;;  %v716_v27 = vld [vmem:[%s9149_s26 + $0x60] sm:$0xff] }
  0x5b   : > { %v6205_v33 = vmax.f32 %v2347_v48, %v2447_v17  ;;  %v2291_v53 = vsel %vm1098_vm2, %v9195_v58, %v2290_v40  ;;  %v2299_v34 = vsel %vm1098_vm2, %v2294_v14, %v2298_v50  ;;  %v6225_v13 = vmax.f32 %v2192_v46, %v2295_v39  ;;  %1012 = vmatmul.mubr.f32.gmra.mxu1 %v714_v19  ;;  %v9207_v39 = vld [vmem:[#allocation7_spill] sm:$0xff] }
  0x5c   : > { %v2303_v48 = vsel %vm1098_vm2, %v2298_v50, %v9084_v16  ;;  %v6223_v3 = vmax.f32 %v5564_v41, %v2291_v53  ;;  %v9086_v40 = vrot.slane %v6203_v44, 6  ;;  %v2346_v14 = vmax.f32 %v2194_v45, %v2299_v34  ;;  %v1947_v41 = vld [vmem:[%s9034_s8 + $0x10] sm:$0xff]  ;;  %863 = vmatmul.mubr.f32.gmra.mxu0 %v696_v54  ;;  %4825 = vmatprep.mubr.msk.f32.mxu1 %vm724_vm0, %v717_v23  ;;  %v701_v23 = vld [vmem:[%s9148_s2 + $0x88] sm:$0xff] }
  0x5d   : > { %v9082_v49 = vrot.slane %v6205_v33, 6  ;;  %v6233_v17 = vmax.f32 %v2196_v52, %v2303_v48  ;;  %v9088_v46 = vrot.slane %v6225_v13, 2  ;;  %v6246_v45 = vmax.f32 %v6143_v4, %v5618_v8  ;;  %4814 = vmatprep.mubr.msk.f32.mxu0 %vm724_vm0, %v699_v56  ;;  %v698_v53 = vld [vmem:[%s9148_s2 + $0x70] sm:$0xff]  ;;  %1463 = vmatpush1.msra.mxu0 %v5755_v0 }
  0x5e   : > { %v6250_v24 = vmax.f32 %v6074_v9, %v5618_v8  ;;  %v6254_v52 = vmax.f32 %v6015_v32, %v5618_v8  ;;  %v2400_v19 = vrot.slane %v2346_v14, 2  ;;  %1464 = vmatprep.subr.mxu0 %v5762_v55  ;;  %1975 = vperm.xlu0 %5191, %v1947_v41   ;;  %v6279_v56 = vmax.f32 %v6157_v57, %v5618_v8  ;;  %v719_v55 = vld [vmem:[%s9149_s26 + $0x78] sm:$0xff] }
  0x5f   : > { %9196 = vst [vmem:[#allocation21_spill] sm:$0xff] %v6233_v17  ;;  %v6261_v50 = vsel %vm1684_vm5, %v9086_v40, %v9082_v49  ;;  %v9085_v58 = vrot.slane %v6233_v17, 2  ;;  %1465 = vmatpush1.msra.mxu0 %v5774_v2  ;;  %1018 = vmatmul.mubr.f32.gmra.mxu1 %v716_v27  ;;  %v6297_v41 = vmax.f32 %v6246_v45, %v5618_v8  ;;  %v718_v2 = vld [vmem:[%s9149_s26 + $0x70] sm:$0xff]  ;;  %v1945_v40 = vld [vmem:[%s9034_s8] sm:$0xff]  ;;  %v9208_v60 = vrot.slane %v9207_v39, 2 }
  0x60   : > { %9197 = vst [vmem:[#allocation22_spill] sm:$0xff] %v6279_v56  ;;  %v6284_v0 = vsel %vm1098_vm2, %v9088_v46, %v2400_v19  ;;  %869 = vmatmul.mubr.f32.gmra.mxu0 %v698_v53  ;;  %1466 = vmatprep.subr.mxu0 %v5790_v59  ;;  %v6308_v27 = vmax.f32 %v6250_v24, %v5618_v8  ;;  %v700_v53 = vld [vmem:[%s9148_s2 + $0x80] sm:$0xff]  ;;  %v721_v59 = vld [vmem:[%s9149_s26 + $0x88] sm:$0xff]  ;;  %v703_v46 = vld [vmem:[%s9148_s2 + $0x98] sm:$0x3f] }
  0x61   : > { %v6289_v49 = vsel %vm1098_vm2, %v2400_v19, %v9085_v58  ;;  %9199 = vst [vmem:[#allocation24_spill] sm:$0xff] %v6297_v41  ;;  %v9090_v16 = vrot.slane %v6284_v0, 2  ;;  %v6312_v19 = vmax.f32 %v6254_v52, %v5618_v8  ;;  %4815 = vmatprep.mubr.msk.f32.mxu0 %vm724_vm0, %v701_v23  ;;  %1467 = vmatpush1.msra.mxu0 %v5796_v51  ;;  %v3008_v58 = vld [vmem:[%s9202_s0] sm:$0xff] }
  0x62   : > { %9198 = vst [vmem:[#allocation23_spill] sm:$0xff] %v6289_v49  ;;  %v9089_v54 = vrot.slane %v6289_v49, 2  ;;  %9200 = vst [vmem:[#allocation25_spill] sm:$0xff] %v6308_v27  ;;  %v2895_v21 = vmax.f32 %v6279_v56, %v5618_v8  ;;  %v2896_v23 = vmax.f32 %v6297_v41, %v5618_v8  ;;  %1468 = vmatprep.subr.mxu0 %v5807_v37  ;;  %4826 = vmatprep.mubr.msk.f32.mxu1 %vm724_vm0, %v719_v55  ;;  %v720_v37 = vld [vmem:[%s9149_s26 + $0x80] sm:$0xff]  ;;  %v9094_v41 = vmov 0.0   ;;  %v3033_v49 = vld [vmem:[%s9031_s5 + $0x28] sm:$0xff] }
  0x63   : > { %9201 = vst [vmem:[#allocation26_spill] sm:$0xff] %v6312_v19  ;;  %v2897_v34 = vmax.f32 %v6308_v27, %v5618_v8  ;;  %1469 = vmatpush1.msra.mxu0 %v5824_v31  ;;  %1024 = vmatmul.mubr.f32.gmra.mxu1 %v718_v2  ;;  %v3009_v31 = vld [vmem:[%s9202_s0 + $0x8] sm:$0xff]  ;;  %v9222_v56 = vrot.slane %v6015_v32, 6 }
  0x64   : > { %v2445_v51 = vsel %vm1098_vm2, %v9090_v16, %v9089_v54  ;;  %v2898_v54 = vmax.f32 %v6312_v19, %v5618_v8  ;;  %v2939_v55 = vrot.slane %v2895_v21, 7  ;;  %v2942_v48 = vrot.slane %v2896_v23, 7  ;;  %875 = vmatmul.mubr.f32.gmra.mxu0 %v700_v53  ;;  %4827 = vmatprep.mubr.msk.f32.mxu1 %vm724_vm0, %v721_v59  ;;  %v3028_v21 = vld [vmem:[%s9031_s5] sm:$0xff]  ;;  %v3029_v2 = vld [vmem:[%s9031_s5 + $0x8] sm:$0xff] }
  0x65   : > { %v6346_v16 = vmax.f32 %v2346_v14, %v2445_v51  ;;  %v6357_v14 = vrot.slane %v2897_v34, 7  ;;  %v9203_v53 = vrot.slane %v5709_v61, 2  ;;  %v9204_v59 = vrot.slane %v5818_v6, 2  ;;  %4816 = vmatprep.mubr.msk.f32.mxu0 %vm724_vm0, %v703_v46  ;;  %v723_v6 = vld [vmem:[%s9149_s26 + $0x98] sm:$0x3f]  ;;  %1965 = vperm.xlu0 %5191, %v1945_v40  }
  0x66   : > { %v6359_v51 = vrot.slane %v2898_v54, 7  ;;  %v9205_v54 = vld [vmem:[#allocation5_spill] sm:$0xff]  ;;  %3474 = vmatprep.subr.mxu1 %v9094_v41 }
  0x67   : > { %v2283_v34 = vsel %vm1098_vm2, %v9204_v59, %v9203_v53  ;;  %v9206_v23 = vrot.slane %v9205_v54, 2  ;;  %v9209_v53 = vrot.slane %v5628_v10, 2  ;;  %v9210_v59 = vrot.slane %v5709_v61, 2  ;;  %v9213_v61 = vld [vmem:[#allocation4_spill] sm:$0xff]  ;;  %1030 = vmatmul.mubr.f32.gmra.mxu1 %v720_v37 }
  0x68   : > { %v2338_v12 = vmax.f32 %v9212_v62, %v2283_v34  ;;  %v2941_v40 = vsel %vm1583_vm3, %v2939_v55, %v6357_v14  ;;  %v2944_v10 = vsel %vm1583_vm3, %v2942_v48, %v6359_v51  ;;  %881 = vmatmul.mubr.f32.gmra.mxu0 %v702_v26  ;;  %4828 = vmatprep.mubr.msk.f32.mxu1 %vm724_vm0, %v723_v6  ;;  %v722_v48 = vld [vmem:[%s9149_s26 + $0x90] sm:$0x3f] }
  0x69   : > { %v2285_v7 = vsel %vm1098_vm2, %v9208_v60, %v9206_v23  ;;  %v2287_v39 = vsel %vm1098_vm2, %v9210_v59, %v9209_v53  ;;  %v9211_v60 = vrot.slane %v5615_v63, 2  ;;  %v9214_v59 = vld [vmem:[#allocation3_spill] sm:$0xff]  ;;  %v6409_v54 = vadd.f32 %v3008_v58, %v2941_v40  ;;  %1502 = vmatprep.mubr.f32.mxu0 %v9094_v41  ;;  %v1391_v58 = vld [vmem:[%s9033_s7] sm:$0xff]  ;;  %2005 = vperm.xlu0 %5191, %v1953_v15  }
  0x6a   : > { %v2339_v53 = vmax.f32 %v9213_v61, %v2285_v7  ;;  %v2340_v63 = vmax.f32 %v9214_v59, %v2287_v39  ;;  %v3171_v62 = vadd.f32 %v3009_v31, %v2944_v10  ;;  %v6411_v34 = vadd.f32 %v3028_v21, %v2941_v40  ;;  %v9215_v7 = vld [vmem:[#allocation2_spill] sm:$0xff] }
  0x6b   : > { %v2289_v46 = vsel %vm1098_vm2, %v9206_v23, %v9211_v60  ;;  %v3232_v60 = vadd.f32 %v3029_v2, %v2944_v10  ;;  %v2384_v39 = vrot.slane %v2338_v12, 2  ;;  %v9099_v31 = vrot.slane %v6223_v3, 2  ;;  %v9218_v10 = vld [vmem:[#allocation12_spill] sm:$0xff]  ;;  %1036 = vmatmul.mubr.f32.gmra.mxu1 %v722_v48 }
  0x6c   : > { %v2341_v55 = vmax.f32 %v9215_v7, %v2289_v46  ;;  %v2386_v23 = vrot.slane %v2339_v53, 2  ;;  %v2388_v61 = vrot.slane %v2340_v63, 2  ;;  %v6423_v26 = vsel %vm724_vm0, %v3171_v62, -inf  ;;  %v1330_v46 = vld [vmem:[%s9032_s6 + $0x48] sm:$0x3f]  ;;  %4831 = vmatmul.mubr.msk.f32.vlgmr.msra.gmra.mxu0 %vm1401_vm6, %v1391_v58 }
  0x6d   : > { %v6426_v37 = vsel %vm724_vm0, %v3232_v60, -inf  ;;  %v9216_v21 = vrot.slane %v6074_v9, 6  ;;  %v9217_v2 = vrot.slane %v6071_v18, 6  ;;  %v9219_v59 = vrot.slane %v9218_v10, 2  ;;  %v9220_v60 = vld [vmem:[#allocation8_spill] sm:$0xff]  ;;  %1378 = vperm.xlu0 %5191, %v1330_v46  }
  0x6e   : > { %v9221_v7 = vrot.slane %v9220_v60, 2  ;;  %v6453_v41 = vsel %vm1098_vm2, %v2388_v61, %v9099_v31 }
  0x6f   : > { %v6434_v6 = vsel %vm1684_vm5, %v9217_v2, %v9216_v21  ;;  %v2385_v62 = vsel %vm1098_vm2, %v9219_v59, %v2384_v39  ;;  %v2389_v21 = vsel %vm1098_vm2, %v2384_v39, %v2388_v61  ;;  %v2390_v2 = vrot.slane %v2341_v55, 2  ;;  %v1392_v61 = vld [vmem:[%s9033_s7 + $0x8] sm:$0xff] }
  0x70   : > { %v2387_v18 = vsel %vm1098_vm2, %v9221_v7, %v2386_v23  ;;  %v2424_v15 = vrot.slane %v2385_v62, 2  ;;  %v2428_v19 = vrot.slane %v2389_v21, 2  ;;  %v9223_v7 = vrot.slane %v6143_v4, 6 }
  0x71   : > { %v2426_v40 = vrot.slane %v2387_v18, 2  ;;  %v9224_v39 = vmov 0.0   ;;  %v2391_v58 = vsel %vm1098_vm2, %v2386_v23, %v2390_v2  ;;  %v9225_v62 = vrot.slane %v6094_v38, 2 }
  0x72   : > { %v6462_v48 = vsel %vm1684_vm5, %v9223_v7, %v9222_v56  ;;  %1508 = vmatprep.mubr.f32.mxu0 %v9224_v39  ;;  %v9226_v21 = vrot.slane %v5912_v5, 2  ;;  %v9227_v7 = vld [vmem:[#allocation10_spill] sm:$0xff]  ;;  %v2429_v27 = vsel %vm1098_vm2, %v2424_v15, %v2428_v19  ;;  %v2430_v46 = vrot.slane %v2391_v58, 2 }
  0x73   : > { %v6472_v18 = vsel %vm1098_vm2, %v2390_v2, %v9225_v62  ;;  %v9228_v31 = vrot.slane %v9227_v7, 2  ;;  %v9229_v23 = vrot.slane %v6453_v41, 2  ;;  %4832 = vmatmul.mubr.msk.f32.gmra.mxu0 %vm1401_vm6, %v1392_v61  ;;  %v9231_v58 = vrot.slane %v6157_v57, 6 }
  0x74   : > { %v2425_v4 = vsel %vm1098_vm2, %v9226_v21, %v2424_v15  ;;  %v9113_v2 = vrot.slane %v6472_v18, 2  ;;  %v2484_v21 = vmax.f32 %v2338_v12, %v2429_v27  ;;  %v2431_v7 = vsel %vm1098_vm2, %v2426_v40, %v2430_v46  ;;  %1514 = vmatprep.mubr.f32.mxu0 %v9224_v39  ;;  %v1393_v12 = vld [vmem:[%s9033_s7 + $0x10] sm:$0xff] }
  0x75   : > { %v2427_v59 = vsel %vm1098_vm2, %v9228_v31, %v2426_v40  ;;  %v2433_v25 = vsel %vm1098_vm2, %v2428_v19, %v9229_v23  ;;  %v2482_v62 = vmax.f32 %v9218_v10, %v2425_v4  ;;  %v2694_v31 = vrot.slane %v6462_v48, 2 }
  0x76   : > { %v2483_v5 = vmax.f32 %v9220_v60, %v2427_v59  ;;  %v6490_v56 = vmax.f32 %v2340_v63, %v2433_v25  ;;  %v9230_v15 = vrot.slane %v6250_v24, 6  ;;  %v2435_v25 = vsel %vm1098_vm2, %v2430_v46, %v9113_v2  ;;  %v3013_v2 = vld [vmem:[%s9202_s0 + $0x28] sm:$0xff] }
  0x77   : > { %v2485_v27 = vmax.f32 %v2339_v53, %v2431_v7  ;;  %v2526_v63 = vrot.slane %v2482_v62, 6  ;;  %v6507_v10 = vmax.f32 %v2341_v55, %v2435_v25  ;;  %v2530_v60 = vrot.slane %v2484_v21, 6  ;;  %4833 = vmatmul.mubr.msk.f32.gmra.mxu0 %vm1401_vm6, %v1393_v12 }
  0x78   : > { %v6498_v19 = vsel %vm1684_vm5, %v9231_v58, %v9230_v15  ;;  %v2528_v40 = vrot.slane %v2483_v5, 6  ;;  %v9103_v57 = vrot.slane %v6490_v56, 6  ;;  %v9232_v59 = vrot.slane %v6254_v52, 6  ;;  %1520 = vmatprep.mubr.f32.mxu0 %v9224_v39 }
  0x79   : > { %v9233_v61 = vrot.slane %v6246_v45, 6  ;;  %v9234_v23 = vrot.slane %v5969_v42, 6  ;;  %v9235_v53 = vrot.slane %v5882_v43, 6  ;;  %v2532_v55 = vrot.slane %v2485_v27, 6  ;;  %v1394_v43 = vld [vmem:[%s9033_s7 + $0x18] sm:$0xff] }
  0x7a   : > { %v9105_v7 = vrot.slane %v6498_v19, 2  ;;  %v2531_v58 = vsel %vm1684_vm5, %v2526_v63, %v2530_v60  ;;  %v6529_v45 = vsel %vm1684_vm5, %v2530_v60, %v9103_v57  ;;  %v9104_v42 = vrot.slane %v6507_v10, 6 }
  0x7b   : > { %v6515_v4 = vsel %vm1684_vm5, %v9233_v61, %v9232_v59  ;;  %v2527_v15 = vsel %vm1684_vm5, %v9234_v23, %v2526_v63  ;;  %v2529_v46 = vsel %vm1684_vm5, %v9235_v53, %v2528_v40  ;;  %v2533_v59 = vsel %vm1684_vm5, %v2528_v40, %v2532_v55  ;;  %4834 = vmatmul.mubr.msk.f32.gmra.mxu0 %vm1401_vm6, %v1394_v43 }
  0x7c   : > { %v2564_v25 = vrot.slane %v2527_v15, 2  ;;  %v2566_v61 = vrot.slane %v2529_v46, 2  ;;  %v2568_v12 = vrot.slane %v2531_v58, 2  ;;  %v9108_v63 = vrot.slane %v6529_v45, 2  ;;  %1526 = vmatprep.mubr.f32.mxu0 %v9224_v39 }
  0x7d   : > { %v6541_v60 = vsel %vm1684_vm5, %v2532_v55, %v9104_v42  ;;  %v9236_v23 = vrot.slane %v6030_v20, 2  ;;  %v2570_v53 = vrot.slane %v2533_v59, 2  ;;  %v6550_v57 = vsel %vm1098_vm2, %v5618_v8, %v9105_v7 }
  0x7e   : > { %v9237_v40 = vrot.slane %v5944_v30, 2  ;;  %v2569_v58 = vsel %vm1098_vm2, %v2564_v25, %v2568_v12  ;;  %v2573_v55 = vsel %vm1098_vm2, %v2568_v12, %v9108_v63  ;;  %v9107_v20 = vrot.slane %v6541_v60, 2  ;;  %v1395_v30 = vld [vmem:[%s9033_s7 + $0x20] sm:$0xff] }
  0x7f   : > { %v2565_v15 = vsel %vm1098_vm2, %v9236_v23, %v2564_v25  ;;  %v2571_v59 = vsel %vm1098_vm2, %v2566_v61, %v2570_v53  ;;  %v6562_v7 = vmax.f32 %v2484_v21, %v2569_v58  ;;  %v6574_v43 = vmax.f32 %v6490_v56, %v2573_v55  ;;  %4835 = vmatmul.mubr.msk.f32.gmra.mxu0 %vm1401_vm6, %v1395_v30  ;;  %v1396_v30 = vld [vmem:[%s9033_s7 + $0x28] sm:$0xff] }
  0x80   : > { %v2567_v46 = vsel %vm1098_vm2, %v9237_v40, %v2566_v61  ;;  %v2621_v23 = vmax.f32 %v2482_v62, %v2565_v15  ;;  %v2575_v25 = vsel %vm1098_vm2, %v2570_v53, %v9107_v20  ;;  %v6571_v12 = vmax.f32 %v2485_v27, %v2571_v59  ;;  %1532 = vmatprep.mubr.f32.mxu0 %v9224_v39  ;;  %v3015_v27 = vld [vmem:[%s9202_s0 + $0x38] sm:$0xff] }
  0x81   : > { %v2622_v42 = vmax.f32 %v2483_v5, %v2567_v46  ;;  %v9106_v62 = vrot.slane %v6515_v4, 2  ;;  %v6578_v5 = vmax.f32 %v6507_v10, %v2575_v25  ;;  %v9112_v15 = vrot.slane %v6562_v7, 6 }
  0x82   : > { %v2663_v21 = vrot.slane %v2621_v23, 6  ;;  %v9238_v40 = vmax.f32 %v6409_v54, %v6423_v26  ;;  %v9109_v53 = vrot.slane %v6571_v12, 6  ;;  %v9239_v58 = vrot.slane %v6434_v6, 2 }
  0x83   : > { %v2665_v61 = vrot.slane %v2622_v42, 6  ;;  %v2808_v46 = vsel %vm1098_vm2, %v5618_v8, %v9106_v62  ;;  %v9240_v59 = vrot.slane %v6074_v9, 6  ;;  %v9241_v26 = vrot.slane %v6015_v32, 6  ;;  %4836 = vmatmul.mubr.msk.f32.gmra.mxu0 %vm1401_vm6, %v1396_v30 }
  0x84   : > { %3192 = vmax.xlane.f32.xlu1 %v9238_v40  ;;  %v2693_v55 = vsel %vm1098_vm2, %v5618_v8, %v9239_v58  ;;  %v6604_v40 = vsel %vm1684_vm5, %v2663_v21, %v9112_v15  ;;  %v9242_v63 = vrot.slane %v6225_v13, 2  ;;  %v9243_v62 = vrot.slane %v6223_v3, 2  ;;  %1538 = vmatprep.mubr.f32.mxu0 %v9224_v39 }
  0x85   : > { %v2664_v54 = vsel %vm1684_vm5, %v9240_v59, %v2663_v21  ;;  %v2666_v25 = vsel %vm1684_vm5, %v9241_v26, %v2665_v61  ;;  %v6614_v9 = vsel %vm1684_vm5, %v2665_v61, %v9109_v53  ;;  %v9111_v59 = vrot.slane %v6604_v40, 2 }
  0x86   : > { %v2696_v32 = vrot.slane %v2664_v54, 2  ;;  %v2698_v58 = vrot.slane %v2666_v25, 2  ;;  %v9110_v21 = vrot.slane %v6614_v9, 2  ;;  %v2695_v26 = vsel %vm1098_vm2, %v5618_v8, %v2694_v31 }
  0x87   : > { %v6622_v20 = vmax.f32 %v2621_v23, %v2693_v55  ;;  %v6629_v61 = vsel %vm1098_vm2, %v9243_v62, %v9242_v63  ;;  %v9244_v54 = vrot.slane %v6434_v6, 2  ;;  %v6640_v55 = vmax.f32 %v2622_v42, %v2695_v26 }
  0x88   : > { %v2699_v53 = vsel %vm1098_vm2, %v2694_v31, %v2698_v58  ;;  %v2701_v23 = vsel %vm1098_vm2, %v2696_v32, %v9111_v59  ;;  %v2703_v63 = vsel %vm1098_vm2, %v2698_v58, %v9110_v21  ;;  %v1397_v31 = vld [vmem:[%s9033_s7 + $0x30] sm:$0xff]  ;;  %v9250_v17 = vrot.slane %v6574_v43, 6 }
  0x89   : > { %v2697_v25 = vsel %vm1098_vm2, %v9244_v54, %v2696_v32  ;;  %v6650_v62 = vmax.f32 %v6571_v12, %v2699_v53  ;;  %v6653_v48 = vmax.f32 %v6574_v43, %v2701_v23  ;;  %v6660_v42 = vmax.f32 %v6578_v5, %v2703_v63  ;;  %4837 = vmatmul.mubr.msk.f32.gmra.mxu0 %vm1401_vm6, %v1397_v31 }
  0x8a   : > { %v6647_v6 = vmax.f32 %v6562_v7, %v2697_v25  ;;  %v6665_v32 = vmax.f32 %v6622_v20, %v5618_v8  ;;  %v6669_v53 = vmax.f32 %v6640_v55, %v5618_v8  ;;  %1544 = vmatprep.mubr.f32.mxu0 %v9224_v39  ;;  %v9251_v28 = vrot.slane %v6562_v7, 6 }
  0x8b   : > { %v2850_v25 = vmax.f32 %v6650_v62, %v5618_v8  ;;  %v2851_v63 = vmax.f32 %v6653_v48, %v6550_v57  ;;  %v2852_v21 = vmax.f32 %v6660_v42, %v2808_v46  ;;  %v1398_v57 = vld [vmem:[%s9033_s7 + $0x38] sm:$0xff] }
  0x8c   : > { %9245 = vst [vmem:[#allocation5_spill] sm:$0xff] %v6665_v32  ;;  %9246 = vst [vmem:[#allocation7_spill] sm:$0xff] %v6669_v53  ;;  %v2849_v54 = vmax.f32 %v6647_v6, %v5618_v8  ;;  %v2899_v15 = vmax.f32 %v6665_v32, %v5618_v8  ;;  %v6743_v36 = vsel %vm1684_vm5, %v9251_v28, %v9250_v17  ;;  %v3010_v28 = vld [vmem:[%s9202_s0 + $0x10] sm:$0xff]  ;;  %v3011_v17 = vld [vmem:[%s9202_s0 + $0x18] sm:$0xff] }
  0x8d   : > { %v2902_v26 = vmax.f32 %v2850_v25, %v5618_v8  ;;  %v6693_v46 = vmax.f32 %v2851_v63, %v5618_v8  ;;  %v6696_v31 = vmax.f32 %v2852_v21, %v5618_v8  ;;  %v2900_v25 = vmax.f32 %v6669_v53, %v5618_v8  ;;  %v3012_v21 = vld [vmem:[%s9202_s0 + $0x20] sm:$0xff]  ;;  %4838 = vmatmul.mubr.msk.f32.gmra.mxu0 %vm1401_vm6, %v1398_v57 }
  0x8e   : > { %v2901_v58 = vmax.f32 %v2849_v54, %v5618_v8  ;;  %v3014_v54 = vld [vmem:[%s9202_s0 + $0x30] sm:$0xff]  ;;  %v2945_v63 = vrot.slane %v2899_v15, 7  ;;  %v2436_v15 = vrot.slane %v6629_v61, 2  ;;  %v9248_v61 = vrot.slane %v6162_v35, 2  ;;  %1550 = vmatprep.mubr.f32.mxu0 %v9224_v39 }
  0x8f   : > { %9247 = vst [vmem:[#allocation6_spill] sm:$0xff] %v6696_v31  ;;  %v2951_v59 = vrot.slane %v2902_v26, 7  ;;  %v3035_v26 = vld [vmem:[%s9031_s5 + $0x38] sm:$0xff]  ;;  %v2947_v30 = vrot.slane %v2900_v25, 7  ;;  %v9249_v57 = vrot.slane %v6472_v18, 2  ;;  %v9253_v18 = vrot.slane %v6696_v31, 7 }
  0x90   : > { %v2949_v23 = vrot.slane %v2901_v58, 7  ;;  %v3034_v58 = vld [vmem:[%s9031_s5 + $0x30] sm:$0xff]  ;;  %v2946_v25 = vsel %vm1583_vm3, %v6357_v14, %v2945_v63  ;;  %v9252_v14 = vrot.slane %v6693_v46, 7 }
  0x91   : > { %v2439_v32 = vsel %vm1098_vm2, %v9249_v57, %v9248_v61  ;;  %v2952_v61 = vsel %vm1583_vm3, %v2947_v30, %v2951_v59  ;;  %4839 = vmatmul.mubr.msk.f32.gmra.mxu0 %vm1401_vm6, %v1399_v22  ;;  %v1400_v22 = vld [vmem:[%s9033_s7 + $0x48] sm:$0x3f] }
  0x92   : > { %v2950_v53 = vsel %vm1583_vm3, %v2945_v63, %v2949_v23  ;;  %v2954_v35 = vsel %vm1583_vm3, %v2949_v23, %v9252_v14  ;;  %v2956_v63 = vsel %vm1583_vm3, %v2951_v59, %v9253_v18  ;;  %v3175_v23 = vadd.f32 %v3013_v2, %v2952_v61  ;;  %v3030_v59 = vld [vmem:[%s9031_s5 + $0x10] sm:$0xff]  ;;  %1556 = vmatprep.mubr.f32.mxu0 %v9224_v39 }
  0x93   : > { %v3174_v7 = vadd.f32 %v3012_v21, %v2950_v53  ;;  %v3176_v57 = vadd.f32 %v3014_v54, %v2954_v35  ;;  %v3177_v1 = vadd.f32 %v3015_v27, %v2956_v63  ;;  %v3237_v47 = vadd.f32 %v3034_v58, %v2954_v35 }
  0x94   : > { %v3238_v29 = vadd.f32 %v3035_v26, %v2956_v63  ;;  %v3235_v14 = vadd.f32 %v3032_v11, %v2950_v53  ;;  %v3236_v31 = vadd.f32 %v3033_v49, %v2952_v61  ;;  %v2948_v18 = vsel %vm1583_vm3, %v6359_v51, %v2947_v30  ;;  %v3031_v49 = vld [vmem:[%s9031_s5 + $0x18] sm:$0xff] }
  0x95   : > { %v9254_v21 = vmax.f32 %v6411_v34, %v6426_v37  ;;  %v3202_v27 = vsel %vm724_vm0, %v3177_v1, -inf  ;;  %v3172_v2 = vadd.f32 %v3010_v28, %v2946_v25  ;;  %v3173_v11 = vadd.f32 %v3011_v17, %v2948_v18  ;;  %4840 = vmatmul.mubr.msk.f32.gmra.mxu0 %vm1401_vm6, %v1400_v22 }
  0x96   : > { %v3263_v54 = vsel %vm724_vm0, %v3238_v29, -inf  ;;  %v3203_v51 = vmax.f32 %v3176_v57, %v3202_v27  ;;  %v3198_v34 = vsel %vm724_vm0, %v3175_v23, -inf  ;;  %v3259_v1 = vsel %vm724_vm0, %v3236_v31, -inf }
  0x97   : > { %3253 = vmax.xlane.f32.xlu0 %v9254_v21  ;;  %v3264_v30 = vmax.f32 %v3237_v47, %v3263_v54  ;;  %v3199_v37 = vmax.f32 %v3174_v7, %v3198_v34  ;;  %v3260_v29 = vmax.f32 %v3235_v14, %v3259_v1  ;;  %v3194_v53 = vsel %vm724_vm0, %v3173_v11, -inf }
  0x98   : > { %v3233_v58 = vadd.f32 %v3030_v59, %v2946_v25  ;;  %3204 = vmax.xlane.f32.xlu1 %v3203_v51  ;;  %v3195_v26 = vmax.f32 %v3172_v2, %v3194_v53  ;;  %v3234_v35 = vadd.f32 %v3031_v49, %v2948_v18  ;;  %v9255_v63 = vrot.slane %v6453_v41, 2 }
  0x99   : > { %v9256_v28 = vrot.slane %v6284_v0, 2  ;;  %v2489_v7 = vmax.f32 %v6094_v38, %v2439_v32  ;;  %v2704_v17 = vrot.slane %v6743_v36, 2  ;;  %v9257_v41 = vrot.slane %v6578_v5, 6 }
  0x9a   : > { %v2437_v61 = vsel %vm1098_vm2, %v9255_v63, %v2436_v15  ;;  %v3255_v57 = vsel %vm724_vm0, %v3234_v35, -inf  ;;  %v9258_v23 = vrot.slane %v6571_v12, 6  ;;  %v9260_v14 = vrot.slane %v6250_v24, 6 }
  0x9b   : > { %v2441_v47 = vsel %vm1098_vm2, %v2436_v15, %v9256_v28  ;;  %3265 = vmax.xlane.f32.xlu0 %v3264_v30  ;;  %v2488_v31 = vmax.f32 %v6223_v3, %v2437_v61  ;;  %v9259_v15 = vrot.slane %v6622_v20, 6  ;;  %v9261_v38 = vrot.slane %v6640_v55, 6 }
  0x9c   : > { %v2490_v25 = vmax.f32 %v6225_v13, %v2441_v47  ;;  %v2674_v0 = vsel %vm1684_vm5, %v9258_v23, %v9257_v41  ;;  %v9262_v13 = vrot.slane %v6254_v52, 6  ;;  %v3256_v32 = vmax.f32 %v3233_v58, %v3255_v57  ;;  %3200 = vmax.xlane.f32.xlu1 %v3199_v37 }
  0x9d   : > { %v2786_v3 = vsel %vm1684_vm5, %v9260_v14, %v9259_v15  ;;  %v2538_v18 = vrot.slane %v2488_v31, 6  ;;  %v2540_v59 = vrot.slane %v2489_v7, 6  ;;  %v9263_v12 = vrot.slane %v6604_v40, 2 }
  0x9e   : > { %v2788_v36 = vsel %vm1684_vm5, %v9262_v13, %v9261_v38  ;;  %v2542_v21 = vrot.slane %v2490_v25, 6  ;;  %v2706_v54 = vrot.slane %v2674_v0, 2  ;;  %v9264_v24 = vrot.slane %v6647_v6, 6 }
  0x9f   : > { %v2705_v27 = vsel %vm1098_vm2, %v9263_v12, %v2704_v17  ;;  %v9265_v2 = vmov %v9259_v15  ;;  %v9266_v52 = vrot.slane %v6650_v62, 6  ;;  %v9267_v49 = vmov %v9261_v38  ;;  %3261 = vmax.xlane.f32.xlu0 %v3260_v29 }
  0xa0   : > { %v6818_v11 = vsel %vm1684_vm5, %v9265_v2, %v9264_v24  ;;  %v9268_v40 = vrot.slane %v6490_v56, 6  ;;  %v9269_v30 = vrot.slane %v6507_v10, 6  ;;  %v2543_v20 = vsel %vm1684_vm5, %v2538_v18, %v2542_v21  ;;  %3196 = vmax.xlane.f32.xlu1 %v3195_v26 }
  0xa1   : > { %v6825_v22 = vsel %vm1684_vm5, %v9267_v49, %v9266_v52  ;;  %v9270_v1 = vrot.slane %v6203_v44, 6  ;;  %v2580_v58 = vrot.slane %v2543_v20, 2  ;;  %v9271_v29 = vrot.slane %v6614_v9, 2 }
  0xa2   : > { %v2539_v51 = vsel %vm1684_vm5, %v9268_v40, %v2538_v18  ;;  %v2541_v34 = vsel %vm1684_vm5, %v9269_v30, %v2540_v59  ;;  %v2809_v63 = vrot.slane %v2786_v3, 2  ;;  %v2811_v61 = vrot.slane %v2788_v36, 2 }
  0xa3   : > { %v2545_v37 = vsel %vm1684_vm5, %v2540_v59, %v9270_v1  ;;  %v2576_v53 = vrot.slane %v2539_v51, 2  ;;  %v2578_v55 = vrot.slane %v2541_v34, 2  ;;  %v2707_v56 = vsel %vm1098_vm2, %v9271_v29, %v2706_v54  ;;  %3257 = vmax.xlane.f32.xlu0 %v3256_v32 }
  0xa4   : > { %v2582_v35 = vrot.slane %v2545_v37, 2  ;;  %v2813_v10 = vrot.slane %v6818_v11, 2  ;;  %v9272_v28 = vrot.slane %v6529_v45, 2  ;;  %v9273_v57 = vrot.slane %v6541_v60, 2  ;;  %v3037_v11 = vld [vmem:[%s9031_s5 + $0x48] sm:$0xff] }
  0xa5   : > { %v2581_v23 = vsel %vm1098_vm2, %v2576_v53, %v2580_v58  ;;  %v9274_v45 = vrot.slane %v6498_v19, 2  ;;  %v9275_v60 = vrot.slane %v6515_v4, 2  ;;  %v9276_v18 = vrot.slane %v6346_v16, 6 }
  0xa6   : > { %v2577_v47 = vsel %vm1098_vm2, %v9272_v28, %v2576_v53  ;;  %v2579_v41 = vsel %vm1098_vm2, %v9273_v57, %v2578_v55  ;;  %v2583_v0 = vsel %vm1098_vm2, %v2578_v55, %v2582_v35  ;;  %v6849_v14 = vmax.f32 %v2490_v25, %v2581_v23 }
  0xa7   : > { %v2627_v9 = vmax.f32 %v2488_v31, %v2577_v47  ;;  %v2628_v15 = vmax.f32 %v2489_v7, %v2579_v41  ;;  %v6852_v3 = vmax.f32 %v6203_v44, %v2583_v0  ;;  %v2810_v26 = vsel %vm1098_vm2, %v9274_v45, %v2809_v63 }
  0xa8   : > { %v2812_v38 = vsel %vm1098_vm2, %v9275_v60, %v2811_v61  ;;  %v2814_v13 = vsel %vm1098_vm2, %v2809_v63, %v2813_v10  ;;  %v2815_v31 = vrot.slane %v6825_v22, 2  ;;  %v2679_v36 = vrot.slane %v6849_v14, 6 }
  0xa9   : > { %v2675_v7 = vrot.slane %v2627_v9, 6  ;;  %v2677_v25 = vrot.slane %v2628_v15, 6  ;;  %v2681_v44 = vrot.slane %v6852_v3, 6  ;;  %v6866_v32 = vmax.f32 %v2627_v9, %v2705_v27 }
  0xaa   : > { %v6868_v19 = vmax.f32 %v2628_v15, %v2707_v56  ;;  %v2816_v4 = vsel %vm1098_vm2, %v2811_v61, %v2815_v31  ;;  %v6876_v59 = vsel %vm1684_vm5, %v2542_v21, %v9276_v18  ;;  %v9277_v12 = vrot.slane %v6574_v43, 6  ;;  %v3036_v18 = vld [vmem:[%s9031_s5 + $0x40] sm:$0xff] }
  0xab   : > { %v9278_v2 = vrot.slane %v6578_v5, 6  ;;  %v9130_v52 = vrot.slane %v6876_v59, 2  ;;  %v9279_v49 = vrot.slane %v6261_v50, 2  ;;  %v2797_v34 = vrot.slane %v6866_v32, 6 }
  0xac   : > { %v2676_v24 = vsel %vm1684_vm5, %v9277_v12, %v2675_v7  ;;  %v2799_v21 = vrot.slane %v6868_v19, 6  ;;  %v2853_v43 = vmax.f32 %v6866_v32, %v2810_v26  ;;  %v2854_v20 = vmax.f32 %v6868_v19, %v2812_v38 }
  0xad   : > { %v2678_v27 = vsel %vm1684_vm5, %v9278_v2, %v2677_v25  ;;  %v2587_v40 = vsel %vm1098_vm2, %v2582_v35, %v9279_v49  ;;  %v2708_v51 = vrot.slane %v2676_v24, 2  ;;  %v2585_v5 = vsel %vm1098_vm2, %v2580_v58, %v9130_v52 }
  0xae   : > { %v2710_v30 = vrot.slane %v2678_v27, 2  ;;  %v6896_v1 = vmax.f32 %v6205_v33, %v2587_v40  ;;  %v6901_v55 = vmax.f32 %v6346_v16, %v2585_v5  ;;  %v6906_v35 = vsel %vm1684_vm5, %v2675_v7, %v2679_v36 }
  0xaf   : > { %v2709_v37 = vsel %vm1098_vm2, %v2704_v17, %v2708_v51  ;;  %v2905_v56 = vmax.f32 %v2853_v43, %v5618_v8  ;;  %v2906_v17 = vmax.f32 %v2854_v20, %v5618_v8  ;;  %v2712_v28 = vrot.slane %v6906_v35, 2  ;;  %v3018_v20 = vld [vmem:[%s9202_s0 + $0x50] sm:$0xff] }
  0xb0   : > { %v2711_v53 = vsel %vm1098_vm2, %v2706_v54, %v2710_v30  ;;  %v6909_v29 = vmax.f32 %v6849_v14, %v2709_v37  ;;  %v6919_v54 = vsel %vm1684_vm5, %v2677_v25, %v2681_v44  ;;  %v2683_v63 = vrot.slane %v6901_v55, 6 }
  0xb1   : > { %v6912_v58 = vmax.f32 %v6852_v3, %v2711_v53  ;;  %v2685_v61 = vrot.slane %v6896_v1, 6  ;;  %v2957_v0 = vrot.slane %v2905_v56, 7  ;;  %v2959_v9 = vrot.slane %v2906_v17, 7  ;;  %v3039_v53 = vld [vmem:[%s9031_s5 + $0x58] sm:$0xff]  ;;  %v9285_v56 = vld [vmem:[#allocation6_spill] sm:$0xff] }
  0xb2   : > { %v2801_v47 = vrot.slane %v6909_v29, 6  ;;  %v2855_v41 = vmax.f32 %v6909_v29, %v2814_v13  ;;  %v2713_v15 = vsel %vm1098_vm2, %v2708_v51, %v2712_v28  ;;  %v2714_v45 = vrot.slane %v6919_v54, 2 }
  0xb3   : > { %v2803_v57 = vrot.slane %v6912_v58, 6  ;;  %v2856_v23 = vmax.f32 %v6912_v58, %v2816_v4  ;;  %v2757_v38 = vmax.f32 %v6901_v55, %v2713_v15  ;;  %v9280_v7 = vrot.slane %v6653_v48, 6  ;;  %v3016_v4 = vld [vmem:[%s9202_s0 + $0x40] sm:$0xff] }
  0xb4   : > { %v2907_v26 = vmax.f32 %v2855_v41, %v5618_v8  ;;  %v9281_v13 = vrot.slane %v6647_v6, 6  ;;  %v2715_v12 = vsel %vm1098_vm2, %v2710_v30, %v2714_v45  ;;  %v9282_v24 = vrot.slane %v6660_v42, 6  ;;  %v3019_v30 = vld [vmem:[%s9202_s0 + $0x58] sm:$0xff] }
  0xb5   : > { %v2908_v60 = vmax.f32 %v2856_v23, %v5618_v8  ;;  %v9283_v2 = vrot.slane %v6650_v62, 6  ;;  %v9284_v49 = vrot.slane %v6693_v46, 7  ;;  %v2758_v62 = vmax.f32 %v6896_v1, %v2715_v12  ;;  %v3038_v46 = vld [vmem:[%s9031_s5 + $0x50] sm:$0xff]  ;;  %v3017_v23 = vld [vmem:[%s9202_s0 + $0x48] sm:$0xff] }
  0xb6   : > { %v6940_v25 = vsel %vm1684_vm5, %v9281_v13, %v9280_v7  ;;  %v2961_v51 = vrot.slane %v2907_v26, 7  ;;  %v9286_v17 = vrot.slane %v9285_v56, 7  ;;  %v9297_v14 = vrot.slane %v6653_v48, 6 }
  0xb7   : > { %v6956_v6 = vsel %vm1684_vm5, %v9283_v2, %v9282_v24  ;;  %v9131_v27 = vrot.slane %v6940_v25, 2  ;;  %v2958_v40 = vsel %vm1583_vm3, %v9284_v49, %v2957_v0  ;;  %v2963_v43 = vrot.slane %v2908_v60, 7 }
  0xb8   : > { %v2819_v5 = vrot.slane %v6956_v6, 2  ;;  %v2960_v41 = vsel %vm1583_vm3, %v9286_v17, %v2959_v9  ;;  %v6987_v15 = vadd.f32 %v3016_v4, %v2958_v40  ;;  %v6992_v26 = vadd.f32 %v3036_v18, %v2958_v40  ;;  %v9287_v17 = vld [vmem:[#allocation16_spill] sm:$0xff] }
  0xb9   : > { %v2818_v37 = vsel %vm1098_vm2, %v2813_v10, %v9131_v27  ;;  %v2962_v10 = vsel %vm1583_vm3, %v2957_v0, %v2961_v51  ;;  %v2964_v60 = vsel %vm1583_vm3, %v2959_v9, %v2963_v43  ;;  %v3179_v18 = vadd.f32 %v3017_v23, %v2960_v41  ;;  %v9289_v27 = vld [vmem:[#allocation20_spill] sm:$0xff] }
  0xba   : > { %v2820_v7 = vsel %vm1098_vm2, %v2815_v31, %v2819_v5  ;;  %v2857_v13 = vmax.f32 %v2757_v38, %v2818_v37  ;;  %v3180_v12 = vadd.f32 %v3018_v20, %v2962_v10  ;;  %v3181_v4 = vadd.f32 %v3019_v30, %v2964_v60  ;;  %v9291_v38 = vld [vmem:[#allocation14_spill] sm:$0xff]  ;;  %v9293_v30 = vld [vmem:[#allocation17_spill] sm:$0xff] }
  0xbb   : > { %v2858_v24 = vmax.f32 %v2758_v62, %v2820_v7  ;;  %v3241_v2 = vadd.f32 %v3038_v46, %v2962_v10  ;;  %v3242_v56 = vadd.f32 %v3039_v53, %v2964_v60  ;;  %v3240_v40 = vadd.f32 %v3037_v11, %v2960_v41  ;;  %v3020_v41 = vld [vmem:[%s9202_s0 + $0x60] sm:$0xff]  ;;  %v3021_v10 = vld [vmem:[%s9202_s0 + $0x68] sm:$0xff] }
  0xbc   : > { %v2909_v49 = vmax.f32 %v2857_v13, %v5618_v8  ;;  %v3210_v0 = vsel %vm724_vm0, %v3181_v4, -inf  ;;  %v9288_v52 = vrot.slane %v9287_v17, 2  ;;  %v9290_v22 = vrot.slane %v9289_v27, 2  ;;  %v3040_v27 = vld [vmem:[%s9031_s5 + $0x60] sm:$0xff]  ;;  %v3041_v7 = vld [vmem:[%s9031_s5 + $0x68] sm:$0xff] }
  0xbd   : > { %v2910_v9 = vmax.f32 %v2858_v24, %v5618_v8  ;;  %v9292_v20 = vrot.slane %v9291_v38, 2  ;;  %v9294_v62 = vrot.slane %v9293_v30, 2  ;;  %v3211_v37 = vmax.f32 %v3180_v12, %v3210_v0 }
  0xbe   : > { %v2307_v31 = vsel %vm1098_vm2, %v9290_v22, %v9288_v52  ;;  %v7014_v53 = vrot.slane %v2909_v49, 7  ;;  %v3271_v23 = vsel %vm724_vm0, %v3242_v56, -inf  ;;  %v3206_v52 = vsel %vm724_vm0, %v3179_v18, -inf  ;;  %v9295_v49 = vld [vmem:[#allocation15_spill] sm:$0xff]  ;;  %v9296_v18 = vld [vmem:[#allocation13_spill] sm:$0xff] }
  0xbf   : > { %v2309_v46 = vsel %vm1098_vm2, %v9294_v62, %v9292_v20  ;;  %v7024_v11 = vrot.slane %v2910_v9, 7  ;;  %v3272_v60 = vmax.f32 %v3241_v2, %v3271_v23  ;;  %v3207_v13 = vmax.f32 %v6987_v15, %v3206_v52  ;;  %3212 = vmax.xlane.f32.xlu1 %v3211_v37 }
  0xc0   : > { %v7034_v12 = vsel %vm724_vm0, %v3240_v40, -inf  ;;  %v2966_v4 = vsel %vm1583_vm3, %v2961_v51, %v7014_v53  ;;  %v2350_v56 = vmax.f32 %v9295_v49, %v2307_v31  ;;  %v2351_v2 = vmax.f32 %v9296_v18, %v2309_v46 }
  0xc1   : > { %v3268_v24 = vmax.f32 %v6992_v26, %v7034_v12  ;;  %v2968_v0 = vsel %vm1583_vm3, %v2963_v43, %v7024_v11  ;;  %v3182_v9 = vadd.f32 %v3020_v41, %v2966_v4  ;;  %v3243_v22 = vadd.f32 %v3040_v27, %v2966_v4  ;;  %v9301_v27 = vld [vmem:[#allocation18_spill] sm:$0xff] }
  0xc2   : > { %v7049_v15 = vsel %vm1684_vm5, %v2679_v36, %v2683_v63  ;;  %v3183_v51 = vadd.f32 %v3021_v10, %v2968_v0  ;;  %v3244_v40 = vadd.f32 %v3041_v7, %v2968_v0  ;;  %v2408_v20 = vrot.slane %v2350_v56, 2 }
  0xc3   : > { %v2410_v30 = vrot.slane %v2351_v2, 2  ;;  %v7056_v31 = vsel %vm1684_vm5, %v2681_v44, %v2685_v61  ;;  %v2716_v43 = vrot.slane %v7049_v15, 2  ;;  %v2798_v36 = vsel %vm1684_vm5, %v9297_v14, %v2797_v34  ;;  %3273 = vmax.xlane.f32.xlu1 %v3272_v60  ;;  %v9299_v44 = vld [vmem:[#allocation21_spill] sm:$0xff] }
  0xc4   : > { %v9298_v62 = vrot.slane %v6660_v42, 6  ;;  %v3214_v37 = vsel %vm724_vm0, %v3183_v51, -inf  ;;  %v3275_v3 = vsel %vm724_vm0, %v3244_v40, -inf  ;;  %v9300_v41 = vrot.slane %v9299_v44, 2  ;;  %v9303_v51 = vld [vmem:[#allocation23_spill] sm:$0xff] }
  0xc5   : > { %v9302_v52 = vrot.slane %v9301_v27, 2  ;;  %v3215_v10 = vmax.f32 %v3182_v9, %v3214_v37  ;;  %v3276_v7 = vmax.f32 %v3243_v22, %v3275_v3  ;;  %v7077_v42 = vrot.slane %v2408_v20, 2  ;;  %v9305_v22 = vld [vmem:[#allocation19_spill] sm:$0xff] }
  0xc6   : > { %v2800_v46 = vsel %vm1684_vm5, %v9298_v62, %v2799_v21  ;;  %v2409_v23 = vsel %vm1098_vm2, %v9300_v41, %v2408_v20  ;;  %v7079_v18 = vrot.slane %v2410_v30, 2  ;;  %v2717_v60 = vsel %vm1098_vm2, %v2712_v28, %v2716_v43 }
  0xc7   : > { %v2411_v48 = vsel %vm1098_vm2, %v9302_v52, %v2410_v30  ;;  %v2448_v4 = vrot.slane %v2409_v23, 2  ;;  %v2718_v0 = vrot.slane %v7056_v31, 2  ;;  %3216 = vmax.xlane.f32.xlu0 %v3215_v10  ;;  %v9304_v40 = vrot.slane %v9303_v51, 2  ;;  %3208 = vmax.xlane.f32.xlu1 %v3207_v13 }
  0xc8   : > { %v2450_v49 = vrot.slane %v2411_v48, 2  ;;  %v9306_v14 = vrot.slane %v9305_v22, 2  ;;  %v7098_v30 = vsel %vm1684_vm5, %v2797_v34, %v2801_v47  ;;  %v7105_v35 = vsel %vm1684_vm5, %v2799_v21, %v2803_v57 }
  0xc9   : > { %v2449_v9 = vsel %vm1098_vm2, %v9304_v40, %v2448_v4  ;;  %v2453_v28 = vsel %vm1098_vm2, %v2448_v4, %v7077_v42  ;;  %v2719_v19 = vsel %vm1098_vm2, %v2714_v45, %v2718_v0  ;;  %v2821_v21 = vrot.slane %v2798_v36, 2  ;;  %v9310_v4 = vld [vmem:[#allocation25_spill] sm:$0xff] }
  0xca   : > { %v2451_v20 = vsel %vm1098_vm2, %v9306_v14, %v2450_v49  ;;  %v2455_v62 = vsel %vm1098_vm2, %v2450_v49, %v7079_v18  ;;  %v2494_v29 = vmax.f32 %v9299_v44, %v2449_v9  ;;  %v2496_v34 = vmax.f32 %v2350_v56, %v2453_v28  ;;  %v9312_v49 = vld [vmem:[#allocation22_spill] sm:$0xff] }
  0xcb   : > { %v2495_v32 = vmax.f32 %v9301_v27, %v2451_v20  ;;  %v2497_v47 = vmax.f32 %v2351_v2, %v2455_v62  ;;  %v2823_v13 = vrot.slane %v2800_v46, 2  ;;  %v2825_v37 = vrot.slane %v7098_v30, 2  ;;  %3277 = vmax.xlane.f32.xlu0 %v3276_v7  ;;  %v9316_v20 = vld [vmem:[#allocation26_spill] sm:$0xff]  ;;  %v9318_v62 = vld [vmem:[#allocation24_spill] sm:$0xff] }
  0xcc   : > { %v2550_v58 = vrot.slane %v2494_v29, 6  ;;  %v2554_v3 = vrot.slane %v2496_v34, 6  ;;  %v9307_v44 = vrot.slane %v6940_v25, 2  ;;  %v2827_v2 = vrot.slane %v7105_v35, 2  ;;  %v3023_v35 = vld [vmem:[%s9202_s0 + $0x78] sm:$0xff] }
  0xcd   : > { %v2552_v57 = vrot.slane %v2495_v32, 6  ;;  %v2556_v41 = vrot.slane %v2497_v47, 6  ;;  %v9308_v23 = vrot.slane %v6346_v16, 6  ;;  %v9309_v45 = vrot.slane %v6205_v33, 6 }
  0xce   : > { %v2822_v56 = vsel %vm1098_vm2, %v9307_v44, %v2821_v21  ;;  %v2824_v46 = vsel %vm1098_vm2, %v2819_v5, %v2823_v13  ;;  %v2826_v25 = vsel %vm1098_vm2, %v2821_v21, %v2825_v37  ;;  %v2555_v27 = vsel %vm1684_vm5, %v2550_v58, %v2554_v3 }
  0xcf   : > { %v2551_v54 = vsel %vm1684_vm5, %v9308_v23, %v2550_v58  ;;  %v2553_v36 = vsel %vm1684_vm5, %v9309_v45, %v2552_v57  ;;  %v2557_v52 = vsel %vm1684_vm5, %v2552_v57, %v2556_v41  ;;  %v2592_v10 = vrot.slane %v2555_v27, 2  ;;  %3269 = vmax.xlane.f32.xlu0 %v3268_v24  ;;  %v9320_v57 = vld [vmem:[#allocation5_spill] sm:$0xff]  ;;  %v9323_v23 = vld [vmem:[#allocation7_spill] sm:$0xff] }
  0xd0   : > { %v2588_v48 = vrot.slane %v2551_v54, 2  ;;  %v2590_v16 = vrot.slane %v2553_v36, 2  ;;  %v2594_v7 = vrot.slane %v2557_v52, 2  ;;  %v2828_v33 = vsel %vm1098_vm2, %v2823_v13, %v2827_v2 }
  0xd1   : > { %v9311_v6 = vrot.slane %v9310_v4, 6  ;;  %v9313_v5 = vrot.slane %v9312_v49, 6  ;;  %v9314_v40 = vrot.slane %v6876_v59, 2  ;;  %v9315_v22 = vrot.slane %v6261_v50, 2 }
  0xd2   : > { %v9317_v28 = vrot.slane %v9316_v20, 6  ;;  %v9319_v21 = vrot.slane %v9318_v62, 6  ;;  %v9321_v13 = vrot.slane %v9320_v57, 6  ;;  %v2593_v59 = vsel %vm1098_vm2, %v2588_v48, %v2592_v10 }
  0xd3   : > { %v2873_v51 = vsel %vm1684_vm5, %v9313_v5, %v9311_v6  ;;  %v2589_v9 = vsel %vm1098_vm2, %v9314_v40, %v2588_v48  ;;  %v2591_v14 = vsel %vm1098_vm2, %v9315_v22, %v2590_v16  ;;  %v9322_v3 = vmov %v9311_v6 }
  0xd4   : > { %v2876_v58 = vsel %vm1684_vm5, %v9319_v21, %v9317_v28  ;;  %v2878_v26 = vsel %vm1684_vm5, %v9322_v3, %v9321_v13  ;;  %v2595_v12 = vsel %vm1098_vm2, %v2590_v16, %v2594_v7  ;;  %v2633_v24 = vmax.f32 %v2494_v29, %v2589_v9 }
  0xd5   : > { %v2634_v50 = vmax.f32 %v2495_v32, %v2591_v14  ;;  %v2635_v41 = vmax.f32 %v2496_v34, %v2593_v59  ;;  %v2636_v44 = vmax.f32 %v2497_v47, %v2595_v12  ;;  %v9324_v54 = vrot.slane %v9323_v23, 6 }
  0xd6   : > { %v9325_v45 = vmov %v9317_v28  ;;  %v2881_v27 = vrot.slane %v2873_v51, 2  ;;  %v2687_v52 = vrot.slane %v2633_v24, 6  ;;  %v2759_v4 = vmax.f32 %v2633_v24, %v2717_v60 }
  0xd7   : > { %v2880_v36 = vsel %vm1684_vm5, %v9325_v45, %v9324_v54  ;;  %v2689_v6 = vrot.slane %v2634_v50, 6  ;;  %v2760_v49 = vmax.f32 %v2634_v50, %v2719_v19  ;;  %v2883_v5 = vrot.slane %v2876_v58, 2 }
  0xd8   : > { %v2882_v48 = vsel %vm1098_vm2, %v5618_v8, %v2881_v27  ;;  %v2885_v16 = vrot.slane %v2878_v26, 2  ;;  %v2887_v29 = vrot.slane %v2880_v36, 2  ;;  %v2688_v32 = vsel %vm1684_vm5, %v2683_v63, %v2687_v52 }
  0xd9   : > { %v2690_v34 = vsel %vm1684_vm5, %v2685_v61, %v2689_v6  ;;  %v2859_v47 = vmax.f32 %v2759_v4, %v2822_v56  ;;  %v2860_v51 = vmax.f32 %v2760_v49, %v2824_v46  ;;  %v2720_v40 = vrot.slane %v2688_v32, 2  ;;  %v9327_v61 = vld [vmem:[#allocation11_spill] sm:$0xff]  ;;  %v9329_v46 = vld [vmem:[#allocation9_spill] sm:$0xff] }
  0xda   : > { %v2722_v9 = vrot.slane %v2690_v34, 2  ;;  %v2884_v60 = vsel %vm1098_vm2, %v5618_v8, %v2883_v5  ;;  %v2886_v19 = vsel %vm1098_vm2, %v2881_v27, %v2885_v16  ;;  %v2888_v22 = vsel %vm1098_vm2, %v2883_v5, %v2887_v29  ;;  %v3027_v4 = vld [vmem:[%s9202_s0 + $0x98] sm:$0x3f]  ;;  %v3046_v5 = vld [vmem:[%s9031_s5 + $0x90] sm:$0x3f] }
  0xdb   : > { %v2911_v14 = vmax.f32 %v2859_v47, %v2882_v48  ;;  %v2912_v20 = vmax.f32 %v2860_v51, %v2884_v60  ;;  %v2721_v55 = vsel %vm1098_vm2, %v2716_v43, %v2720_v40  ;;  %v9326_v63 = vrot.slane %v9287_v17, 2 }
  0xdc   : > { %v2723_v1 = vsel %vm1098_vm2, %v2718_v0, %v2722_v9  ;;  %v9328_v8 = vrot.slane %v9291_v38, 2  ;;  %v2761_v62 = vmax.f32 %v2635_v41, %v2721_v55 }
  0xdd   : > { %v2352_v56 = vmax.f32 %v9327_v61, %v9326_v63  ;;  %v2762_v21 = vmax.f32 %v2636_v44, %v2723_v1  ;;  %v2969_v58 = vrot.slane %v2911_v14, 7  ;;  %v2971_v57 = vrot.slane %v2912_v20, 7 }
  0xde   : > { %v2353_v28 = vmax.f32 %v9329_v46, %v9328_v8  ;;  %v2861_v13 = vmax.f32 %v2761_v62, %v2826_v25 }
  0xdf   : > { %v2498_v15 = vmax.f32 %v2352_v56, %v7077_v42  ;;  %v2862_v31 = vmax.f32 %v2762_v21, %v2828_v33  ;;  %v7199_v0 = vsel %vm1583_vm3, %v7014_v53, %v2969_v58  ;;  %v7203_v17 = vsel %vm1583_vm3, %v7024_v11, %v2971_v57  ;;  %v3025_v53 = vld [vmem:[%s9202_s0 + $0x88] sm:$0xff]  ;;  %v1991_v21 = vpop.permute.xlu0 %1990 }
  0xe0   : > { %v2499_v43 = vmax.f32 %v2353_v28, %v7079_v18  ;;  %9330 = vst [vmem:[#allocation4_spill] sm:$0xff] %v7199_v0  ;;  %9331 = vst [vmem:[#allocation3_spill] sm:$0xff] %v7203_v17  ;;  %v2913_v26 = vmax.f32 %v2861_v13, %v2886_v19  ;;  %v3024_v18 = vld [vmem:[%s9202_s0 + $0x80] sm:$0xff]  ;;  %v3185_v32 = vadd.f32 %v3023_v35, %v7203_v17 }
  0xe1   : > { %v2637_v38 = vmax.f32 %v2498_v15, %v2592_v10  ;;  %v2914_v59 = vmax.f32 %v2862_v31, %v2888_v22  ;;  %v3044_v10 = vld [vmem:[%s9031_s5 + $0x80] sm:$0xff] }
  0xe2   : > { %v2638_v3 = vmax.f32 %v2499_v43, %v2594_v7  ;;  %v2973_v50 = vrot.slane %v2913_v26, 7  ;;  %v3045_v7 = vld [vmem:[%s9031_s5 + $0x88] sm:$0xff]  ;;  %v3218_v1 = vsel %vm724_vm0, %v3185_v32, -inf }
  0xe3   : > { %v2763_v12 = vmax.f32 %v2637_v38, %v2720_v40  ;;  %v2975_v42 = vrot.slane %v2914_v59, 7  ;;  %v3022_v40 = vld [vmem:[%s9202_s0 + $0x70] sm:$0xff]  ;;  %v1996_v43 = vpop.permute.xlu0 %1995 }
  0xe4   : > { %v2764_v24 = vmax.f32 %v2638_v3, %v2722_v9  ;;  %v2974_v33 = vsel %vm1583_vm3, %v2969_v58, %v2973_v50  ;;  %v3184_v55 = vadd.f32 %v3022_v40, %v7199_v0  ;;  %v1955_v58 = vlaneseq  ;;  %v5280_v3 = vld [vmem:[%s5502_s30 + $0x98] sm:$0xff]  ;;  %v5281_v59 = vld [vmem:[%s5502_s30 + $0x90] sm:$0xff] }
  0xe5   : > { %v2863_v11 = vmax.f32 %v2763_v12, %v2825_v37  ;;  %v2976_v41 = vsel %vm1583_vm3, %v2971_v57, %v2975_v42  ;;  %v3186_v44 = vadd.f32 %v3024_v18, %v2974_v33  ;;  %v3026_v37 = vld [vmem:[%s9202_s0 + $0x90] sm:$0x3f]  ;;  %v1986_v57 = vpop.permute.xlu1 %1985 }
  0xe6   : > { %v2864_v25 = vmax.f32 %v2764_v24, %v2827_v2  ;;  %v3187_v23 = vadd.f32 %v3025_v53, %v2976_v41  ;;  %v3247_v2 = vadd.f32 %v3044_v10, %v2974_v33  ;;  %v3248_v45 = vadd.f32 %v3045_v7, %v2976_v41 }
  0xe7   : > { %v2915_v54 = vmax.f32 %v2863_v11, %v2885_v16  ;;  %v3047_v16 = vld [vmem:[%s9031_s5 + $0x98] sm:$0x3f]  ;;  %v3219_v62 = vmax.f32 %v3184_v55, %v3218_v1  ;;  %v7254_v15 = vshrl.u32 %v1955_v58, 7  ;;  %v1976_v38 = vpop.permute.xlu0 %1975 }
  0xe8   : > { %v2916_v30 = vmax.f32 %v2864_v25, %v2887_v29  ;;  %v3222_v36 = vsel %vm724_vm0, %v3187_v23, -inf  ;;  %v3283_v29 = vsel %vm724_vm0, %v3248_v45, -inf  ;;  %v5286_v55 = vld [vmem:[%s9148_s2 + $0x18] sm:$0xff] }
  0xe9   : > { %v2977_v27 = vrot.slane %v2915_v54, 7  ;;  %v3001_v6 = vrot.slane %v2915_v54, 6  ;;  %v3223_v49 = vmax.f32 %v3186_v44, %v3222_v36  ;;  %v3284_v51 = vmax.f32 %v3247_v2, %v3283_v29  ;;  %9332 = vst [vmem:[#allocation2_spill] sm:$0xff] %v7254_v15  ;;  %v1981_v13 = vpop.permute.xlu1 %1980  ;;  %v5284_v36 = vld [vmem:[%s9149_s26 + $0x8] sm:$0xff] }
  0xea   : > { %v2979_v52 = vrot.slane %v2916_v30, 7  ;;  %v3002_v48 = vrot.slane %v2916_v30, 6  ;;  %v1957_v31 = vsub.s32 6, %v7254_v15  ;;  %v5282_v30 = vld [vmem:[%s9148_s2] sm:$0xff] }
  0xeb   : > { %v2978_v34 = vsel %vm1583_vm3, %v2973_v50, %v2977_v27  ;;  %3224 = vmax.xlane.f32.xlu1 %v3223_v49  ;;  %v1966_v10 = vpop.permute.xlu0 %1965 }
  0xec   : > { %v2980_v47 = vsel %vm1583_vm3, %v2975_v42, %v2979_v52  ;;  %v3006_v9 = vsel %vm3005_vm7, %v2978_v34, %v3001_v6  ;;  %v7258_v26 = vrot.slane %v5280_v3, %v1957_v31  ;;  %v7261_v12 = vrot.slane %v5281_v59, %v1957_v31 }
  0xed   : > { %v3007_v60 = vsel %vm3005_vm7, %v2980_v47, %v3002_v48  ;;  %v3188_v19 = vadd.f32 %v3026_v37, %v3006_v9  ;;  %v3249_v14 = vadd.f32 %v3046_v5, %v3006_v9  ;;  %v1971_v24 = vpop.permute.xlu1 %1970  ;;  %v5283_v37 = vld [vmem:[%s9148_s2 + $0x8] sm:$0xff] }
  0xee   : > { %v3189_v22 = vadd.f32 %v3027_v4, %v3007_v60  ;;  %v3250_v20 = vadd.f32 %v3047_v16, %v3007_v60  ;;  %9333 = vst [vmem:[#allocation12_spill] sm:$0xff] %v7258_v26  ;;  %9334 = vst [vmem:[#allocation8_spill] sm:$0xff] %v7261_v12  ;;  %v7264_v18 = vadd.f32 %v1986_v57, %v7261_v12 }
  0xef   : > { %v3226_v63 = vsel %vm1098_vm2, %v3188_v19, -inf  ;;  %v3287_v56 = vsel %vm1098_vm2, %v3249_v14, -inf  ;;  %v7267_v53 = vadd.f32 %v1986_v57, %v7258_v26  ;;  %v7270_v11 = vadd.f32 %v1981_v13, %v7261_v12  ;;  %v5285_v14 = vld [vmem:[%s9149_s26] sm:$0xff] }
  0xf0   : > { %v3227_v61 = vsel %vm1100_vm8, %v3189_v22, -inf  ;;  %v3288_v8 = vsel %vm1100_vm8, %v3250_v20, -inf  ;;  %v7273_v25 = vadd.f32 %v1981_v13, %v7258_v26  ;;  %v7276_v41 = vadd.f32 %v1971_v24, %v7261_v12 }
  0xf1   : > { %v3228_v46 = vmax.f32 %v3226_v63, %v3227_v61  ;;  %v3289_v28 = vmax.f32 %v3287_v56, %v3288_v8  ;;  %v7279_v44 = vadd.f32 %v1971_v24, %v7258_v26  ;;  %v7282_v23 = vadd.f32 %v1991_v21, %v7261_v12  ;;  %v2011_v52 = vpop.permute.xlu1 %2010  ;;  %v2006_v56 = vpop.permute.xlu0 %2005 }
  0xf2   : > { %v7285_v54 = vadd.f32 %v1991_v21, %v7258_v26  ;;  %v7297_v5 = vadd.f32 %v2011_v52, %v7261_v12  ;;  %v7300_v16 = vadd.f32 %v1996_v43, %v7261_v12  ;;  %v7304_v32 = vadd.f32 %v2011_v52, %v7258_v26 }
  0xf3   : > { %3229 = vmax.xlane.f32.xlu0 %v3228_v46  ;;  %3290 = vmax.xlane.f32.xlu1 %v3289_v28  ;;  %v7307_v34 = vadd.f32 %v1996_v43, %v7258_v26  ;;  %v7310_v47 = vadd.f32 %v1976_v38, %v7261_v12  ;;  %v7314_v19 = vadd.f32 %v1976_v38, %v7258_v26  ;;  %v5287_v28 = vld [vmem:[%s9149_s26 + $0x18] sm:$0xff]  ;;  %v5288_v43 = vld [vmem:[%s9148_s2 + $0x10] sm:$0xff] }
  0xf4   : > { %9335 = vst [vmem:[#allocation10_spill] sm:$0xff] %v7297_v5  ;;  %9336 = vst [vmem:[#allocation6_spill] sm:$0xff] %v7304_v32  ;;  %v7317_v22 = vadd.f32 %v1966_v10, %v7261_v12  ;;  %v7331_v57 = vadd.f32 %v1966_v10, %v7258_v26  ;;  %v5289_v38 = vld [vmem:[%s9149_s26 + $0x10] sm:$0xff]  ;;  %v7340_v59 = vadd.f32 %v2006_v56, %v7261_v12 }
  0xf5   : > { %9337 = vst [vmem:[#allocation16_spill] sm:$0xff] %v7307_v34 }
  0xf6   : > { %9338 = vst [vmem:[#allocation20_spill] sm:$0xff] %v7340_v59 }
  0xf7   : > { %3285 = vmax.xlane.f32.xlu0 %v3284_v51  ;;  %3220 = vmax.xlane.f32.xlu1 %v3219_v62 }
 0x102   : > { %v828_v50 = vpop.f32.mrf.mxu0 }
 0x103   : > { %v983_v42 = vpop.f32.mrf.mxu1  ;;  %v1042_v35 = vmul.f32 %v5282_v30, %v828_v50  ;;  %v1105_v20 = vmul.f32 %v5285_v14, %v828_v50 }
 0x104   : > { %v830_v7 = vpop.f32.mrf.mxu0  ;;  %v1166_v6 = vmul.f32 %v5282_v30, %v983_v42  ;;  %v1227_v8 = vmul.f32 %v5285_v14, %v983_v42  ;;  %v5290_v30 = vld [vmem:[%s9148_s2 + $0x28] sm:$0xff] }
 0x105   : > { %v985_v33 = vpop.f32.mrf.mxu1  ;;  %v1043_v2 = vmul.f32 %v5283_v37, %v830_v7  ;;  %v1106_v4 = vmul.f32 %v5284_v36, %v830_v7 }
 0x106   : > { %v1167_v45 = vmul.f32 %v5283_v37, %v985_v33  ;;  %v1228_v27 = vmul.f32 %v5284_v36, %v985_v33  ;;  %v5291_v37 = vld [vmem:[%s9149_s26 + $0x28] sm:$0xff]  ;;  %v7351_v36 = vadd.f32 %v2006_v56, %v7258_v26 }
 0x107   : > { %v834_v49 = vpop.f32.mrf.mxu0  ;;  %v989_v48 = vpop.f32.mrf.mxu1  ;;  %v1062_v9 = vsel %vm724_vm0, %v1043_v2, 0.0  ;;  %v1125_v21 = vsel %vm724_vm0, %v1106_v4, 0.0 }
 0x108   : > { %v1186_v29 = vsel %vm724_vm0, %v1167_v45, 0.0  ;;  %v1063_v63 = vadd.f32 %v1062_v9, %v1042_v35  ;;  %v1247_v61 = vsel %vm724_vm0, %v1228_v27, 0.0  ;;  %v1044_v13 = vmul.f32 %v5288_v43, %v834_v49  ;;  %9339 = vst [vmem:[#allocation14_spill] sm:$0xff] %v7351_v36 }
 0x109   : > { %v836_v51 = vpop.f32.mrf.mxu0  ;;  %v1187_v40 = vadd.f32 %v1186_v29, %v1166_v6  ;;  %v991_v60 = vpop.f32.mrf.mxu1  ;;  %v1229_v3 = vmul.f32 %v5289_v38, %v989_v48  ;;  %v1248_v42 = vadd.f32 %v1247_v61, %v1227_v8  ;;  %v1126_v45 = vadd.f32 %v1125_v21, %v1105_v20  ;;  %v5292_v6 = vld [vmem:[%s9148_s2 + $0x20] sm:$0xff]  ;;  %v5294_v8 = vld [vmem:[%s9148_s2 + $0x30] sm:$0xff] }
 0x10a   : > { %v1045_v1 = vmul.f32 %v5286_v55, %v836_v51  ;;  %v1230_v62 = vmul.f32 %v5287_v28, %v991_v60  ;;  %v1108_v31 = vmul.f32 %v5287_v28, %v836_v51  ;;  %1064 = vadd.xlane.f32.xlu0 %v1063_v63  ;;  %v1169_v50 = vmul.f32 %v5286_v55, %v991_v60  ;;  %v5293_v29 = vld [vmem:[%s9149_s26 + $0x20] sm:$0xff]  ;;  %v5295_v28 = vld [vmem:[%s9149_s26 + $0x30] sm:$0xff] }
 0x10b   : > { %1188 = vadd.xlane.f32.xlu1 %v1187_v40  ;;  %v840_v46 = vpop.f32.mrf.mxu0  ;;  %v995_v58 = vpop.f32.mrf.mxu1  ;;  %v1107_v27 = vmul.f32 %v5289_v38, %v834_v49  ;;  %v1168_v52 = vmul.f32 %v5288_v43, %v989_v48 }
 0x10c   : > { %v1251_v10 = vsel %vm724_vm0, %v1230_v62, 0.0  ;;  %v1066_v7 = vsel %vm724_vm0, %v1045_v1, 0.0  ;;  %v1046_v4 = vmul.f32 %v5292_v6, %v840_v46  ;;  %v1109_v51 = vmul.f32 %v5293_v29, %v840_v46 }
 0x10d   : > { %v842_v24 = vpop.f32.mrf.mxu0  ;;  %v997_v33 = vpop.f32.mrf.mxu1  ;;  %v1252_v60 = vadd.f32 %v1251_v10, %v1229_v3  ;;  %v1067_v14 = vadd.f32 %v1066_v7, %v1044_v13  ;;  %v1129_v20 = vsel %vm724_vm0, %v1108_v31, 0.0  ;;  %v1170_v55 = vmul.f32 %v5292_v6, %v995_v58  ;;  %v5296_v13 = vld [vmem:[%s9148_s2 + $0x38] sm:$0xff] }
 0x10e   : > { %v1047_v35 = vmul.f32 %v5290_v30, %v842_v24  ;;  %v1110_v2 = vmul.f32 %v5291_v37, %v842_v24  ;;  %1127 = vadd.xlane.f32.xlu0 %v1126_v45  ;;  %v1171_v1 = vmul.f32 %v5290_v30, %v997_v33  ;;  %v1232_v63 = vmul.f32 %v5291_v37, %v997_v33 }
 0x10f   : > { %1249 = vadd.xlane.f32.xlu1 %v1248_v42  ;;  %v846_v40 = vpop.f32.mrf.mxu0  ;;  %v1001_v9 = vpop.f32.mrf.mxu1  ;;  %v1190_v61 = vsel %vm724_vm0, %v1169_v50, 0.0  ;;  %v1231_v21 = vmul.f32 %v5293_v29, %v995_v58  ;;  %v1130_v3 = vadd.f32 %v1129_v20, %v1107_v27  ;;  %v5297_v50 = vld [vmem:[%s9149_s26 + $0x38] sm:$0xff] }
 0x110   : > { %v1070_v49 = vsel %vm724_vm0, %v1047_v35, 0.0  ;;  %v1048_v46 = vmul.f32 %v5294_v8, %v846_v40  ;;  %v1111_v62 = vmul.f32 %v5295_v28, %v846_v40  ;;  %v1133_v43 = vsel %vm724_vm0, %v1110_v2, 0.0  ;;  %v5299_v40 = vld [vmem:[%s9149_s26 + $0x40] sm:$0xff] }
 0x111   : > { %v848_v48 = vpop.f32.mrf.mxu0  ;;  %v1003_v56 = vpop.f32.mrf.mxu1  ;;  %v1071_v24 = vadd.f32 %v1070_v49, %v1046_v4  ;;  %v1172_v58 = vmul.f32 %v5294_v8, %v1001_v9  ;;  %v1233_v33 = vmul.f32 %v5295_v28, %v1001_v9  ;;  %v1191_v30 = vadd.f32 %v1190_v61, %v1168_v52  ;;  %v5298_v4 = vld [vmem:[%s9148_s2 + $0x40] sm:$0xff]  ;;  %v5300_v52 = vld [vmem:[%s9148_s2 + $0x48] sm:$0xff] }
 0x112   : > { %v1049_v31 = vmul.f32 %v5296_v13, %v848_v48  ;;  %v1234_v42 = vmul.f32 %v5297_v50, %v1003_v56  ;;  %v1112_v7 = vmul.f32 %v5297_v50, %v848_v48  ;;  %1253 = vadd.xlane.f32.xlu0 %v1252_v60  ;;  %v1134_v37 = vadd.f32 %v1133_v43, %v1109_v51  ;;  %v5301_v9 = vld [vmem:[%s9149_s26 + $0x48] sm:$0xff] }
 0x113   : > { %1068 = vadd.xlane.f32.xlu1 %v1067_v14  ;;  %v852_v38 = vpop.f32.mrf.mxu0  ;;  %v1173_v2 = vmul.f32 %v5296_v13, %v1003_v56  ;;  %v1194_v45 = vsel %vm724_vm0, %v1171_v1, 0.0  ;;  %v1255_v6 = vsel %vm724_vm0, %v1232_v63, 0.0 }
 0x114   : > { %v1007_v10 = vpop.f32.mrf.mxu1  ;;  %v1050_v29 = vmul.f32 %v5298_v4, %v852_v38  ;;  %v1113_v60 = vmul.f32 %v5299_v40, %v852_v38  ;;  %v1259_v1 = vsel %vm724_vm0, %v1234_v42, 0.0  ;;  %v1074_v63 = vsel %vm724_vm0, %v1049_v31, 0.0  ;;  %v5302_v42 = vld [vmem:[%s9148_s2 + $0x58] sm:$0xff] }
 0x115   : > { %v854_v35 = vpop.f32.mrf.mxu0  ;;  %v1174_v48 = vmul.f32 %v5298_v4, %v1007_v10  ;;  %v1235_v61 = vmul.f32 %v5299_v40, %v1007_v10  ;;  %v1195_v56 = vadd.f32 %v1194_v45, %v1170_v55  ;;  %v1137_v28 = vsel %vm724_vm0, %v1112_v7, 0.0  ;;  %v5303_v55 = vld [vmem:[%s9149_s26 + $0x58] sm:$0xff]  ;;  %v5304_v7 = vld [vmem:[%s9148_s2 + $0x50] sm:$0xff] }
 0x116   : > { %v1009_v27 = vpop.f32.mrf.mxu1  ;;  %v1051_v51 = vmul.f32 %v5300_v52, %v854_v35  ;;  %v1114_v20 = vmul.f32 %v5301_v9, %v854_v35  ;;  %1072 = vadd.xlane.f32.xlu0 %v1071_v24  ;;  %v1256_v13 = vadd.f32 %v1255_v6, %v1231_v21  ;;  %v1198_v50 = vsel %vm724_vm0, %v1173_v2, 0.0  ;;  %v5305_v45 = vld [vmem:[%s9149_s26 + $0x50] sm:$0xff] }
 0x117   : > { %v1236_v14 = vmul.f32 %v5301_v9, %v1009_v27  ;;  %1131 = vadd.xlane.f32.xlu1 %v1130_v3  ;;  %v858_v49 = vpop.f32.mrf.mxu0  ;;  %v1175_v8 = vmul.f32 %v5300_v52, %v1009_v27  ;;  %v7401_v24 = vadd.f32 %v1259_v1, %v1233_v33  ;;  %v1075_v10 = vadd.f32 %v1074_v63, %v1048_v46 }
 0x118   : > { %v1078_v3 = vsel %vm724_vm0, %v1051_v51, 0.0  ;;  %v1052_v2 = vmul.f32 %v5304_v7, %v858_v49  ;;  %v1115_v6 = vmul.f32 %v5305_v45, %v858_v49  ;;  %v7409_v4 = vadd.f32 %v1137_v28, %v1111_v62  ;;  %v5308_v28 = vld [vmem:[%s9148_s2 + $0x60] sm:$0xff] }
 0x119   : > { %v860_v43 = vpop.f32.mrf.mxu0  ;;  %v1263_v38 = vsel %vm724_vm0, %v1236_v14, 0.0  ;;  %v1141_v40 = vsel %vm724_vm0, %v1114_v20, 0.0  ;;  %v7414_v52 = vadd.f32 %v1198_v50, %v1172_v58  ;;  %v7416_v51 = vadd.f32 %v1078_v3, %v1050_v29  ;;  %v5307_v58 = vld [vmem:[%s9149_s26 + $0x68] sm:$0xff] }
 0x11a   : > { %v1053_v35 = vmul.f32 %v5302_v42, %v860_v43  ;;  %v1116_v31 = vmul.f32 %v5303_v55, %v860_v43  ;;  %1135 = vadd.xlane.f32.xlu0 %v1134_v37  ;;  %v7412_v33 = vadd.f32 %v1263_v38, %v1235_v61  ;;  %v1202_v9 = vsel %vm724_vm0, %v1175_v8, 0.0  ;;  %v5306_v37 = vld [vmem:[%s9148_s2 + $0x68] sm:$0xff]  ;;  %v5309_v38 = vld [vmem:[%s9149_s26 + $0x60] sm:$0xff] }
 0x11b   : > { %v1013_v21 = vpop.f32.mrf.mxu1  ;;  %1192 = vadd.xlane.f32.xlu1 %v1191_v30  ;;  %v7427_v8 = vadd.f32 %v1141_v40, %v1113_v60 }
 0x11c   : > { %v864_v27 = vpop.f32.mrf.mxu0  ;;  %v1082_v30 = vsel %vm724_vm0, %v1053_v35, 0.0  ;;  %v1145_v62 = vsel %vm724_vm0, %v1116_v31, 0.0  ;;  %v1176_v49 = vmul.f32 %v5304_v7, %v1013_v21  ;;  %v7435_v35 = vadd.f32 %v1202_v9, %v1174_v48  ;;  %v5310_v48 = vld [vmem:[%s9148_s2 + $0x78] sm:$0xff]  ;;  %v5312_v9 = vld [vmem:[%s9148_s2 + $0x70] sm:$0xff] }
 0x11d   : > { %v1015_v46 = vpop.f32.mrf.mxu1  ;;  %v1054_v43 = vmul.f32 %v5308_v28, %v864_v27  ;;  %v1117_v50 = vmul.f32 %v5309_v38, %v864_v27  ;;  %v7440_v7 = vadd.f32 %v1145_v62, %v1115_v6 }
 0x11e   : > { %v866_v14 = vpop.f32.mrf.mxu0  ;;  %v1177_v1 = vmul.f32 %v5302_v42, %v1015_v46  ;;  %v1238_v63 = vmul.f32 %v5303_v55, %v1015_v46  ;;  %v1237_v42 = vmul.f32 %v5305_v45, %v1013_v21  ;;  %1257 = vadd.xlane.f32.xlu0 %v1256_v13  ;;  %v7437_v55 = vadd.f32 %v1082_v30, %v1052_v2  ;;  %v5311_v21 = vld [vmem:[%s9149_s26 + $0x78] sm:$0xff] }
 0x11f   : > { %v1055_v20 = vmul.f32 %v5306_v37, %v866_v14  ;;  %v1118_v29 = vmul.f32 %v5307_v58, %v866_v14  ;;  %v1019_v61 = vpop.f32.mrf.mxu1  ;;  %1196 = vadd.xlane.f32.xlu1 %v1195_v56 }
 0x120   : > { %v870_v3 = vpop.f32.mrf.mxu0  ;;  %v1206_v40 = vsel %vm724_vm0, %v1177_v1, 0.0  ;;  %v1178_v14 = vmul.f32 %v5308_v28, %v1019_v61  ;;  %v1267_v56 = vsel %vm724_vm0, %v1238_v63, 0.0  ;;  %v1239_v45 = vmul.f32 %v5309_v38, %v1019_v61  ;;  %v5313_v63 = vld [vmem:[%s9149_s26 + $0x70] sm:$0xff] }
 0x121   : > { %v1021_v60 = vpop.f32.mrf.mxu1  ;;  %v1086_v31 = vsel %vm724_vm0, %v1055_v20, 0.0  ;;  %v1149_v27 = vsel %vm724_vm0, %v1118_v29, 0.0  ;;  %v1056_v1 = vmul.f32 %v5312_v9, %v870_v3  ;;  %v1119_v30 = vmul.f32 %v5313_v63, %v870_v3 }
 0x122   : > { %v872_v46 = vpop.f32.mrf.mxu0  ;;  %v1179_v15 = vmul.f32 %v5306_v37, %v1021_v60  ;;  %v1240_v39 = vmul.f32 %v5307_v58, %v1021_v60  ;;  %v7457_v37 = vadd.f32 %v1086_v31, %v1054_v43  ;;  %v7459_v20 = vadd.f32 %v1206_v40, %v1176_v49  ;;  %1261 = vadd.xlane.f32.xlu0 %v7401_v24  ;;  %v5314_v49 = vld [vmem:[%s9148_s2 + $0x80] sm:$0xff] }
 0x123   : > { %v1057_v13 = vmul.f32 %v5310_v48, %v872_v46  ;;  %v1120_v2 = vmul.f32 %v5311_v21, %v872_v46  ;;  %v1025_v6 = vpop.f32.mrf.mxu1  ;;  %1076 = vadd.xlane.f32.xlu1 %v1075_v10  ;;  %v7464_v38 = vadd.f32 %v1267_v56, %v1237_v42  ;;  %v7466_v3 = vadd.f32 %v1149_v27, %v1117_v50  ;;  %v5316_v50 = vld [vmem:[%s9149_s26 + $0x80] sm:$0xff] }
 0x124   : > { %v876_v62 = vpop.f32.mrf.mxu0  ;;  %v1180_v58 = vmul.f32 %v5312_v9, %v1025_v6  ;;  %v1271_v29 = vsel %vm724_vm0, %v1240_v39, 0.0  ;;  %v1241_v46 = vmul.f32 %v5313_v63, %v1025_v6  ;;  %v1210_v10 = vsel %vm724_vm0, %v1179_v15, 0.0  ;;  %v5315_v39 = vld [vmem:[%s9149_s26 + $0x88] sm:$0xff] }
 0x125   : > { %v1027_v61 = vpop.f32.mrf.mxu1  ;;  %v1090_v28 = vsel %vm724_vm0, %v1057_v13, 0.0  ;;  %v1058_v24 = vmul.f32 %v5314_v49, %v876_v62  ;;  %v1153_v40 = vsel %vm724_vm0, %v1120_v2, 0.0  ;;  %v1121_v56 = vmul.f32 %v5316_v50, %v876_v62  ;;  %v5317_v15 = vld [vmem:[%s9148_s2 + $0x88] sm:$0xff] }
 0x126   : > { %v878_v60 = vpop.f32.mrf.mxu0  ;;  %v1242_v0 = vmul.f32 %v5311_v21, %v1027_v61  ;;  %v1181_v31 = vmul.f32 %v5310_v48, %v1027_v61  ;;  %v7483_v6 = vadd.f32 %v1271_v29, %v1239_v45  ;;  %v7485_v27 = vadd.f32 %v1090_v28, %v1056_v1  ;;  %1265 = vadd.xlane.f32.xlu0 %v7412_v33  ;;  %v5318_v48 = vld [vmem:[%s9148_s2 + $0x90] sm:$0x3f] }
 0x127   : > { %v1122_v43 = vmul.f32 %v5315_v39, %v878_v60  ;;  %v1031_v42 = vpop.f32.mrf.mxu1  ;;  %v1059_v13 = vmul.f32 %v5317_v15, %v878_v60  ;;  %1139 = vadd.xlane.f32.xlu1 %v7409_v4  ;;  %v7493_v61 = vadd.f32 %v1210_v10, %v1178_v14  ;;  %v7495_v1 = vadd.f32 %v1153_v40, %v1119_v30  ;;  %v5319_v33 = vld [vmem:[%s9149_s26 + $0x90] sm:$0x3f]  ;;  %v5321_v40 = vld [vmem:[%s9149_s26 + $0x98] sm:$0x3f] }
 0x128   : > { %v882_v21 = vpop.f32.mrf.mxu0  ;;  %v1275_v9 = vsel %vm724_vm0, %v1242_v0, 0.0  ;;  %v1182_v60 = vmul.f32 %v5314_v49, %v1031_v42  ;;  %v1243_v45 = vmul.f32 %v5316_v50, %v1031_v42  ;;  %v5320_v0 = vld [vmem:[%s9148_s2 + $0x98] sm:$0x3f]  ;;  %v1214_v14 = vsel %vm724_vm0, %v1181_v31, 0.0 }
 0x129   : > { %v1060_v2 = vmul.f32 %v5318_v48, %v882_v21  ;;  %v1033_v63 = vpop.f32.mrf.mxu1  ;;  %v1157_v62 = vsel %vm724_vm0, %v1122_v43, 0.0  ;;  %v1123_v28 = vmul.f32 %v5319_v33, %v882_v21  ;;  %v7505_v49 = vadd.f32 %v1275_v9, %v1241_v46 }
 0x12a   : > { %v884_v4 = vpop.f32.mrf.mxu0  ;;  %v1244_v29 = vmul.f32 %v5315_v39, %v1033_v63  ;;  %v1183_v26 = vmul.f32 %v5317_v15, %v1033_v63  ;;  %v7507_v30 = vadd.f32 %v1157_v62, %v1121_v56  ;;  %1084 = vadd.xlane.f32.xlu0 %v7437_v55  ;;  %v7517_v62 = vadd.f32 %v1214_v14, %v1180_v58 }
 0x12b   : > { %v1061_v17 = vmul.f32 %v5320_v0, %v884_v4  ;;  %v1037_v43 = vpop.f32.mrf.mxu1  ;;  %1200 = vadd.xlane.f32.xlu1 %v7414_v52  ;;  %v1124_v50 = vmul.f32 %v5321_v40, %v884_v4  ;;  %v1099_v31 = vsel %vm1098_vm2, %v1060_v2, 0.0  ;;  %v1094_v52 = vsel %vm724_vm0, %v1059_v13, 0.0 }
 0x12c   : > { %v1504_v10 = vpop.f32.mrf.mxu0  ;;  %v1245_v39 = vmul.f32 %v5319_v33, %v1037_v43  ;;  %v1279_v42 = vsel %vm724_vm0, %v1244_v29, 0.0  ;;  %v1184_v9 = vmul.f32 %v5318_v48, %v1037_v43  ;;  %v1218_v55 = vsel %vm724_vm0, %v1183_v26, 0.0 }
 0x12d   : > { %v1584_v15 = vrot.slane %v1504_v10, 7  ;;  %v1039_v21 = vpop.f32.mrf.mxu1  ;;  %v1101_v63 = vsel %vm1100_vm8, %v1061_v17, 0.0  ;;  %v7520_v12 = vadd.f32 %v1279_v42, %v1243_v45  ;;  %v7526_v43 = vadd.f32 %v1094_v52, %v1058_v24 }
 0x12e   : > { %v1506_v46 = vpop.f32.mrf.mxu0  ;;  %v1246_v56 = vmul.f32 %v5321_v40, %v1039_v21  ;;  %v1283_v13 = vsel %vm1098_vm2, %v1245_v39, 0.0  ;;  %1088 = vadd.xlane.f32.xlu0 %v7457_v37  ;;  %v1185_v14 = vmul.f32 %v5320_v0, %v1039_v21  ;;  %v7530_v45 = vadd.f32 %v1101_v63, %v1099_v31 }
 0x12f   : > { %v1642_v29 = vsel %vm1583_vm3, -3e+38, %v1584_v15  ;;  %v1585_v33 = vrot.slane %v1506_v46, 7  ;;  %1080 = vadd.xlane.f32.xlu1 %v7416_v51  ;;  %v7532_v40 = vadd.f32 %v1218_v55, %v1182_v60  ;;  %v1161_v51 = vsel %vm1098_vm2, %v1123_v28, 0.0 }
 0x130   : > { %v1644_v4 = vmax.f32 %v1504_v10, %v1642_v29  ;;  %v1284_v48 = vsel %vm1100_vm8, %v1246_v56, 0.0  ;;  %v1162_v52 = vsel %vm1100_vm8, %v1124_v50, 0.0  ;;  %v1222_v31 = vsel %vm1098_vm2, %v1184_v9, 0.0 }
 0x131   : > { %v1643_v17 = vsel %vm1583_vm3, -3e+38, %v1585_v33  ;;  %v7536_v24 = vadd.f32 %v1284_v48, %v1283_v13 }
 0x132   : > { %v1685_v42 = vrot.slane %v1644_v4, 6  ;;  %v1645_v26 = vmax.f32 %v1506_v46, %v1643_v17  ;;  %1273 = vadd.xlane.f32.xlu0 %v7483_v6 }
 0x133   : > { %v1510_v2 = vpop.f32.mrf.mxu0  ;;  %1143 = vadd.xlane.f32.xlu1 %v7427_v8 }
 0x134   : > { %v1586_v58 = vrot.slane %v1510_v2, 7  ;;  %v1743_v37 = vsel %vm1684_vm5, -3e+38, %v1685_v42  ;;  %v1686_v29 = vrot.slane %v1645_v26, 6 }
 0x135   : > { %v1512_v10 = vpop.f32.mrf.mxu0  ;;  %v1745_v60 = vmax.f32 %v1644_v4, %v1743_v37 }
 0x136   : > { %v1587_v39 = vsel %vm1583_vm3, %v1584_v15, %v1586_v58  ;;  %v1588_v56 = vrot.slane %v1512_v10, 7  ;;  %v1223_v15 = vsel %vm1100_vm8, %v1185_v14, 0.0  ;;  %v1744_v63 = vsel %vm1684_vm5, -3e+38, %v1686_v29  ;;  %1092 = vadd.xlane.f32.xlu0 %v7485_v27 }
 0x137   : > { %v1646_v0 = vmax.f32 %v1510_v2, %v1587_v39  ;;  %v1516_v21 = vpop.f32.mrf.mxu0  ;;  %v7548_v2 = vadd.f32 %v1162_v52, %v1161_v51  ;;  %v1785_v8 = vrot.slane %v1745_v60, 4  ;;  %v1746_v48 = vmax.f32 %v1645_v26, %v1744_v63  ;;  %1204 = vadd.xlane.f32.xlu1 %v7435_v35 }
 0x138   : > { %v1589_v46 = vsel %vm1583_vm3, %v1585_v33, %v1588_v56  ;;  %v1590_v28 = vrot.slane %v1516_v21, 7  ;;  %v7554_v39 = vadd.f32 %v1223_v15, %v1222_v31 }
 0x139   : > { %v1687_v50 = vrot.slane %v1646_v0, 6  ;;  %v1647_v55 = vmax.f32 %v1512_v10, %v1589_v46  ;;  %v7546_v13 = vpop.f32.mrf.mxu0  ;;  %v1843_v10 = vsel %vm755_vm4, -3e+38, %v1785_v8  ;;  %v1786_v37 = vrot.slane %v1746_v48, 4 }
 0x13a   : > { %v1591_v9 = vsel %vm1583_vm3, %v1586_v58, %v1590_v28  ;;  %v1592_v4 = vrot.slane %v7546_v13, 7  ;;  %v1845_v58 = vmax.f32 %v1745_v60, %v1843_v10  ;;  %1277 = vadd.xlane.f32.xlu0 %v7505_v49 }
 0x13b   : > { %v1688_v33 = vsel %vm1684_vm5, %v1685_v42, %v1687_v50  ;;  %v1689_v6 = vrot.slane %v1647_v55, 6  ;;  %v1648_v17 = vmax.f32 %v1516_v21, %v1591_v9  ;;  %v1522_v14 = vpop.f32.mrf.mxu0  ;;  %v1844_v35 = vsel %vm755_vm4, -3e+38, %v1786_v37  ;;  %1147 = vadd.xlane.f32.xlu1 %v7440_v7 }
 0x13c   : > { %v1747_v51 = vmax.f32 %v1646_v0, %v1688_v33  ;;  %v1593_v52 = vsel %vm1583_vm3, %v1588_v56, %v1592_v4  ;;  %v1594_v63 = vrot.slane %v1522_v14, 7  ;;  %v1865_v9 = vmax.f32 %v1845_v58, -3e+38 }
 0x13d   : > { %v1690_v26 = vsel %vm1684_vm5, %v1686_v29, %v1689_v6  ;;  %v1691_v46 = vrot.slane %v1648_v17, 6  ;;  %v7561_v42 = vmax.f32 %v7546_v13, %v1593_v52  ;;  %v7563_v21 = vpop.f32.mrf.mxu0  ;;  %v1846_v0 = vmax.f32 %v1746_v48, %v1844_v35 }
 0x13e   : > { %v1787_v31 = vrot.slane %v1747_v51, 4  ;;  %v1748_v15 = vmax.f32 %v1647_v55, %v1690_v26  ;;  %v1595_v10 = vsel %vm1583_vm3, %v1590_v28, %v1594_v63  ;;  %v7572_v52 = vmax.f32 %v1865_v9, -3e+38  ;;  %1159 = vadd.xlane.f32.xlu0 %v7507_v30 }
 0x13f   : > { %v1692_v56 = vsel %vm1684_vm5, %v1687_v50, %v1691_v46  ;;  %v9138_v27 = vrot.slane %v7561_v42, 6  ;;  %v1528_v29 = vpop.f32.mrf.mxu0  ;;  %v1866_v55 = vmax.f32 %v1846_v0, -3e+38  ;;  %1208 = vadd.xlane.f32.xlu1 %v7459_v20 }
 0x140   : > { %v1788_v60 = vsel %vm755_vm4, %v1785_v8, %v1787_v31  ;;  %v1789_v13 = vrot.slane %v1748_v15, 4  ;;  %v1749_v33 = vmax.f32 %v1648_v17, %v1692_v56  ;;  %v1650_v17 = vmax.f32 %v1522_v14, %v1595_v10 }
 0x141   : > { %v1847_v26 = vmax.f32 %v1747_v51, %v1788_v60  ;;  %v1694_v50 = vsel %vm1684_vm5, %v1689_v6, %v9138_v27  ;;  %v7577_v48 = vpop.f32.mrf.mxu0  ;;  %v7583_v28 = vmax.f32 %v1866_v55, -3e+38  ;;  %v1596_v51 = vrot.slane %v7563_v21, 7 }
 0x142   : > { %v1790_v7 = vsel %vm755_vm4, %v1786_v37, %v1789_v13  ;;  %v1791_v35 = vrot.slane %v1749_v33, 4  ;;  %v7581_v8 = vmax.f32 %v7561_v42, %v1694_v50  ;;  %v1695_v27 = vrot.slane %v1650_v17, 6  ;;  %1281 = vadd.xlane.f32.xlu0 %v7520_v12 }
 0x143   : > { %v7585_v49 = vmax.f32 %v1847_v26, %v1845_v58  ;;  %v1848_v56 = vmax.f32 %v1748_v15, %v1790_v7  ;;  %v7589_v60 = vpop.f32.mrf.mxu0  ;;  %v1598_v32 = vrot.slane %v1528_v29, 7  ;;  %v9140_v58 = vmax.f32 %v7583_v28, -3e+38  ;;  %1269 = vadd.xlane.f32.xlu1 %v7464_v38 }
 0x144   : > { %v1792_v6 = vsel %vm755_vm4, %v1787_v31, %v1791_v35  ;;  %v9139_v37 = vrot.slane %v7581_v8, 4  ;;  %v1696_v31 = vsel %vm1684_vm5, %v1691_v46, %v1695_v27  ;;  %v1597_v7 = vsel %vm1583_vm3, %v1592_v4, %v1596_v51 }
 0x145   : > { %v7595_v10 = vmax.f32 %v1848_v56, %v1846_v0  ;;  %v1849_v15 = vmax.f32 %v1749_v33, %v1792_v6  ;;  %v7598_v50 = vpop.f32.mrf.mxu0  ;;  %v1599_v5 = vsel %vm1583_vm3, %v1594_v63, %v1598_v32  ;;  %v1926_v0 = vmax.f32 %v9140_v58, -3e+38 }
 0x146   : > { %v1794_v20 = vsel %vm755_vm4, %v1789_v13, %v9139_v37  ;;  %v1751_v13 = vmax.f32 %v1650_v17, %v1696_v31  ;;  %v1651_v46 = vmax.f32 %v7563_v21, %v1597_v7  ;;  %v1652_v37 = vmax.f32 %v1528_v29, %v1599_v5  ;;  %1103 = vadd.xlane.f32.xlu0 %v7530_v45 }
 0x147   : > { %v7609_v14 = vmax.f32 %v1849_v15, %v1847_v26  ;;  %v1850_v33 = vmax.f32 %v7581_v8, %v1794_v20  ;;  %v1600_v4 = vrot.slane %v7577_v48, 7  ;;  %v7619_v63 = vmax.f32 %v1926_v0, %v7331_v57  ;;  %1151 = vadd.xlane.f32.xlu1 %v7466_v3 }
 0x148   : > { %v1602_v38 = vrot.slane %v7589_v60, 7  ;;  %v1795_v17 = vrot.slane %v1751_v13, 4  ;;  %v1697_v31 = vrot.slane %v1651_v46, 6  ;;  %v1699_v21 = vrot.slane %v1652_v37, 6 }
 0x149   : > { %v7613_v6 = vpop.f32.mrf.mxu0  ;;  %v7622_v26 = vmax.f32 %v7609_v14, %v1865_v9  ;;  %v7624_v58 = vmax.f32 %v1850_v33, %v1848_v56  ;;  %v1601_v5 = vsel %vm1583_vm3, %v1596_v51, %v1600_v4  ;;  %v1604_v9 = vrot.slane %v7598_v50, 7 }
 0x14a   : > { %v1653_v12 = vmax.f32 %v7577_v48, %v1601_v5  ;;  %v1603_v57 = vsel %vm1583_vm3, %v1598_v32, %v1602_v38  ;;  %v1796_v56 = vsel %vm755_vm4, %v1791_v35, %v1795_v17  ;;  %v9340_v7 = vrot.slane %v7561_v42, 6  ;;  %1286 = vadd.xlane.f32.xlu0 %v7536_v24 }
 0x14b   : > { %v7627_v20 = vpop.f32.mrf.mxu0  ;;  %v7631_v29 = vmax.f32 %v7624_v58, %v1866_v55  ;;  %v1700_v30 = vsel %vm1684_vm5, %v1695_v27, %v1699_v21  ;;  %v1654_v51 = vmax.f32 %v7589_v60, %v1603_v57  ;;  %v1851_v48 = vmax.f32 %v1751_v13, %v1796_v56  ;;  %1212 = vadd.xlane.f32.xlu1 %v7493_v61 }
 0x14c   : > { %v1698_v0 = vsel %vm1684_vm5, %v9340_v7, %v1697_v31  ;;  %v1753_v5 = vmax.f32 %v1652_v37, %v1700_v30  ;;  %v1701_v36 = vrot.slane %v1653_v12, 6  ;;  %v1605_v3 = vsel %vm1583_vm3, %v1600_v4, %v1604_v9 }
 0x14d   : > { %v7643_v55 = vpop.f32.mrf.mxu0  ;;  %v1752_v32 = vmax.f32 %v1651_v46, %v1698_v0  ;;  %v1703_v59 = vrot.slane %v1654_v51, 6  ;;  %v1606_v35 = vrot.slane %v7613_v6, 7  ;;  %v1608_v42 = vrot.slane %v7627_v20, 7 }
 0x14e   : > { %v1871_v7 = vmax.f32 %v1851_v48, %v1849_v15  ;;  %v1799_v27 = vrot.slane %v1753_v5, 4  ;;  %v1702_v60 = vsel %vm1684_vm5, %v1697_v31, %v1701_v36  ;;  %v1655_v37 = vmax.f32 %v7598_v50, %v1605_v3 }
 0x14f   : > { %v1797_v34 = vrot.slane %v1752_v32, 4  ;;  %v1754_v57 = vmax.f32 %v1653_v12, %v1702_v60  ;;  %v1704_v45 = vsel %vm1684_vm5, %v1699_v21, %v1703_v59  ;;  %v1607_v30 = vsel %vm1583_vm3, %v1602_v38, %v1606_v35  ;;  %v7654_v13 = vpop.f32.mrf.mxu0  ;;  %1155 = vadd.xlane.f32.xlu1 %v7495_v1 }
 0x150   : > { %v7658_v46 = vmax.f32 %v1871_v7, %v7585_v49  ;;  %v9341_v15 = vrot.slane %v7581_v8, 4  ;;  %v1800_v61 = vsel %vm755_vm4, %v1795_v17, %v1799_v27  ;;  %v1755_v31 = vmax.f32 %v1654_v51, %v1704_v45 }
 0x151   : > { %v1853_v21 = vmax.f32 %v1753_v5, %v1800_v61  ;;  %v1801_v56 = vrot.slane %v1754_v57, 4  ;;  %v1705_v50 = vrot.slane %v1655_v37, 6  ;;  %v1656_v38 = vmax.f32 %v7613_v6, %v1607_v30  ;;  %v7672_v51 = vpop.f32.mrf.mxu0 }
 0x152   : > { %v1798_v4 = vsel %vm755_vm4, %v9341_v15, %v1797_v34  ;;  %v1803_v0 = vrot.slane %v1755_v31, 4  ;;  %v1609_v3 = vsel %vm1583_vm3, %v1604_v9, %v1608_v42  ;;  %v1610_v24 = vrot.slane %v7643_v55, 7 }
 0x153   : > { %v1852_v12 = vmax.f32 %v1752_v32, %v1798_v4  ;;  %v7668_v8 = vmax.f32 %v1853_v21, %v1851_v48  ;;  %v1802_v15 = vsel %vm755_vm4, %v1797_v34, %v1801_v56  ;;  %v1706_v17 = vsel %vm1684_vm5, %v1701_v36, %v1705_v50  ;;  %1216 = vadd.xlane.f32.xlu1 %v7517_v62 }
 0x154   : > { %v1854_v32 = vmax.f32 %v1754_v57, %v1802_v15  ;;  %v1804_v5 = vsel %vm755_vm4, %v1799_v27, %v1803_v0  ;;  %v1756_v45 = vmax.f32 %v1655_v37, %v1706_v17  ;;  %v1707_v6 = vrot.slane %v1656_v38, 6  ;;  %v7688_v27 = vpop.permute.xlu1 %2000 }
 0x155   : > { %v1872_v60 = vmax.f32 %v1852_v12, %v1850_v33  ;;  %v7680_v1 = vmax.f32 %v7668_v8, %v7609_v14  ;;  %v1855_v33 = vmax.f32 %v1755_v31, %v1804_v5  ;;  %v1657_v48 = vmax.f32 %v7627_v20, %v1609_v3  ;;  %9342 = vst [vmem:[#allocation17_spill] sm:$0xff] %v7688_v27  ;;  %v7693_v31 = vpop.f32.mrf.mxu0 }
 0x156   : > { %v7683_v34 = vmax.f32 %v1854_v32, %v1852_v12  ;;  %v1805_v36 = vrot.slane %v1756_v45, 4  ;;  %v1708_v30 = vsel %vm1684_vm5, %v1703_v59, %v1707_v6  ;;  %v1611_v57 = vsel %vm1583_vm3, %v1606_v35, %v1610_v24 }
 0x157   : > { %v7676_v9 = vmax.f32 %v1872_v60, %v7595_v10  ;;  %v7690_v37 = vmax.f32 %v1855_v33, %v1853_v21  ;;  %v1757_v4 = vmax.f32 %v1656_v38, %v1708_v30  ;;  %v1709_v61 = vrot.slane %v1657_v48, 6  ;;  %1096 = vadd.xlane.f32.xlu1 %v7526_v43 }
 0x158   : > { %v1658_v14 = vmax.f32 %v7643_v55, %v1611_v57  ;;  %v7697_v20 = vmax.f32 %v7683_v34, %v7624_v58  ;;  %v1806_v59 = vsel %vm755_vm4, %v1801_v56, %v1805_v36  ;;  %v1612_v35 = vrot.slane %v7654_v13, 7  ;;  %v7714_v57 = vpop.xlane.xlu1 %3192 }
 0x159   : > { %v1614_v62 = vrot.slane %v7672_v51, 7  ;;  %v7703_v12 = vmax.f32 %v7690_v37, %v1871_v7  ;;  %v1856_v21 = vmax.f32 %v1756_v45, %v1806_v59  ;;  %v1807_v38 = vrot.slane %v1757_v4, 4  ;;  %v1558_v45 = vpop.f32.mrf.mxu0  ;;  %9343 = vst [vmem:[#allocation15_spill] sm:$0xff] %v7714_v57 }
 0x15a   : > { %v1710_v3 = vsel %vm1684_vm5, %v1705_v50, %v1709_v61  ;;  %v1711_v15 = vrot.slane %v1658_v14, 6  ;;  %v1613_v17 = vsel %vm1583_vm3, %v1608_v42, %v1612_v35  ;;  %v1616_v42 = vrot.slane %v7693_v31, 7 }
 0x15b   : > { %v1758_v55 = vmax.f32 %v1657_v48, %v1710_v3  ;;  %v1615_v58 = vsel %vm1583_vm3, %v1610_v24, %v1614_v62  ;;  %v7709_v56 = vmax.f32 %v1856_v21, %v1854_v32  ;;  %v1808_v5 = vsel %vm755_vm4, %v1803_v0, %v1807_v38  ;;  %v7721_v0 = vpop.permute.xlu0 %1378  ;;  %1220 = vadd.xlane.f32.xlu1 %v7532_v40 }
 0x15c   : > { %v1659_v30 = vmax.f32 %v7654_v13, %v1613_v17  ;;  %v1660_v7 = vmax.f32 %v7672_v51, %v1615_v58  ;;  %v1857_v50 = vmax.f32 %v1757_v4, %v1808_v5  ;;  %v1712_v59 = vsel %vm1684_vm5, %v1707_v6, %v1711_v15  ;;  %9344 = vst [vmem:[#allocation13_spill] sm:$0xff] %v7721_v0 }
 0x15d   : > { %v1809_v48 = vrot.slane %v1758_v55, 4  ;;  %v7719_v24 = vmax.f32 %v7709_v56, %v1872_v60  ;;  %v1759_v43 = vmax.f32 %v1658_v14, %v1712_v59  ;;  %v1617_v17 = vsel %vm1583_vm3, %v1612_v35, %v1616_v42 }
 0x15e   : > { %v1713_v32 = vrot.slane %v1659_v30, 6  ;;  %v1715_v3 = vrot.slane %v1660_v7, 6  ;;  %v7723_v13 = vmax.f32 %v1857_v50, %v1855_v33  ;;  %v1618_v4 = vrot.slane %v1558_v45, 7 }
 0x15f   : > { %v1810_v51 = vsel %vm755_vm4, %v1805_v36, %v1809_v48  ;;  %v1811_v58 = vrot.slane %v1759_v43, 4  ;;  %v1661_v33 = vmax.f32 %v7693_v31, %v1617_v17  ;;  %v9142_v40 = vmax.f32 %v7572_v52, -3e+38  ;;  %1164 = vadd.xlane.f32.xlu1 %v7548_v2 }
 0x160   : > { %v1858_v6 = vmax.f32 %v1758_v55, %v1810_v51  ;;  %v1714_v5 = vsel %vm1684_vm5, %v1709_v61, %v1713_v32  ;;  %v1716_v60 = vsel %vm1684_vm5, %v1711_v15, %v1715_v3  ;;  %v1619_v35 = vsel %vm1583_vm3, %v1614_v62, %v1618_v4  ;;  %v7738_v55 = vpop.xlane.xlu1 %3204  ;;  %v5322_v62 = vld [vmem:[%s9202_s0 + $0x8] sm:$0xff] }
 0x161   : > { %v1760_v59 = vmax.f32 %v1659_v30, %v1714_v5  ;;  %v1761_v0 = vmax.f32 %v1660_v7, %v1716_v60  ;;  %v1812_v36 = vsel %vm755_vm4, %v1807_v38, %v1811_v58  ;;  %v1717_v27 = vrot.slane %v1661_v33, 6  ;;  %v7741_v30 = vpop.xlane.xlu0 %3253 }
 0x162   : > { %v7733_v57 = vmax.f32 %v1858_v6, %v1856_v21  ;;  %v1859_v61 = vmax.f32 %v1759_v43, %v1812_v36  ;;  %9345 = vst [vmem:[#allocation21_spill] sm:$0xff] %v7741_v30  ;;  %v1662_v21 = vmax.f32 %v1558_v45, %v1619_v35  ;;  %v1925_v38 = vmax.f32 %v9142_v40, -3e+38  ;;  %v1560_v43 = vpop.f32.mrf.mxu0 }
 0x163   : > { %v1813_v51 = vrot.slane %v1760_v59, 4  ;;  %v1815_v15 = vrot.slane %v1761_v0, 4  ;;  %v3049_v7 = vadd.f32 %v5322_v62, %v7619_v63  ;;  %v1718_v5 = vsel %vm1684_vm5, %v1713_v32, %v1717_v27  ;;  %1225 = vadd.xlane.f32.xlu1 %v7554_v39 }
 0x164   : > { %v7751_v17 = vmax.f32 %v1859_v61, %v1857_v50  ;;  %v1762_v36 = vmax.f32 %v1661_v33, %v1718_v5  ;;  %v1719_v35 = vrot.slane %v1662_v21, 6  ;;  %v7759_v31 = vmax.f32 %v1925_v38, %v7317_v22  ;;  %v5323_v33 = vld [vmem:[%s9202_s0] sm:$0xff] }
 0x165   : > { %v1814_v2 = vsel %vm755_vm4, %v1809_v48, %v1813_v51  ;;  %v1816_v4 = vsel %vm755_vm4, %v1811_v58, %v1815_v15  ;;  %v3068_v62 = vsel %vm724_vm0, %v3049_v7, -inf  ;;  %v1620_v50 = vrot.slane %v1560_v43, 7 }
 0x166   : > { %v1860_v60 = vmax.f32 %v1760_v59, %v1814_v2  ;;  %v1861_v45 = vmax.f32 %v1761_v0, %v1816_v4  ;;  %v1817_v14 = vrot.slane %v1762_v36, 4  ;;  %v1720_v32 = vsel %vm1684_vm5, %v1715_v3, %v1719_v35  ;;  %v7766_v0 = vpop.xlane.xlu1 %3200 }
 0x167   : > { %v1763_v59 = vmax.f32 %v1662_v21, %v1720_v32  ;;  %v3048_v22 = vadd.f32 %v5323_v33, %v7759_v31  ;;  %v1621_v38 = vsel %vm1583_vm3, %v1616_v42, %v1620_v50  ;;  %v9346_v7 = vmax.f32 %v7585_v49, -3e+38 }
 0x168   : > { %v7763_v48 = vmax.f32 %v1860_v60, %v1858_v6  ;;  %v1881_v58 = vmax.f32 %v1861_v45, %v1859_v61  ;;  %v7777_v6 = vpop.xlane.xlu0 %3265  ;;  %v1818_v21 = vsel %vm755_vm4, %v1813_v51, %v1817_v14  ;;  %v1663_v2 = vmax.f32 %v1560_v43, %v1621_v38 }
 0x169   : > { %v7775_v39 = vmax.f32 %v9346_v7, -3e+38  ;;  %v1862_v4 = vmax.f32 %v1762_v36, %v1818_v21  ;;  %v1819_v5 = vrot.slane %v1763_v59, 4  ;;  %v3069_v35 = vmax.f32 %v3048_v22, %v3068_v62 }
 0x16a   : > { %v7782_v61 = vmax.f32 %v1881_v58, %v7723_v13  ;;  %v9347_v42 = vmax.f32 %v7595_v10, -3e+38  ;;  %v1721_v32 = vrot.slane %v1663_v2, 6  ;;  %v1909_v7 = vmax.f32 %v7622_v26, -3e+38  ;;  %v7800_v21 = vpop.xlane.xlu1 %3196 }
 0x16b   : > { %v1927_v33 = vmax.f32 %v7775_v39, -3e+38  ;;  %v1913_v3 = vmax.f32 %v7680_v1, %v7572_v52  ;;  %v1882_v58 = vmax.f32 %v1862_v4, %v1860_v60  ;;  %v1820_v40 = vsel %vm755_vm4, %v1815_v15, %v1819_v5  ;;  %3070 = vmax.xlane.f32.xlu0 %v3069_v35  ;;  %9348 = vst [vmem:[#allocation18_spill] sm:$0xff] %v7800_v21 }
 0x16c   : > { %v7787_v50 = vmax.f32 %v9347_v42, -3e+38  ;;  %v1910_v43 = vmax.f32 %v7631_v29, -3e+38  ;;  %v1863_v36 = vmax.f32 %v1763_v59, %v1820_v40  ;;  %v1722_v62 = vsel %vm1684_vm5, %v1717_v27, %v1721_v32  ;;  %v7806_v35 = vpop.xlane.xlu0 %3261  ;;  %v5324_v27 = vld [vmem:[%s9202_s0 + $0x10] sm:$0xff] }
 0x16d   : > { %v7798_v22 = vmax.f32 %v1927_v33, %v7276_v41  ;;  %v1929_v38 = vmax.f32 %v1909_v7, -3e+38  ;;  %v7803_v42 = vmax.f32 %v1882_v58, %v7733_v57  ;;  %v1764_v60 = vmax.f32 %v1663_v2, %v1722_v62  ;;  %9349 = vst [vmem:[#allocation23_spill] sm:$0xff] %v7806_v35  ;;  %v5327_v62 = vld [vmem:[%s9202_s0 + $0x28] sm:$0xff] }
 0x16e   : > { %v1928_v51 = vmax.f32 %v7787_v50, -3e+38  ;;  %v1930_v5 = vmax.f32 %v1910_v43, -3e+38  ;;  %v7808_v30 = vmax.f32 %v1863_v36, %v1861_v45  ;;  %v1911_v59 = vmax.f32 %v7658_v46, -3e+38 }
 0x16f   : > { %v3050_v41 = vadd.f32 %v5324_v27, %v7798_v22  ;;  %v7815_v40 = vmax.f32 %v1929_v38, %v7310_v47  ;;  %v1821_v32 = vrot.slane %v1764_v60, 4  ;;  %v1912_v33 = vmax.f32 %v7676_v9, -3e+38  ;;  %v5326_v47 = vld [vmem:[%s9202_s0 + $0x20] sm:$0xff] }
 0x170   : > { %v2036_v15 = vmax.f32 %v1928_v51, %v7279_v44  ;;  %v5325_v44 = vld [vmem:[%s9202_s0 + $0x18] sm:$0xff]  ;;  %v7822_v45 = vmax.f32 %v1930_v5, %v7314_v19  ;;  %v1931_v51 = vmax.f32 %v1911_v59, -3e+38  ;;  %v1914_v43 = vmax.f32 %v7697_v20, %v7583_v28 }
 0x171   : > { %v3052_v58 = vadd.f32 %v5326_v47, %v7815_v40  ;;  %v1822_v36 = vsel %vm755_vm4, %v1817_v14, %v1821_v32  ;;  %v1932_v5 = vmax.f32 %v1912_v33, -3e+38  ;;  %v1933_v59 = vmax.f32 %v1913_v3, -3e+38  ;;  %v7842_v47 = vpop.xlane.xlu1 %3212  ;;  %v5328_v3 = vld [vmem:[%s9202_s0 + $0x30] sm:$0xff] }
 0x172   : > { %v3051_v2 = vadd.f32 %v5325_v44, %v2036_v15  ;;  %v3053_v38 = vadd.f32 %v5327_v62, %v7822_v45  ;;  %v1864_v27 = vmax.f32 %v1764_v60, %v1822_v36  ;;  %v7840_v7 = vmax.f32 %v1931_v51, %v7270_v11  ;;  %v7851_v62 = vpop.xlane.xlu0 %3257 }
 0x173   : > { %v7846_v14 = vmax.f32 %v1932_v5, %v7273_v25  ;;  %v1934_v32 = vmax.f32 %v1914_v43, -3e+38  ;;  %v7860_v25 = vmax.f32 %v1933_v59, %v7264_v18  ;;  %v5330_v18 = vld [vmem:[%s9031_s5 + $0x40] sm:$0xff]  ;;  %v5333_v5 = vld [vmem:[%s9031_s5 + $0x48] sm:$0xff] }
 0x174   : > { %v3072_v19 = vsel %vm724_vm0, %v3051_v2, -inf  ;;  %v3076_v35 = vsel %vm724_vm0, %v3053_v38, -inf  ;;  %v9350_v2 = vmax.f32 %v7585_v49, -3e+38  ;;  %v7853_v60 = vmax.f32 %v1864_v27, %v1862_v4  ;;  %v5329_v49 = vld [vmem:[%s9202_s0 + $0x38] sm:$0xff] }
 0x175   : > { %v3073_v44 = vmax.f32 %v3050_v41, %v3072_v19  ;;  %v3077_v11 = vmax.f32 %v3052_v58, %v3076_v35  ;;  %v3054_v41 = vadd.f32 %v5328_v3, %v7840_v7  ;;  %v3055_v33 = vadd.f32 %v5329_v49, %v7846_v14  ;;  %v5331_v19 = vld [vmem:[%s9031_s5] sm:$0xff]  ;;  %v5335_v3 = vld [vmem:[%s9031_s5 + $0x18] sm:$0xff] }
 0x176   : > { %v1915_v21 = vmax.f32 %v7703_v12, %v9350_v2  ;;  %v7867_v4 = vmax.f32 %v1934_v32, %v7267_v53  ;;  %v9351_v35 = vmax.f32 %v7595_v10, -3e+38  ;;  %v1904_v43 = vmax.f32 %v7853_v60, %v7763_v48  ;;  %v5332_v10 = vld [vmem:[%s9031_s5 + $0x8] sm:$0xff]  ;;  %v5334_v2 = vld [vmem:[%s9031_s5 + $0x10] sm:$0xff] }
 0x177   : > { %3074 = vmax.xlane.f32.xlu0 %v3073_v44  ;;  %v3117_v36 = vadd.f32 %v5330_v18, %v7860_v25  ;;  %v3109_v53 = vadd.f32 %v5331_v19, %v7759_v31  ;;  %v3080_v38 = vsel %vm724_vm0, %v3055_v33, -inf  ;;  %v3112_v49 = vadd.f32 %v5335_v3, %v2036_v15  ;;  %v7900_v33 = vpop.xlane.xlu1 %3273  ;;  %v5337_v15 = vld [vmem:[%s9031_s5 + $0x50] sm:$0xff] }
 0x178   : > { %v1916_v58 = vmax.f32 %v7719_v24, %v9351_v35  ;;  %v1935_v51 = vmax.f32 %v1915_v21, -3e+38  ;;  %v3110_v21 = vadd.f32 %v5332_v10, %v7619_v63  ;;  %v3118_v27 = vadd.f32 %v5333_v5, %v7867_v4 }
 0x179   : > { %v3081_v32 = vmax.f32 %v3054_v41, %v3080_v38  ;;  %v3111_v63 = vadd.f32 %v5334_v2, %v7798_v22  ;;  %v3133_v19 = vsel %vm724_vm0, %v3112_v49, -inf  ;;  %v1921_v2 = vmax.f32 %v7782_v61, %v7680_v1  ;;  %v9354_v1 = vld [vmem:[#allocation16_spill] sm:$0xff] }
 0x17a   : > { %v1936_v44 = vmax.f32 %v1916_v58, -3e+38  ;;  %v2043_v59 = vmax.f32 %v1935_v51, %v7282_v23  ;;  %v3129_v31 = vsel %vm724_vm0, %v3110_v21, -inf  ;;  %v3145_v35 = vsel %vm724_vm0, %v3118_v27, -inf  ;;  %v7909_v51 = vpop.xlane.xlu0 %3216 }
 0x17b   : > { %3078 = vmax.xlane.f32.xlu0 %v3077_v11  ;;  %v5336_v11 = vld [vmem:[%s9202_s0 + $0x50] sm:$0xff]  ;;  %v3130_v58 = vmax.f32 %v3109_v53, %v3129_v31  ;;  %v3146_v22 = vmax.f32 %v3117_v36, %v3145_v35  ;;  %v5338_v53 = vld [vmem:[%s9202_s0 + $0x58] sm:$0xff]  ;;  %v3134_v5 = vmax.f32 %v3111_v63, %v3133_v19  ;;  %v9353_v27 = vmax.f32 %v7733_v57, %v7683_v34  ;;  %v7952_v49 = vpop.xlane.xlu1 %3208 }
 0x17c   : > { %v2044_v23 = vmax.f32 %v1936_v44, %v7285_v54  ;;  %v7907_v41 = vadd.f32 %v5336_v11, %v2043_v59  ;;  %v7914_v18 = vadd.f32 %v5337_v15, %v2043_v59  ;;  %v9352_v54 = vmax.f32 %v7723_v13, %v7668_v8  ;;  %v5339_v36 = vld [vmem:[%s9031_s5 + $0x58] sm:$0xff]  ;;  %v5341_v59 = vld [vmem:[%s9031_s5 + $0x28] sm:$0xff]  ;;  %v5343_v15 = vld [vmem:[%s9031_s5 + $0x30] sm:$0xff] }
 0x17d   : > { %3131 = vmax.xlane.f32.xlu1 %v3130_v58  ;;  %v1918_v44 = vmax.f32 %v9353_v27, %v7631_v29  ;;  %v3114_v31 = vadd.f32 %v5341_v59, %v7822_v45  ;;  %v5351_v59 = vld [vmem:[%s9031_s5 + $0x80] sm:$0xff] }
 0x17e   : > { %v1917_v10 = vmax.f32 %v9352_v54, %v7622_v26  ;;  %v3059_v21 = vadd.f32 %v5338_v53, %v2044_v23  ;;  %v3120_v38 = vadd.f32 %v5339_v36, %v2044_v23  ;;  %v5340_v26 = vld [vmem:[%s9031_s5 + $0x20] sm:$0xff]  ;;  %v9355_v23 = vmax.f32 %v7572_v52, -3e+38  ;;  %v5344_v52 = vld [vmem:[%s9031_s5 + $0x38] sm:$0xff]  ;;  %v5346_v54 = vld [vmem:[%s9031_s5 + $0x68] sm:$0xff] }
 0x17f   : > { %3082 = vmax.xlane.f32.xlu0 %v3081_v32  ;;  %v3113_v13 = vadd.f32 %v5340_v26, %v7815_v40  ;;  %v1938_v57 = vmax.f32 %v1918_v44, -3e+38  ;;  %v1922_v32 = vmax.f32 %v7803_v42, %v7697_v20  ;;  %v3137_v45 = vsel %vm724_vm0, %v3114_v31, -inf  ;;  %v9357_v53 = vld [vmem:[#allocation20_spill] sm:$0xff] }
 0x180   : > { %v1937_v8 = vmax.f32 %v1917_v10, -3e+38  ;;  %v3088_v34 = vsel %vm724_vm0, %v3059_v21, -inf  ;;  %v7943_v29 = vsel %vm724_vm0, %v3120_v38, -inf  ;;  %v1941_v11 = vmax.f32 %v1921_v2, %v9355_v23  ;;  %v5347_v38 = vld [vmem:[%s9202_s0 + $0x48] sm:$0xff] }
 0x181   : > { %v3089_v40 = vmax.f32 %v7907_v41, %v3088_v34  ;;  %v3150_v63 = vmax.f32 %v7914_v18, %v7943_v29  ;;  %3135 = vmax.xlane.f32.xlu1 %v3134_v5  ;;  %v2046_v61 = vmax.f32 %v1938_v57, %v9354_v1  ;;  %v3138_v35 = vmax.f32 %v3113_v13, %v3137_v45  ;;  %v7959_v41 = vpop.xlane.xlu0 %3277  ;;  %v5349_v13 = vld [vmem:[%s9202_s0 + $0x80] sm:$0xff]  ;;  %v5352_v2 = vld [vmem:[%s9031_s5 + $0x88] sm:$0xff]  ;;  %v8020_v57 = vpop.xlane.xlu1 %3224 }
 0x182   : > { %v2045_v3 = vmax.f32 %v1937_v8, %v7300_v16  ;;  %v9356_v20 = vmax.f32 %v7583_v28, -3e+38  ;;  %v5342_v16 = vld [vmem:[%s9031_s5 + $0x60] sm:$0xff]  ;;  %v3115_v18 = vadd.f32 %v5343_v15, %v7840_v7  ;;  %v3116_v28 = vadd.f32 %v5344_v52, %v7846_v14  ;;  %9360 = vst [vmem:[#allocation19_spill] sm:$0xff] %v8020_v57 }
 0x183   : > { %3147 = vmax.xlane.f32.xlu0 %v3146_v22  ;;  %v5345_v22 = vld [vmem:[%s9202_s0 + $0x40] sm:$0xff]  ;;  %v3122_v10 = vadd.f32 %v5346_v54, %v2046_v61  ;;  %v2049_v21 = vmax.f32 %v1941_v11, %v9357_v53  ;;  %v3057_v14 = vadd.f32 %v5347_v38, %v7867_v4  ;;  %v1924_v44 = vmax.f32 %v1904_v43, %v7719_v24  ;;  %v5353_v11 = vld [vmem:[%s9202_s0 + $0x68] sm:$0xff]  ;;  %v9367_v54 = vld [vmem:[#allocation12_spill] sm:$0xff] }
 0x184   : > { %v1942_v42 = vmax.f32 %v1922_v32, %v9356_v20  ;;  %v7964_v58 = vadd.f32 %v5342_v16, %v2045_v3  ;;  %v3056_v19 = vadd.f32 %v5345_v22, %v7860_v25  ;;  %v9358_v7 = vld [vmem:[#allocation14_spill] sm:$0xff]  ;;  %v3141_v5 = vsel %vm724_vm0, %v3116_v28, -inf  ;;  %v9365_v22 = vld [vmem:[#allocation8_spill] sm:$0xff] }
 0x185   : > { %v9359_v25 = vmax.f32 %v7808_v30, %v7751_v17  ;;  %v5348_v8 = vld [vmem:[%s9202_s0 + $0x60] sm:$0xff]  ;;  %v3153_v4 = vsel %vm724_vm0, %v3122_v10, -inf  ;;  %3139 = vmax.xlane.f32.xlu1 %v3138_v35  ;;  %v8005_v30 = vadd.f32 %v5349_v13, %v2049_v21  ;;  %v3142_v60 = vmax.f32 %v3115_v18, %v3141_v5  ;;  %v8025_v1 = vpop.xlane.xlu0 %3269 }
 0x186   : > { %v2050_v36 = vmax.f32 %v1942_v42, %v9358_v7  ;;  %v7999_v26 = vadd.f32 %v5348_v8, %v2045_v3  ;;  %v3154_v43 = vmax.f32 %v7964_v58, %v3153_v4  ;;  %v8014_v31 = vadd.f32 %v5351_v59, %v2049_v21  ;;  %v9363_v15 = vld [vmem:[#allocation6_spill] sm:$0xff]  ;;  %v3042_v8 = vld [vmem:[%s9031_s5 + $0x70] sm:$0xff] }
 0x187   : > { %v1923_v27 = vmax.f32 %v9359_v25, %v7703_v12  ;;  %v5350_v12 = vld [vmem:[%s9202_s0 + $0x88] sm:$0xff]  ;;  %3090 = vmax.xlane.f32.xlu0 %v3089_v40  ;;  %v3084_v29 = vsel %vm724_vm0, %v3057_v14, -inf  ;;  %v1944_v45 = vmax.f32 %v1924_v44, %v7787_v50  ;;  %v3061_v20 = vadd.f32 %v5353_v11, %v2046_v61  ;;  %v9362_v50 = vld [vmem:[#allocation10_spill] sm:$0xff]  ;;  %v5357_v14 = vld [vmem:[%s9031_s5 + $0x98] sm:$0x3f]  ;;  %v8064_v25 = vpop.xlane.xlu1 %3290 }
 0x188   : > { %v3065_v24 = vadd.f32 %v5350_v12, %v2050_v36  ;;  %v3126_v34 = vadd.f32 %v5352_v2, %v2050_v36  ;;  %v3085_v40 = vmax.f32 %v3056_v19, %v3084_v29  ;;  %v9361_v42 = vmax.f32 %v7751_v17, %v7690_v37  ;;  %v9366_v19 = vld [vmem:[#allocation17_spill] sm:$0xff]  ;;  %v5354_v17 = vld [vmem:[%s9202_s0 + $0x90] sm:$0x3f]  ;;  %9368 = vst [vmem:[#allocation25_spill] sm:$0xff] %v8064_v25 }
 0x189   : > { %v1943_v3 = vmax.f32 %v1923_v27, %v7775_v39  ;;  %3143 = vmax.xlane.f32.xlu1 %v3142_v60  ;;  %v2052_v18 = vmax.f32 %v1944_v45, %v9363_v15  ;;  %v9364_v52 = vmax.f32 %v7763_v48, %v7709_v56  ;;  %v2027_v61 = vadd.f32 %v9366_v19, %v9365_v22  ;;  %v5355_v56 = vld [vmem:[%s9202_s0 + $0x98] sm:$0x3f]  ;;  %v5356_v36 = vld [vmem:[%s9031_s5 + $0x90] sm:$0x3f]  ;;  %v8071_v4 = vpop.xlane.xlu0 %3229 }
 0x18a   : > { %v3100_v32 = vsel %vm724_vm0, %v3065_v24, -inf  ;;  %v3161_v23 = vsel %vm724_vm0, %v3126_v34, -inf  ;;  %v1919_v16 = vmax.f32 %v9361_v42, %v7658_v46  ;;  %v2028_v10 = vadd.f32 %v9366_v19, %v9367_v54  ;;  %9369 = vst [vmem:[#allocation22_spill] sm:$0xff] %v8071_v4  ;;  %v9373_v42 = vld [vmem:[#allocation4_spill] sm:$0xff]  ;;  %v1329_v54 = vld [vmem:[%s9032_s6 + $0x40] sm:$0xff] }
 0x18b   : > { %v3101_v35 = vmax.f32 %v8005_v30, %v3100_v32  ;;  %v3162_v39 = vmax.f32 %v8014_v31, %v3161_v23  ;;  %v2051_v58 = vmax.f32 %v1943_v3, %v9362_v50  ;;  %v1920_v28 = vmax.f32 %v9364_v52, %v7676_v9  ;;  %3151 = vmax.xlane.f32.xlu0 %v3150_v63  ;;  %v3043_v63 = vld [vmem:[%s9031_s5 + $0x78] sm:$0xff]  ;;  %v5359_v31 = vld [vmem:[%s9202_s0 + $0x70] sm:$0xff]  ;;  %v8083_v45 = vpop.xlane.xlu1 %3220  ;;  %v9371_v23 = vld [vmem:[#allocation3_spill] sm:$0xff] }
 0x18c   : > { %v3092_v46 = vsel %vm724_vm0, %v3061_v20, -inf  ;;  %v1939_v37 = vmax.f32 %v1919_v16, -3e+38  ;;  %v3067_v9 = vadd.f32 %v5355_v56, %v2052_v18  ;;  %v3128_v5 = vadd.f32 %v5357_v14, %v2052_v18  ;;  %v5358_v30 = vld [vmem:[%s9202_s0 + $0x78] sm:$0xff]  ;;  %9370 = vst [vmem:[#allocation26_spill] sm:$0xff] %v8083_v45  ;;  %v1321_v14 = vld [vmem:[%s9032_s6] sm:$0xff] }
 0x18d   : > { %v3066_v53 = vadd.f32 %v5354_v17, %v2051_v58  ;;  %v3093_v48 = vmax.f32 %v7999_v26, %v3092_v46  ;;  %v1940_v21 = vmax.f32 %v1920_v28, -3e+38  ;;  %v3127_v38 = vadd.f32 %v5356_v36, %v2051_v58  ;;  %3086 = vmax.xlane.f32.xlu1 %v3085_v40  ;;  %v8086_v20 = vpop.xlane.xlu0 %3285 }
 0x18e   : > { %v2047_v7 = vmax.f32 %v1939_v37, %v2027_v61  ;;  %v3105_v44 = vsel %vm1100_vm8, %v3067_v9, -inf  ;;  %v3166_v59 = vsel %vm1100_vm8, %v3128_v5, -inf  ;;  %v3246_v11 = vadd.f32 %v3043_v63, %v9371_v23  ;;  %9372 = vst [vmem:[#allocation24_spill] sm:$0xff] %v8086_v20  ;;  %v1327_v37 = vld [vmem:[%s9032_s6 + $0x30] sm:$0xff]  ;;  %v1325_v9 = vld [vmem:[%s9032_s6 + $0x20] sm:$0xff]  ;;  %v3363_v23 = vld [vmem:[%s9035_s9 + $0x8] sm:$0xff] }
 0x18f   : > { %v3104_v27 = vsel %vm1098_vm2, %v3066_v53, -inf  ;;  %v2048_v26 = vmax.f32 %v1940_v21, %v2028_v10  ;;  %3155 = vmax.xlane.f32.xlu0 %v3154_v43  ;;  %v3165_v60 = vsel %vm1098_vm2, %v3127_v38, -inf  ;;  %v3245_v16 = vadd.f32 %v3042_v8, %v9373_v42  ;;  %v1328_v53 = vld [vmem:[%s9032_s6 + $0x38] sm:$0xff]  ;;  %v1326_v21 = vld [vmem:[%s9032_s6 + $0x28] sm:$0xff]  ;;  %4842 = vmatprep.mubr.msk.f32.mxu1 %vm724_vm0, %v3363_v23 }
 0x190   : > { %v3106_v13 = vmax.f32 %v3104_v27, %v3105_v44  ;;  %v3062_v2 = vadd.f32 %v5359_v31, %v2047_v7  ;;  %v3123_v34 = vadd.f32 %v3042_v8, %v2047_v7  ;;  %v3167_v29 = vmax.f32 %v3165_v60, %v3166_v59  ;;  %v1324_v38 = vld [vmem:[%s9032_s6 + $0x18] sm:$0xff]  ;;  %v1322_v27 = vld [vmem:[%s9032_s6 + $0x8] sm:$0xff]  ;;  %v3386_v8 = vld [vmem:[%s9036_s10 + $0x20] sm:$0xff] }
 0x191   : > { %v3063_v12 = vadd.f32 %v5358_v30, %v2048_v26  ;;  %v3124_v24 = vadd.f32 %v3043_v63, %v2048_v26  ;;  %3094 = vmax.xlane.f32.xlu1 %v3093_v48  ;;  %v3279_v50 = vsel %vm724_vm0, %v3246_v11, -inf  ;;  %v1323_v63 = vld [vmem:[%s9032_s6 + $0x10] sm:$0xff]  ;;  %v3390_v60 = vld [vmem:[%s9036_s10 + $0x40] sm:$0xff]  ;;  %v3385_v11 = vld [vmem:[%s9036_s10 + $0x18] sm:$0xff] }
 0x192   : > { %v3384_v30 = vld [vmem:[%s9036_s10 + $0x10] sm:$0xff]  ;;  %v3382_v59 = vld [vmem:[%s9036_s10] sm:$0xff] }
 0x193   : > { %v3096_v43 = vsel %vm724_vm0, %v3063_v12, -inf  ;;  %v3157_v32 = vsel %vm724_vm0, %v3124_v24, -inf  ;;  %3102 = vmax.xlane.f32.xlu0 %v3101_v35  ;;  %v8092_v15 = vpop.xlane.xlu0 %1064  ;;  %v3280_v35 = vmax.f32 %v3245_v16, %v3279_v50  ;;  %v3383_v50 = vld [vmem:[%s9036_s10 + $0x8] sm:$0xff] }
 0x194   : > { %v3097_v40 = vmax.f32 %v3062_v2, %v3096_v43  ;;  %v3158_v3 = vmax.f32 %v3123_v34, %v3157_v32  ;;  %v8090_v58 = vpop.xlane.xlu1 %1188  ;;  %v3389_v2 = vld [vmem:[%s9036_s10 + $0x38] sm:$0xff]  ;;  %v3388_v43 = vld [vmem:[%s9036_s10 + $0x30] sm:$0xff] }
 0x195   : > { %9374 = vst [vmem:[#allocation5_spill] sm:$0xff] %v8090_v58 }
 0x196   : > { %3098 = vmax.xlane.f32.xlu1 %v3097_v40 }
 0x197   : > { %3163 = vmax.xlane.f32.xlu0 %v3162_v39  ;;  %v8096_v52 = vpop.xlane.xlu0 %1127 }
 0x198   : > { %v8094_v18 = vpop.xlane.xlu1 %1249 }
 0x199   : > { %9375 = vst [vmem:[#allocation7_spill] sm:$0xff] %v8094_v18 }
 0x19a   : > { %3159 = vmax.xlane.f32.xlu1 %v3158_v3  ;;  %v3387_v3 = vld [vmem:[%s9036_s10 + $0x28] sm:$0xff] }
 0x19b   : > { %3107 = vmax.xlane.f32.xlu0 %v3106_v13  ;;  %v8100_v39 = vpop.xlane.xlu0 %1253  ;;  %v3391_v13 = vld [vmem:[%s9036_s10 + $0x48] sm:$0x3f] }
 0x19c   : > { %v8098_v28 = vpop.xlane.xlu1 %1068  ;;  %9376 = vst [vmem:[#allocation11_spill] sm:$0xff] %v8100_v39 }
 0x19e   : > { %3168 = vmax.xlane.f32.xlu1 %v3167_v29 }
 0x19f   : > { %3281 = vmax.xlane.f32.xlu0 %v3280_v35  ;;  %v8104_v19 = vpop.xlane.xlu0 %1072 }
 0x1a0   : > { %v8102_v22 = vpop.xlane.xlu1 %1131 }
 0x1a3   : > { %v8111_v10 = vpop.xlane.xlu0 %1135 }
 0x1a4   : > { %v8106_v61 = vpop.xlane.xlu1 %1192 }
 0x1a5   : > { %9377 = vst [vmem:[#allocation9_spill] sm:$0xff] %v8106_v61 }
 0x1a7   : > { %v8123_v56 = vpop.xlane.xlu0 %1257 }
 0x1a8   : > { %v8113_v46 = vpop.xlane.xlu1 %1196  ;;  %9378 = vst [vmem:[#allocation16_spill] sm:$0xff] %v8123_v56 }
 0x1ab   : > { %v8136_v7 = vpop.xlane.xlu0 %1261 }
 0x1ac   : > { %v8118_v17 = vpop.xlane.xlu1 %1076  ;;  %9379 = vst [vmem:[#allocation20_spill] sm:$0xff] %v8136_v7 }
 0x1af   : > { %1373 = vperm.xlu1 %5192, %v1329_v54   ;;  %v8151_v44 = vpop.xlane.xlu0 %1265 }
 0x1b0   : > { %v8128_v48 = vpop.xlane.xlu1 %1139 }
 0x1b3   : > { %1363 = vperm.xlu1 %5192, %v1327_v37   ;;  %v8164_v12 = vpop.xlane.xlu0 %1084 }
 0x1b4   : > { %v8138_v36 = vpop.xlane.xlu1 %1200 }
 0x1b5   : > { %1368 = vperm.xlu0 %5191, %v1328_v53  }
 0x1b7   : > { %1353 = vperm.xlu1 %5192, %v1325_v9   ;;  %v8179_v34 = vpop.xlane.xlu0 %1088 }
 0x1b8   : > { %v8146_v5 = vpop.xlane.xlu1 %1080 }
 0x1b9   : > { %1358 = vperm.xlu0 %5191, %v1326_v21  }
 0x1bb   : > { %1343 = vperm.xlu1 %5192, %v1323_v63   ;;  %v8186_v32 = vpop.xlane.xlu0 %1273 }
 0x1bc   : > { %v8156_v26 = vpop.xlane.xlu1 %1143 }
 0x1bd   : > { %1348 = vperm.xlu0 %5191, %v1324_v38  }
 0x1bf   : > { %1333 = vperm.xlu1 %5192, %v1321_v14   ;;  %v8200_v42 = vpop.xlane.xlu0 %1092 }
 0x1c0   : > { %v8166_v24 = vpop.xlane.xlu1 %1204 }
 0x1c1   : > { %1338 = vperm.xlu0 %5191, %v1322_v27  }
 0x1c3   : > { %3414 = vperm.xlu1 %5192, %v3386_v8   ;;  %v8207_v35 = vpop.xlane.xlu0 %1277 }
 0x1c4   : > { %v8174_v31 = vpop.xlane.xlu1 %1147 }
 0x1c5   : > { %3439 = vperm.xlu0 %5191, %v3391_v13  }
 0x1c7   : > { %3404 = vperm.xlu1 %5192, %v3384_v30   ;;  %v8211_v37 = vpop.xlane.xlu0 %1159 }
 0x1c8   : > { %v8181_v29 = vpop.xlane.xlu1 %1208 }
 0x1c9   : > { %3434 = vperm.xlu0 %5191, %v3390_v60  }
 0x1cb   : > { %3394 = vperm.xlu1 %5192, %v3382_v59   ;;  %v8215_v9 = vpop.xlane.xlu0 %1281 }
 0x1cc   : > { %v8188_v40 = vpop.xlane.xlu1 %1269 }
 0x1cd   : > { %3429 = vperm.xlu0 %5191, %v3389_v2  }
 0x1cf   : > { %v1104_v63 = vpop.xlane.xlu0 %1103 }
 0x1d0   : > { %v8202_v16 = vpop.xlane.xlu1 %1151 }
 0x1d1   : > { %3424 = vperm.xlu0 %5191, %v3388_v43  }
 0x1d3   : > { %v8221_v14 = vpop.xlane.xlu0 %1286 }
 0x1d4   : > { %v8209_v54 = vpop.xlane.xlu1 %1212 }
 0x1d5   : > { %3419 = vperm.xlu0 %5191, %v3387_v3  }
 0x1d8   : > { %v8213_v53 = vpop.xlane.xlu1 %1155 }
 0x1d9   : > { %3409 = vperm.xlu0 %5191, %v3385_v11  }
 0x1dc   : > { %v8217_v21 = vpop.xlane.xlu1 %1216 }
 0x1dd   : > { %3399 = vperm.xlu0 %5191, %v3383_v50  }
 0x1e0   : > { %v8219_v38 = vpop.xlane.xlu1 %1096 }
 0x1e4   : > { %v8223_v27 = vpop.xlane.xlu1 %1220 }
 0x1e8   : > { %v1165_v13 = vpop.xlane.xlu1 %1164 }
 0x1ec   : > { %v1226_v60 = vpop.xlane.xlu1 %1225 }
 0x1f4   : > { %v3071_v8 = vpop.xlane.xlu0 %3070 }
 0x200   : > { %v3075_v30 = vpop.xlane.xlu0 %3074 }
 0x204   : > { %v3079_v59 = vpop.xlane.xlu0 %3078 }
 0x206   : > { %v3132_v2 = vpop.xlane.xlu1 %3131 }
 0x208   : > { %v3083_v43 = vpop.xlane.xlu0 %3082 }
 0x20a   : > { %v3136_v3 = vpop.xlane.xlu1 %3135 }
 0x20c   : > { %v3148_v23 = vpop.xlane.xlu0 %3147 }
 0x20e   : > { %v3140_v11 = vpop.xlane.xlu1 %3139 }
 0x210   : > { %v3091_v50 = vpop.xlane.xlu0 %3090 }
 0x212   : > { %v3144_v20 = vpop.xlane.xlu1 %3143 }
 0x213   : > { %v3295_v4 = vsel %vm1288_vm9, %v3083_v43, %v3144_v20 }
 0x214   : > { %v3152_v18 = vpop.xlane.xlu0 %3151 }
 0x215   : > { %v3297_v25 = vsel %vm1288_vm9, %v3091_v50, %v3152_v18  ;;  %v3294_v18 = vsel %vm1288_vm9, %v3079_v59, %v3140_v11 }
 0x216   : > { %v3087_v39 = vpop.xlane.xlu1 %3086  ;;  %v3307_v58 = vsel %vm1299_vm10, %v3297_v25, %v7842_v47  ;;  %v3305_v47 = vsel %vm1299_vm10, %v3295_v4, %v7738_v55  ;;  %v3304_v20 = vsel %vm1299_vm10, %v3294_v18, %v7766_v0  ;;  %v3292_v55 = vsel %vm1288_vm9, %v3071_v8, %v3132_v2  ;;  %v9381_v0 = vld [vmem:[#allocation23_spill] sm:$0xff] }
 0x217   : > { %v3296_v57 = vsel %vm1288_vm9, %v3087_v39, %v3148_v23  ;;  %v3317_v7 = vsel %vm1310_vm11, %v3307_v58, %v7900_v33 }
 0x218   : > { %v3156_v45 = vpop.xlane.xlu0 %3155  ;;  %v3306_v56 = vsel %vm1299_vm10, %v3296_v57, %v7952_v49  ;;  %v3293_v57 = vsel %vm1288_vm9, %v3075_v30, %v3136_v3  ;;  %v3341_v25 = vrot.slane %v3317_v7, 2  ;;  %v3314_v7 = vsel %vm1310_vm11, %v3304_v20, %v9381_v0  ;;  %v9382_v30 = vld [vmem:[#allocation15_spill] sm:$0xff] }
 0x219   : > { %v3316_v39 = vsel %vm1310_vm11, %v3306_v56, %v8025_v1  ;;  %v3302_v59 = vsel %vm1299_vm10, %v3292_v55, %v9382_v30  ;;  %v1298_v3 = vsel %vm1288_vm9, %v1104_v63, %v1165_v13  ;;  %v1297_v13 = vsel %vm1288_vm9, %v8219_v38, %v8211_v37 }
 0x21a   : > { %v3095_v61 = vpop.xlane.xlu1 %3094  ;;  %v3339_v58 = vrot.slane %v3316_v39, 2  ;;  %v1309_v18 = vsel %vm1299_vm10, %v1298_v3, %v1226_v60  ;;  %v3335_v39 = vrot.slane %v3314_v7, 2  ;;  %v1308_v55 = vsel %vm1299_vm10, %v1297_v13, %v8223_v27 }
 0x21b   : > { %v3298_v23 = vsel %vm1288_vm9, %v3095_v61, %v3156_v45  ;;  %v9380_v61 = vld [vmem:[#allocation18_spill] sm:$0xff]  ;;  %v1296_v37 = vsel %vm1288_vm9, %v8200_v42, %v8213_v53  ;;  %v1319_v27 = vsel %vm1310_vm11, %v1308_v55, %v8215_v9  ;;  %v1295_v7 = vsel %vm1288_vm9, %v8179_v34, %v8202_v16 }
 0x21c   : > { %v8235_v50 = vpop.xlane.xlu0 %3102  ;;  %v3308_v49 = vsel %vm1299_vm10, %v3298_v23, %v7909_v51  ;;  %v3315_v51 = vsel %vm1310_vm11, %v3305_v47, %v7777_v6  ;;  %v9383_v6 = vmov 0.0   ;;  %v3342_v43 = vsel %vm1098_vm2, %v3339_v58, %v3341_v25  ;;  %v9384_v47 = vld [vmem:[#allocation21_spill] sm:$0xff] }
 0x21d   : > { %v8247_v33 = vsel %vm1310_vm11, %v3308_v49, %v7959_v41  ;;  %v3303_v41 = vsel %vm1299_vm10, %v3293_v57, %v9380_v61  ;;  %v3337_v8 = vrot.slane %v3315_v51, 2  ;;  %v3312_v49 = vsel %vm1310_vm11, %v3302_v59, %v9384_v47  ;;  %v9385_v61 = vld [vmem:[#allocation13_spill] sm:$0xff]  ;;  %v9389_v47 = vld [vmem:[#allocation16_spill] sm:$0xff] }
 0x21e   : > { %v3343_v1 = vrot.slane %v8247_v33, 2  ;;  %v3313_v11 = vsel %vm1310_vm11, %v3303_v41, %v7851_v62  ;;  %v1320_v62 = vsel %vm1310_vm11, %v1309_v18, %v8221_v14  ;;  %v3332_v60 = vrot.slane %v3312_v49, 2  ;;  %v3366_v33 = vld [vmem:[%s9035_s9 + $0x20] sm:$0xff] }
 0x21f   : > { %v8252_v45 = vpop.xlane.xlu1 %3098  ;;  %v3340_v23 = vsel %vm1098_vm2, %v3337_v8, %v3339_v58  ;;  %v3333_v20 = vrot.slane %v3313_v11, 2  ;;  %v3338_v63 = vsel %vm1098_vm2, %v3335_v39, %v3337_v8  ;;  %v1390_v41 = vmul.f32 %v9385_v61, %v1320_v62 }
 0x220   : > { %v8257_v4 = vpop.xlane.xlu0 %3163  ;;  %v3344_v56 = vsel %vm1098_vm2, %v3341_v25, %v3343_v1  ;;  %v1307_v38 = vsel %vm1299_vm10, %v1296_v37, %v8217_v21  ;;  %v1306_v42 = vsel %vm1299_vm10, %v1295_v7, %v8209_v54  ;;  %v1293_v34 = vsel %vm1288_vm9, %v8146_v5, %v8156_v26 }
 0x221   : > { %3475 = vmatpush1.msra.mxu1 %v3344_v56  ;;  %v3336_v58 = vsel %vm1098_vm2, %v3333_v20, %v3335_v39  ;;  %v3334_v14 = vsel %vm1098_vm2, %v3332_v60, %v3333_v20  ;;  %v3361_v0 = vsel %vm1098_vm2, %v1390_v41, %v3332_v60  ;;  %v1318_v21 = vsel %vm1310_vm11, %v1307_v38, %v8207_v35  ;;  %v9390_v20 = vld [vmem:[#allocation5_spill] sm:$0xff]  ;;  %v9395_v41 = vld [vmem:[#allocation7_spill] sm:$0xff] }
 0x222   : > { %3476 = vmatprep.subr.mxu1 %v9383_v6  ;;  %v1294_v16 = vsel %vm1288_vm9, %v8164_v12, %v8174_v31  ;;  %v1317_v54 = vsel %vm1310_vm11, %v1306_v42, %v8186_v32  ;;  %v1304_v8 = vsel %vm1299_vm10, %v1293_v34, %v8166_v24  ;;  %v1292_v5 = vsel %vm1288_vm9, %v8118_v17, %v8128_v48  ;;  %v3368_v34 = vld [vmem:[%s9035_s9 + $0x30] sm:$0xff] }
 0x223   : > { %v8268_v2 = vpop.xlane.xlu1 %3159  ;;  %3477 = vmatpush1.msra.mxu1 %v3342_v43  ;;  %v1305_v35 = vsel %vm1299_vm10, %v1294_v16, %v8181_v29  ;;  %v1303_v31 = vsel %vm1299_vm10, %v1292_v5, %v8138_v36  ;;  %v1291_v29 = vsel %vm1288_vm9, %v8104_v19, %v8111_v10  ;;  %v1315_v32 = vsel %vm1310_vm11, %v1304_v8, %v8151_v44  ;;  %v9386_v10 = vld [vmem:[#allocation20_spill] sm:$0xff]  ;;  %v3371_v16 = vld [vmem:[%s9035_s9 + $0x48] sm:$0xff]  ;;  %v3373_v8 = vld [vmem:[%s9035_s9 + $0x58] sm:$0xff] }
 0x224   : > { %3478 = vmatprep.subr.mxu1 %v9383_v6  ;;  %v3108_v57 = vpop.xlane.xlu0 %3107  ;;  %v1316_v26 = vsel %vm1310_vm11, %v1305_v35, %v8188_v40  ;;  %v1302_v17 = vsel %vm1299_vm10, %v1291_v29, %v8113_v46  ;;  %v1289_v36 = vsel %vm1288_vm9, %v8092_v15, %v8096_v52  ;;  %v1290_v19 = vsel %vm1288_vm9, %v8098_v28, %v8102_v22  ;;  %v9387_v46 = vld [vmem:[#allocation9_spill] sm:$0xff]  ;;  %v9388_v28 = vld [vmem:[#allocation22_spill] sm:$0xff]  ;;  %v3372_v35 = vld [vmem:[%s9035_s9 + $0x50] sm:$0xff] }
 0x225   : > { %3479 = vmatpush1.msra.mxu1 %v3340_v23  ;;  %v1314_v44 = vsel %vm1310_vm11, %v1303_v31, %v9386_v10  ;;  %v1301_v39 = vsel %vm1299_vm10, %v1290_v19, %v9387_v46  ;;  %v3300_v23 = vsel %vm1288_vm9, %v8235_v50, %v8257_v4  ;;  %v3299_v15 = vsel %vm1288_vm9, %v8252_v45, %v8268_v2  ;;  %v9391_v50 = vld [vmem:[#allocation19_spill] sm:$0xff]  ;;  %v3377_v5 = vld [vmem:[%s9035_s9 + $0x78] sm:$0xff]  ;;  %v3378_v31 = vld [vmem:[%s9035_s9 + $0x80] sm:$0xff] }
 0x226   : > { %3480 = vmatprep.subr.mxu1 %v9383_v6  ;;  %v1313_v49 = vsel %vm1310_vm11, %v1302_v17, %v9389_v47  ;;  %v3310_v4 = vsel %vm1299_vm10, %v3300_v23, %v9391_v50  ;;  %v9393_v2 = vld [vmem:[#allocation11_spill] sm:$0xff]  ;;  %v3380_v29 = vld [vmem:[%s9035_s9 + $0x90] sm:$0x3f] }
 0x227   : > { %v3169_v25 = vpop.xlane.xlu1 %3168  ;;  %3481 = vmatpush1.msra.mxu1 %v3338_v63  ;;  %v9392_v63 = vld [vmem:[#allocation26_spill] sm:$0xff]  ;;  %v1312_v62 = vsel %vm1310_vm11, %v1301_v39, %v9393_v2  ;;  %v8467_v17 = vld [vmem:[%s9038_s12 + $0x48] sm:$0x3f] }
 0x228   : > { %3482 = vmatprep.subr.mxu1 %v9383_v6  ;;  %v8291_v51 = vpop.xlane.xlu0 %3281  ;;  %v3301_v48 = vsel %vm1288_vm9, %v3108_v57, %v3169_v25  ;;  %v1300_v25 = vsel %vm1299_vm10, %v1289_v36, %v9390_v20  ;;  %v3309_v45 = vsel %vm1299_vm10, %v3299_v15, %v9392_v63  ;;  %4166 = vrot.lane.b32.xlu1 %v8467_v17, %s5371_s29  ;;  %v8495_v36 = vld [vmem:[%s9038_s12 + $0x20] sm:$0xff]  ;;  %v8500_v19 = vld [vmem:[%s9038_s12 + $0x28] sm:$0xff] }
 0x229   : > { %3483 = vmatpush1.msra.mxu1 %v3336_v58  ;;  %v3311_v22 = vsel %vm1299_vm10, %v3301_v48, %v9388_v28  ;;  %v9394_v58 = vld [vmem:[#allocation25_spill] sm:$0xff]  ;;  %v3319_v38 = vsel %vm1310_vm11, %v3309_v45, %v8291_v51  ;;  %v8472_v48 = vld [vmem:[%s9038_s12 + $0x40] sm:$0xff] }
 0x22a   : > { %3484 = vmatprep.subr.mxu1 %v9383_v6  ;;  %v3321_v55 = vsel %vm1310_vm11, %v3311_v22, %v9394_v58  ;;  %4164 = vrot.lane.b32.xlu0 %v8472_v48, %s5371_s29 }
 0x22b   : > { %v1374_v56 = vpop.permute.xlu1 %1373  ;;  %3485 = vmatpush1.msra.mxu1 %v3334_v14  ;;  %v9396_v14 = vld [vmem:[#allocation24_spill] sm:$0xff] }
 0x22c   : > { %3486 = vmatprep.subr.mxu1 %v9383_v6  ;;  %v1389_v30 = vmul.f32 %v1374_v56, %v1319_v27  ;;  %v1311_v56 = vsel %vm1310_vm11, %v1300_v25, %v9395_v41  ;;  %v3320_v37 = vsel %vm1310_vm11, %v3310_v4, %v9396_v14 }
 0x22d   : > { %3487 = vmatpush1.msra.mxu1 %v3361_v0  ;;  %v3349_v0 = vrot.slane %v3321_v55, 2  ;;  %v3347_v7 = vrot.slane %v3320_v37, 2 }
 0x22e   : > { %3488 = vmatprep.subr.mxu1 %v9383_v6 }
 0x22f   : > { %v1364_v53 = vpop.permute.xlu1 %1363  ;;  %3489 = vmatpush1.msra.mxu1 %v1389_v30  ;;  %v3345_v30 = vrot.slane %v3319_v38, 2  ;;  %v3350_v42 = vsel %vm1098_vm2, %v3347_v7, %v3349_v0 }
 0x230   : > { %v1369_v9 = vpop.permute.xlu0 %1368  ;;  %3490 = vmatprep.subr.mxu1 %v9383_v6  ;;  %v1387_v43 = vmul.f32 %v1364_v53, %v1317_v54  ;;  %v3362_v53 = vld [vmem:[%s9035_s9] sm:$0xff] }
 0x231   : > { %v1388_v59 = vmul.f32 %v1369_v9, %v1318_v21  ;;  %v3348_v51 = vsel %vm1098_vm2, %v3345_v30, %v3347_v7  ;;  %v3346_v21 = vsel %vm1098_vm2, %v3343_v1, %v3345_v30  ;;  %v3365_v9 = vld [vmem:[%s9035_s9 + $0x18] sm:$0xff]  ;;  %v3370_v54 = vld [vmem:[%s9035_s9 + $0x40] sm:$0xff] }
 0x232   : > { %v3369_v1 = vld [vmem:[%s9035_s9 + $0x38] sm:$0xff] }
 0x233   : > { %3491 = vmatpush1.msra.mxu1 %v1388_v59  ;;  %v1354_v3 = vpop.permute.xlu1 %1353  ;;  %v3364_v59 = vld [vmem:[%s9035_s9 + $0x10] sm:$0xff] }
 0x234   : > { %v1359_v12 = vpop.permute.xlu0 %1358  ;;  %3492 = vmatprep.subr.mxu1 %v9383_v6  ;;  %v1385_v40 = vmul.f32 %v1354_v3, %v1315_v32  ;;  %v3374_v3 = vld [vmem:[%s9035_s9 + $0x60] sm:$0xff] }
 0x235   : > { %v1386_v24 = vmul.f32 %v1359_v12, %v1316_v26  ;;  %3493 = vmatpush1.msra.mxu1 %v1387_v43  ;;  %v3375_v43 = vld [vmem:[%s9035_s9 + $0x68] sm:$0xff]  ;;  %v3376_v26 = vld [vmem:[%s9035_s9 + $0x70] sm:$0xff]  ;;  %v3599_v32 = vld [vmem:[%s9037_s11] sm:$0xff] }
 0x236   : > { %3494 = vmatprep.subr.mxu1 %v9383_v6  ;;  %v3379_v12 = vld [vmem:[%s9035_s9 + $0x88] sm:$0xff]  ;;  %5025 = vmatprep.mubr.msk.f32.mxu0 %vm3619_vm12, %v3599_v32  ;;  %v3607_v32 = vld [vmem:[%s9037_s11 + $0x40] sm:$0xff] }
 0x237   : > { %3495 = vmatpush1.msra.mxu1 %v1386_v24  ;;  %v1344_v11 = vpop.permute.xlu1 %1343  ;;  %v3381_v24 = vld [vmem:[%s9035_s9 + $0x98] sm:$0x3f] }
 0x238   : > { %v1349_v18 = vpop.permute.xlu0 %1348  ;;  %3496 = vmatprep.subr.mxu1 %v9383_v6  ;;  %v1383_v57 = vmul.f32 %v1344_v11, %v1313_v49  ;;  %v8486_v11 = vld [vmem:[%s9038_s12 + $0x38] sm:$0xff] }
 0x239   : > { %v1384_v52 = vmul.f32 %v1349_v18, %v1314_v44  ;;  %3497 = vmatpush1.msra.mxu1 %v1385_v40  ;;  %v8481_v40 = vld [vmem:[%s9038_s12 + $0x30] sm:$0xff]  ;;  %4162 = vrot.lane.b32.xlu0 %v8486_v11, %s5371_s29 }
 0x23a   : > { %3498 = vmatprep.subr.mxu1 %v9383_v6  ;;  %4160 = vrot.lane.b32.xlu1 %v8481_v40, %s5371_s29 }
 0x23b   : > { %3499 = vmatpush1.msra.mxu1 %v1384_v52  ;;  %v1334_v60 = vpop.permute.xlu1 %1333 }
 0x23c   : > { %v1339_v13 = vpop.permute.xlu0 %1338  ;;  %3500 = vmatprep.subr.mxu1 %v9383_v6  ;;  %v1381_v27 = vmul.f32 %v1334_v60, %v1311_v56 }
 0x23d   : > { %v1382_v61 = vmul.f32 %v1339_v13, %v1312_v62  ;;  %3501 = vmatpush1.msra.mxu1 %v1383_v57  ;;  %4158 = vrot.lane.b32.xlu0 %v8500_v19, %s5371_s29 }
 0x23e   : > { %3502 = vmatprep.subr.mxu1 %v9383_v6  ;;  %4156 = vrot.lane.b32.xlu1 %v8495_v36, %s5371_s29 }
 0x23f   : > { %3503 = vmatpush1.msra.mxu1 %v1382_v61  ;;  %v3415_v30 = vpop.permute.xlu1 %3414 }
 0x240   : > { %3504 = vmatprep.subr.mxu1 %v9383_v6  ;;  %v3440_v57 = vpop.permute.xlu0 %3439 }
 0x241   : > { %3505 = vmatpush1.msra.mxu1 %v1381_v27 }
 0x242   : > { %3530 = vmatprep.subr.mxu1 %v9383_v6 }
 0x243   : > { %4841 = vmatpush2.msk.msra.mxu1 %vm755_vm4, %v3349_v0 }
 0x244   : > { %3532 = vmatprep.subr.mxu1 %v9383_v6  ;;  %v3435_v4 = vpop.permute.xlu0 %3434 }
 0x245   : > { %3533 = vmatpush2.msra.mxu1 %v3350_v42 }
 0x246   : > { %3534 = vmatprep.subr.mxu1 %v9383_v6 }
 0x247   : > { %3535 = vmatpush2.msra.mxu1 %v3348_v51 }
 0x248   : > { %3536 = vmatprep.subr.mxu1 %v9383_v6  ;;  %v3367_v6 = vld [vmem:[%s9035_s9 + $0x28] sm:$0xff]  ;;  %v3430_v62 = vpop.permute.xlu0 %3429 }
 0x249   : > { %3537 = vmatpush2.msra.mxu1 %v3346_v21 }
 0x24a   : > { %3539 = vmatmul.mubr.f32.vlgmr.msra.gmra.mxu1 %v3362_v53 }
 0x24b   : > { %4843 = vmatprep.mubr.msk.f32.mxu1 %vm724_vm0, %v3365_v9 }
 0x24c   : > { %v3425_v14 = vpop.permute.xlu0 %3424 }
 0x24e   : > { %3544 = vmatmul.mubr.f32.gmra.mxu1 %v3364_v59  ;;  %v3405_v59 = vpop.permute.xlu1 %3404 }
 0x24f   : > { %4844 = vmatprep.mubr.msk.f32.mxu1 %vm724_vm0, %v3367_v6 }
 0x250   : > { %v3420_v27 = vpop.permute.xlu0 %3419 }
 0x252   : > { %3549 = vmatmul.mubr.f32.gmra.mxu1 %v3366_v33 }
 0x253   : > { %4845 = vmatprep.mubr.msk.f32.mxu1 %vm724_vm0, %v3369_v1 }
 0x254   : > { %v3410_v53 = vpop.permute.xlu0 %3409 }
 0x256   : > { %3554 = vmatmul.mubr.f32.gmra.mxu1 %v3368_v34 }
 0x257   : > { %4846 = vmatprep.mubr.msk.f32.mxu1 %vm724_vm0, %v3371_v16 }
 0x258   : > { %v3400_v1 = vpop.permute.xlu0 %3399 }
 0x25a   : > { %3559 = vmatmul.mubr.f32.gmra.mxu1 %v3370_v54  ;;  %v3395_v54 = vpop.permute.xlu1 %3394 }
 0x25b   : > { %4847 = vmatprep.mubr.msk.f32.mxu1 %vm724_vm0, %v3373_v8 }
 0x25e   : > { %3564 = vmatmul.mubr.f32.gmra.mxu1 %v3372_v35 }
 0x25f   : > { %4848 = vmatprep.mubr.msk.f32.mxu1 %vm724_vm0, %v3375_v43 }
 0x262   : > { %3569 = vmatmul.mubr.f32.gmra.mxu1 %v3374_v3  ;;  %v3600_v3 = vld [vmem:[%s9037_s11 + $0x8] sm:$0xff] }
 0x263   : > { %4849 = vmatprep.mubr.msk.f32.mxu1 %vm724_vm0, %v3377_v5  ;;  %v3601_v5 = vld [vmem:[%s9037_s11 + $0x10] sm:$0xff] }
 0x266   : > { %3574 = vmatmul.mubr.f32.gmra.mxu1 %v3376_v26  ;;  %v3602_v26 = vld [vmem:[%s9037_s11 + $0x18] sm:$0xff] }
 0x267   : > { %4850 = vmatprep.mubr.msk.f32.mxu1 %vm724_vm0, %v3379_v12  ;;  %v3603_v12 = vld [vmem:[%s9037_s11 + $0x20] sm:$0xff] }
 0x26a   : > { %3579 = vmatmul.mubr.f32.gmra.mxu1 %v3378_v31  ;;  %v3604_v31 = vld [vmem:[%s9037_s11 + $0x28] sm:$0xff] }
 0x26b   : > { %4851 = vmatprep.mubr.msk.f32.mxu1 %vm724_vm0, %v3381_v24  ;;  %v3605_v24 = vld [vmem:[%s9037_s11 + $0x30] sm:$0xff] }
 0x26e   : > { %3584 = vmatmul.mubr.f32.gmra.mxu1 %v3380_v29  ;;  %v3606_v29 = vld [vmem:[%s9037_s11 + $0x38] sm:$0xff] }
 0x30a   : > { %v3540_v10 = vpop.f32.mrf.mxu1 }
 0x30b   : > { %v3541_v8 = vadd.f32 %v3540_v10, %v3395_v54  ;;  %v3608_v10 = vld [vmem:[%s9037_s11 + $0x48] sm:$0xff] }
 0x30c   : > { %v3542_v44 = vpop.f32.mrf.mxu1 }
 0x30d   : > { %v3589_v43 = vmax.f32 %v3541_v8, 0.0  ;;  %v3609_v44 = vld [vmem:[%s9037_s11 + $0x50] sm:$0xff] }
 0x30e   : > { %v3545_v18 = vpop.f32.mrf.mxu1 }
 0x30f   : > { %v3546_v34 = vadd.f32 %v3545_v18, %v3400_v1  ;;  %v3610_v18 = vld [vmem:[%s9037_s11 + $0x58] sm:$0xff] }
 0x310   : > { %v3547_v46 = vpop.f32.mrf.mxu1 }
 0x311   : > { %v3590_v35 = vmax.f32 %v3546_v34, 0.0  ;;  %v3611_v46 = vld [vmem:[%s9037_s11 + $0x60] sm:$0xff] }
 0x312   : > { %v3550_v39 = vpop.f32.mrf.mxu1 }
 0x313   : > { %v3551_v6 = vadd.f32 %v3550_v39, %v3405_v59  ;;  %v3612_v39 = vld [vmem:[%s9037_s11 + $0x68] sm:$0xff] }
 0x314   : > { %v3552_v23 = vpop.f32.mrf.mxu1 }
 0x315   : > { %v3591_v16 = vmax.f32 %v3551_v6, 0.0  ;;  %v3613_v23 = vld [vmem:[%s9037_s11 + $0x70] sm:$0xff] }
 0x316   : > { %v3555_v15 = vpop.f32.mrf.mxu1 }
 0x317   : > { %v3556_v21 = vadd.f32 %v3555_v15, %v3410_v53  ;;  %v3614_v15 = vld [vmem:[%s9037_s11 + $0x78] sm:$0xff] }
 0x318   : > { %v3557_v52 = vpop.f32.mrf.mxu1 }
 0x319   : > { %v3592_v33 = vmax.f32 %v3556_v21, 0.0  ;;  %v3615_v52 = vld [vmem:[%s9037_s11 + $0x80] sm:$0xff] }
 0x31a   : > { %v3560_v28 = vpop.f32.mrf.mxu1 }
 0x31b   : > { %v3561_v42 = vadd.f32 %v3560_v28, %v3415_v30  ;;  %v3616_v28 = vld [vmem:[%s9037_s11 + $0x88] sm:$0xff] }
 0x31c   : > { %v3562_v22 = vpop.f32.mrf.mxu1 }
 0x31d   : > { %v3593_v9 = vmax.f32 %v3561_v42, 0.0  ;;  %v3617_v22 = vld [vmem:[%s9037_s11 + $0x90] sm:$0xff] }
 0x31e   : > { %v3565_v47 = vpop.f32.mrf.mxu1 }
 0x31f   : > { %v3566_v0 = vadd.f32 %v3565_v47, %v3420_v27  ;;  %v3618_v47 = vld [vmem:[%s9037_s11 + $0x98] sm:$0xf] }
 0x320   : > { %v3567_v49 = vpop.f32.mrf.mxu1 }
 0x321   : > { %v3594_v51 = vmax.f32 %v3566_v0, 0.0  ;;  %v4167_v49 = vpop.permute.xlu1 %4166 }
 0x322   : > { %v3570_v20 = vpop.f32.mrf.mxu1  ;;  %5055 = vmatprep.subr.msk.mxu1 %vm1098_vm2, %v4167_v49 }
 0x323   : > { %v3571_v37 = vadd.f32 %v3570_v20, %v3425_v14  ;;  %5056 = vmatpush3.msk.msra.mxu1 %vm1098_vm2, %v4167_v49 }
 0x324   : > { %v3572_v25 = vpop.f32.mrf.mxu1 }
 0x325   : > { %v3595_v7 = vmax.f32 %v3571_v37, 0.0  ;;  %v4161_v25 = vpop.permute.xlu1 %4160 }
 0x326   : > { %v3575_v50 = vpop.f32.mrf.mxu1 }
 0x327   : > { %v3576_v41 = vadd.f32 %v3575_v50, %v3430_v62 }
 0x328   : > { %v3577_v63 = vpop.f32.mrf.mxu1 }
 0x329   : > { %v3596_v38 = vmax.f32 %v3576_v41, 0.0 }
 0x32a   : > { %v3580_v45 = vpop.f32.mrf.mxu1 }
 0x32b   : > { %v3581_v60 = vadd.f32 %v3580_v45, %v3435_v4  ;;  %v4157_v4 = vpop.permute.xlu1 %4156 }
 0x32c   : > { %v3582_v2 = vpop.f32.mrf.mxu1 }
 0x32d   : > { %v3597_v56 = vmax.f32 %v3581_v60, 0.0 }
 0x32e   : > { %v3585_v13 = vpop.f32.mrf.mxu1 }
 0x32f   : > { %v3586_v58 = vadd.f32 %v3585_v13, %v3440_v57  ;;  %v4165_v57 = vpop.permute.xlu0 %4164 }
 0x330   : > { %v3587_v55 = vpop.f32.mrf.mxu1  ;;  %5057 = vmatprep.subr.mxu1 %v4165_v57 }
 0x331   : > { %v3598_v61 = vmax.f32 %v3586_v58, 0.0  ;;  %5058 = vmatpush3.msra.mxu1 %v4165_v57 }
 0x333   : > { %5005 = vmatprep.subr.msk.mxu0 %vm3619_vm12, %v3598_v61  ;;  %v4163_v20 = vpop.permute.xlu0 %4162 }
 0x334   : > { %5006 = vmatpush3.xpose.msk.msra.mxu0 %vm3619_vm12, %v3598_v61  ;;  %5059 = vmatprep.subr.mxu1 %v4163_v20 }
 0x335   : > { %5007 = vmatprep.subr.msk.mxu0 %vm3619_vm12, %v3597_v56  ;;  %5060 = vmatpush3.msra.mxu1 %v4163_v20 }
 0x336   : > { %5061 = vmatprep.subr.mxu1 %v4161_v25 }
 0x337   : > { %5062 = vmatpush3.msra.mxu1 %v4161_v25  ;;  %v4159_v50 = vpop.permute.xlu0 %4158 }
 0x338   : > { %5008 = vmatpush3.xpose.msk.msra.mxu0 %vm3619_vm12, %v3597_v56  ;;  %5063 = vmatprep.subr.mxu1 %v4159_v50 }
 0x339   : > { %5009 = vmatprep.subr.msk.mxu0 %vm3619_vm12, %v3596_v38  ;;  %5064 = vmatpush3.msra.mxu1 %v4159_v50 }
 0x33a   : > { %5065 = vmatprep.subr.mxu1 %v4157_v4 }
 0x33b   : > { %5066 = vmatpush3.msra.mxu1 %v4157_v4 }
 0x33c   : > { %5010 = vmatpush3.xpose.msk.msra.mxu0 %vm3619_vm12, %v3596_v38 }
 0x33d   : > { %5011 = vmatprep.subr.msk.mxu0 %vm3619_vm12, %v3595_v7 }
 0x340   : > { %5012 = vmatpush3.xpose.msk.msra.mxu0 %vm3619_vm12, %v3595_v7 }
 0x341   : > { %5013 = vmatprep.subr.msk.mxu0 %vm3619_vm12, %v3594_v51 }
 0x344   : > { %5014 = vmatpush3.xpose.msk.msra.mxu0 %vm3619_vm12, %v3594_v51 }
 0x345   : > { %5015 = vmatprep.subr.msk.mxu0 %vm3619_vm12, %v3593_v9 }
 0x348   : > { %5016 = vmatpush3.xpose.msk.msra.mxu0 %vm3619_vm12, %v3593_v9 }
 0x349   : > { %5017 = vmatprep.subr.msk.mxu0 %vm3619_vm12, %v3592_v33 }
 0x34c   : > { %5018 = vmatpush3.xpose.msk.msra.mxu0 %vm3619_vm12, %v3592_v33 }
 0x34d   : > { %5019 = vmatprep.subr.msk.mxu0 %vm3619_vm12, %v3591_v16 }
 0x350   : > { %5020 = vmatpush3.xpose.msk.msra.mxu0 %vm3619_vm12, %v3591_v16 }
 0x351   : > { %5021 = vmatprep.subr.msk.mxu0 %vm3619_vm12, %v3590_v35 }
 0x354   : > { %5022 = vmatpush3.xpose.msk.msra.mxu0 %vm3619_vm12, %v3590_v35 }
 0x355   : > { %5023 = vmatprep.subr.msk.mxu0 %vm3619_vm12, %v3589_v43 }
 0x358   : > { %5024 = vmatpush3.xpose.msk.msra.mxu0 %vm3619_vm12, %v3589_v43 }
 0x35b   : > { %5026 = vmatmul.mubr.msk.f32.vlgmr.msra.gmra.mxu0 %vm3619_vm12, %v3600_v3 }
 0x35c   : > { %5028 = vmatprep.mubr.msk.f32.mxu0 %vm3619_vm12, %v3601_v5 }
 0x35f   : > { %5029 = vmatmul.mubr.msk.f32.gmra.mxu0 %vm3619_vm12, %v3602_v26 }
 0x360   : > { %5031 = vmatprep.mubr.msk.f32.mxu0 %vm3619_vm12, %v3603_v12 }
 0x363   : > { %5032 = vmatmul.mubr.msk.f32.gmra.mxu0 %vm3619_vm12, %v3604_v31 }
 0x364   : > { %5034 = vmatprep.mubr.msk.f32.mxu0 %vm3619_vm12, %v3605_v24 }
 0x367   : > { %5035 = vmatmul.mubr.msk.f32.gmra.mxu0 %vm3619_vm12, %v3606_v29 }
 0x368   : > { %5037 = vmatprep.mubr.msk.f32.mxu0 %vm3619_vm12, %v3607_v32  ;;  %v8687_v32 = vld [vmem:[%s9038_s12 + $0x18] sm:$0xff] }
 0x36b   : > { %5038 = vmatmul.mubr.msk.f32.gmra.mxu0 %vm3619_vm12, %v3608_v10  ;;  %v8694_v10 = vld [vmem:[%s9038_s12 + $0x10] sm:$0xff] }
 0x36c   : > { %5040 = vmatprep.mubr.msk.f32.mxu0 %vm3619_vm12, %v3609_v44 }
 0x36f   : > { %5041 = vmatmul.mubr.msk.f32.gmra.mxu0 %vm3619_vm12, %v3610_v18 }
 0x370   : > { %5043 = vmatprep.mubr.msk.f32.mxu0 %vm3619_vm12, %v3611_v46 }
 0x373   : > { %5044 = vmatmul.mubr.msk.f32.gmra.mxu0 %vm3619_vm12, %v3612_v39 }
 0x374   : > { %5046 = vmatprep.mubr.msk.f32.mxu0 %vm3619_vm12, %v3613_v23 }
 0x377   : > { %5047 = vmatmul.mubr.msk.f32.gmra.mxu0 %vm3619_vm12, %v3614_v15 }
 0x378   : > { %5049 = vmatprep.mubr.msk.f32.mxu0 %vm3619_vm12, %v3615_v52 }
 0x37b   : > { %5050 = vmatmul.mubr.msk.f32.gmra.mxu0 %vm3619_vm12, %v3616_v28 }
 0x37c   : > { %5052 = vmatprep.mubr.msk.f32.mxu0 %vm3619_vm12, %v3617_v22 }
 0x37f   : > { %5053 = vmatmul.mubr.msk.f32.gmra.mxu0 %vm3619_vm12, %v3618_v47 }
 0x41b   : > { %v8604_v63 = vpop.f32.mrf.mxu0 }
 0x41c   : > { %v3878_v45 = vsel %vm1401_vm6, %v8604_v63, -inf }
 0x41d   : > { %3879 = vmax.xlane.f32.xlu1 %v3878_v45  ;;  %v8608_v2 = vpop.f32.mrf.mxu0 }
 0x41e   : > { %v3875_v62 = vsel %vm1401_vm6, %v8608_v2, -inf }
 0x41f   : > { %3876 = vmax.xlane.f32.xlu0 %v3875_v62  ;;  %v8612_v13 = vpop.f32.mrf.mxu0 }
 0x420   : > { %v3884_v60 = vsel %vm1401_vm6, %v8612_v13, -inf }
 0x421   : > { %3885 = vmax.xlane.f32.xlu1 %v3884_v60  ;;  %v8616_v58 = vpop.f32.mrf.mxu0 }
 0x422   : > { %v3881_v55 = vsel %vm1401_vm6, %v8616_v58, -inf }
 0x423   : > { %3882 = vmax.xlane.f32.xlu0 %v3881_v55  ;;  %v8620_v61 = vpop.f32.mrf.mxu0 }
 0x424   : > { %v3890_v41 = vsel %vm1401_vm6, %v8620_v61, -inf }
 0x425   : > { %3891 = vmax.xlane.f32.xlu1 %v3890_v41  ;;  %v8624_v56 = vpop.f32.mrf.mxu0 }
 0x426   : > { %v3887_v14 = vsel %vm1401_vm6, %v8624_v56, -inf }
 0x427   : > { %3888 = vmax.xlane.f32.xlu0 %v3887_v14  ;;  %v8628_v37 = vpop.f32.mrf.mxu0 }
 0x428   : > { %v3896_v38 = vsel %vm1401_vm6, %v8628_v37, -inf }
 0x429   : > { %3897 = vmax.xlane.f32.xlu1 %v3896_v38  ;;  %v8632_v27 = vpop.f32.mrf.mxu0 }
 0x42a   : > { %v3893_v0 = vsel %vm1401_vm6, %v8632_v27, -inf }
 0x42b   : > { %3894 = vmax.xlane.f32.xlu0 %v3893_v0  ;;  %v8636_v7 = vpop.f32.mrf.mxu0 }
 0x42c   : > { %v3902_v30 = vsel %vm1401_vm6, %v8636_v7, -inf }
 0x42d   : > { %v8640_v42 = vpop.f32.mrf.mxu0 }
 0x42e   : > { %v3899_v21 = vsel %vm1401_vm6, %v8640_v42, -inf }
 0x42f   : > { %3903 = vmax.xlane.f32.xlu0 %v3902_v30  ;;  %v8642_v51 = vpop.f32.mrf.mxu0 }
 0x430   : > { %v3908_v1 = vsel %vm1401_vm6, %v8642_v51, -inf }
 0x431   : > { %v8644_v53 = vpop.f32.mrf.mxu0 }
 0x432   : > { %v3905_v9 = vsel %vm1401_vm6, %v8644_v53, -inf }
 0x433   : > { %3900 = vmax.xlane.f32.xlu0 %v3899_v21  ;;  %3906 = vmax.xlane.f32.xlu1 %v3905_v9  ;;  %v8650_v59 = vpop.f32.mrf.mxu0 }
 0x434   : > { %v3914_v6 = vsel %vm1401_vm6, %v8650_v59, -inf }
 0x435   : > { %v8654_v33 = vpop.f32.mrf.mxu0 }
 0x436   : > { %v3911_v8 = vsel %vm1401_vm6, %v8654_v33, -inf }
 0x437   : > { %3909 = vmax.xlane.f32.xlu0 %v3908_v1  ;;  %3915 = vmax.xlane.f32.xlu1 %v3914_v6  ;;  %v8658_v34 = vpop.f32.mrf.mxu0 }
 0x438   : > { %v3920_v16 = vsel %vm1401_vm6, %v8658_v34, -inf }
 0x439   : > { %v8662_v54 = vpop.f32.mrf.mxu0 }
 0x43a   : > { %v3917_v5 = vsel %vm1401_vm6, %v8662_v54, -inf }
 0x43b   : > { %3912 = vmax.xlane.f32.xlu0 %v3911_v8  ;;  %3921 = vmax.xlane.f32.xlu1 %v3920_v16  ;;  %v8666_v35 = vpop.f32.mrf.mxu0 }
 0x43c   : > { %v3926_v43 = vsel %vm1401_vm6, %v8666_v35, -inf }
 0x43d   : > { %v8670_v3 = vpop.f32.mrf.mxu0 }
 0x43e   : > { %v3923_v31 = vsel %vm1401_vm6, %v8670_v3, -inf }
 0x43f   : > { %3918 = vmax.xlane.f32.xlu0 %v3917_v5  ;;  %3927 = vmax.xlane.f32.xlu1 %v3926_v43  ;;  %v8674_v26 = vpop.f32.mrf.mxu0 }
 0x440   : > { %v3933_v12 = vsel %vm3932_vm13, %v8674_v26, -inf }
 0x441   : > { %v8680_v24 = vpop.f32.mrf.mxu0 }
 0x442   : > { %v3929_v29 = vsel %vm1401_vm6, %v8680_v24, -inf }
 0x443   : > { %3924 = vmax.xlane.f32.xlu0 %v3923_v31  ;;  %3934 = vmax.xlane.f32.xlu1 %v3933_v12 }
 0x447   : > { %3930 = vmax.xlane.f32.xlu0 %v3929_v29 }
 0x454   : > { %4154 = vrot.lane.b32.xlu1 %v8687_v32, %s5371_s29 }
 0x45d   : > { %4152 = vrot.lane.b32.xlu0 %v8694_v10, %s5371_s29 }
 0x4a6   : > { %v3880_v44 = vpop.xlane.xlu1 %3879 }
 0x4a7   : > { %v3937_v18 = vsub.f32 %v8604_v63, %v3880_v44 }
 0x4a8   : > { %v3877_v46 = vpop.xlane.xlu0 %3876 }
 0x4a9   : > { %v3958_v39 = vmul.f32 1.442695, %v3937_v18  ;;  %v3936_v23 = vsub.f32 %v8608_v2, %v3877_v46 }
 0x4aa   : > { %v3886_v15 = vpop.xlane.xlu1 %3885 }
 0x4ab   : > { %5196 = vpow2.f32 %v3958_v39  ;;  %v3956_v52 = vmul.f32 1.442695, %v3936_v23  ;;  %v3939_v28 = vsub.f32 %v8612_v13, %v3886_v15 }
 0x4ac   : > { %v3883_v22 = vpop.xlane.xlu0 %3882 }
 0x4ad   : > { %5198 = vpow2.f32 %v3956_v52  ;;  %v3962_v47 = vmul.f32 1.442695, %v3939_v28  ;;  %v3938_v49 = vsub.f32 %v8616_v58, %v3883_v22 }
 0x4ae   : > { %v8704_v25 = vpop.xlane.xlu1 %3891 }
 0x4af   : > { %5200 = vpow2.f32 %v3962_v47  ;;  %v3960_v57 = vmul.f32 1.442695, %v3938_v49 }
 0x4b0   : > { %v8702_v20 = vpop.xlane.xlu0 %3888 }
 0x4b1   : > { %5202 = vpow2.f32 %v3960_v57 }
 0x4b2   : > { %v8710_v63 = vpop.xlane.xlu1 %3897 }
 0x4b4   : > { %v8706_v50 = vpop.xlane.xlu0 %3894 }
 0x4b8   : > { %v8708_v4 = vpop.eup %5196  ;;  %v3904_v45 = vpop.xlane.xlu0 %3903 }
 0x4b9   : > { %v3945_v2 = vsub.f32 %v8636_v7, %v3904_v45  ;;  %v3999_v62 = vsel %vm1401_vm6, %v8708_v4, 0.0 }
 0x4ba   : > { %v8715_v13 = vpop.eup %5198  ;;  %4000 = vadd.xlane.f32.xlu0 %v3999_v62 }
 0x4bb   : > { %v3974_v60 = vmul.f32 1.442695, %v3945_v2  ;;  %v3996_v58 = vsel %vm1401_vm6, %v8715_v13, 0.0 }
 0x4bc   : > { %v8719_v55 = vpop.eup %5200  ;;  %v3907_v41 = vpop.xlane.xlu1 %3906  ;;  %3997 = vadd.xlane.f32.xlu1 %v3996_v58 }
 0x4bd   : > { %v8721_v14 = vpop.xlane.xlu0 %3900  ;;  %5204 = vpow2.f32 %v3974_v60  ;;  %v3946_v38 = vsub.f32 %v8644_v53, %v3907_v41  ;;  %v4005_v0 = vsel %vm1401_vm6, %v8719_v55, 0.0 }
 0x4be   : > { %v8726_v7 = vpop.eup %5202  ;;  %4006 = vadd.xlane.f32.xlu0 %v4005_v0 }
 0x4bf   : > { %v3976_v30 = vmul.f32 1.442695, %v3946_v38  ;;  %v4002_v21 = vsel %vm1401_vm6, %v8726_v7, 0.0 }
 0x4c0   : > { %v3916_v9 = vpop.xlane.xlu1 %3915  ;;  %4003 = vadd.xlane.f32.xlu1 %v4002_v21 }
 0x4c1   : > { %v3910_v6 = vpop.xlane.xlu0 %3909  ;;  %5206 = vpow2.f32 %v3976_v30  ;;  %v3949_v1 = vsub.f32 %v8650_v59, %v3916_v9 }
 0x4c2   : > { %v3947_v16 = vsub.f32 %v8642_v51, %v3910_v6 }
 0x4c3   : > { %v3982_v53 = vmul.f32 1.442695, %v3949_v1 }
 0x4c4   : > { %v3978_v8 = vmul.f32 1.442695, %v3947_v16  ;;  %v3922_v43 = vpop.xlane.xlu1 %3921 }
 0x4c5   : > { %v3913_v5 = vpop.xlane.xlu0 %3912  ;;  %v3951_v12 = vsub.f32 %v8658_v34, %v3922_v43 }
 0x4c6   : > { %v3948_v31 = vsub.f32 %v8654_v33, %v3913_v5  ;;  %5208 = vpow2.f32 %v3978_v8 }
 0x4c7   : > { %5210 = vpow2.f32 %v3982_v53  ;;  %v3986_v44 = vmul.f32 1.442695, %v3951_v12 }
 0x4c8   : > { %v3980_v29 = vmul.f32 1.442695, %v3948_v31  ;;  %v3928_v18 = vpop.xlane.xlu1 %3927  ;;  %v8786_v31 = vld [vmem:[%s9038_s12 + $0x8] sm:$0xff] }
 0x4c9   : > { %v3919_v46 = vpop.xlane.xlu0 %3918  ;;  %v3953_v39 = vsub.f32 %v8666_v35, %v3928_v18 }
 0x4ca   : > { %v3950_v59 = vsub.f32 %v8662_v54, %v3919_v46  ;;  %v8736_v23 = vpop.eup %5204  ;;  %5212 = vpow2.f32 %v3980_v29  ;;  %v8793_v29 = vld [vmem:[%s9038_s12] sm:$0xff]  ;;  %v3942_v46 = vsub.f32 %v8632_v27, %v8706_v50 }
 0x4cb   : > { %v4023_v15 = vsel %vm1401_vm6, %v8736_v23, 0.0  ;;  %5214 = vpow2.f32 %v3986_v44  ;;  %v3990_v34 = vmul.f32 1.442695, %v3953_v39  ;;  %v3940_v44 = vsub.f32 %v8624_v56, %v8702_v20 }
 0x4cc   : > { %v3984_v51 = vmul.f32 1.442695, %v3950_v59  ;;  %v3935_v33 = vpop.xlane.xlu1 %3934  ;;  %4024 = vadd.xlane.f32.xlu1 %v4023_v15  ;;  %v3941_v39 = vsub.f32 %v8620_v61, %v8704_v25  ;;  %v3943_v59 = vsub.f32 %v8628_v37, %v8710_v63 }
 0x4cd   : > { %v3925_v52 = vpop.xlane.xlu0 %3924  ;;  %v3955_v35 = vsub.f32 %v8674_v26, %v3935_v33  ;;  %v3964_v18 = vmul.f32 1.442695, %v3940_v44 }
 0x4ce   : > { %v3952_v28 = vsub.f32 %v8670_v3, %v3925_v52  ;;  %v8741_v22 = vpop.eup %5206  ;;  %5216 = vpow2.f32 %v3984_v51  ;;  %v3968_v51 = vmul.f32 1.442695, %v3942_v46  ;;  %v3966_v15 = vmul.f32 1.442695, %v3941_v39 }
 0x4cf   : > { %v4026_v54 = vsel %vm1401_vm6, %v8741_v22, 0.0  ;;  %5218 = vpow2.f32 %v3990_v34  ;;  %v3994_v62 = vmul.f32 1.442695, %v3955_v35  ;;  %v3944_v34 = vsub.f32 %v8640_v42, %v8721_v14 }
 0x4d0   : > { %v3988_v47 = vmul.f32 1.442695, %v3952_v28  ;;  %4027 = vadd.xlane.f32.xlu0 %v4026_v54  ;;  %v4155_v57 = vpop.permute.xlu1 %4154  ;;  %v3970_v33 = vmul.f32 1.442695, %v3943_v59  ;;  %v4673_v28 = vld [vmem:[%s638_s24] sm:$0x1] }
 0x4d1   : > { %v3931_v49 = vpop.xlane.xlu0 %3930  ;;  %5067 = vmatprep.subr.mxu1 %v4155_v57  ;;  %v3972_v56 = vmul.f32 1.442695, %v3944_v34  ;;  %v5372_v54 = vmov 1  }
 0x4d2   : > { %v3954_v45 = vsub.f32 %v8680_v24, %v3931_v49  ;;  %5068 = vmatpush3.msra.mxu1 %v4155_v57  ;;  %5220 = vpow2.f32 %v3988_v47 }
 0x4d3   : > { %v8747_v2 = vpop.eup %5208 }
 0x4d4   : > { %v3992_v3 = vmul.f32 1.442695, %v3954_v45  ;;  %v4029_v60 = vsel %vm1401_vm6, %v8747_v2, 0.0  ;;  %v8751_v41 = vpop.eup %5210 }
 0x4d5   : > { %v4153_v58 = vpop.permute.xlu0 %4152  ;;  %4030 = vadd.xlane.f32.xlu1 %v4029_v60  ;;  %v4035_v24 = vsel %vm1401_vm6, %v8751_v41, 0.0 }
 0x4d6   : > { %5222 = vpow2.f32 %v3992_v3  ;;  %5069 = vmatprep.subr.mxu1 %v4153_v58 }
 0x4d7   : > { %5070 = vmatpush3.msra.mxu1 %v4153_v58  ;;  %v8753_v26 = vpop.eup %5212  ;;  %5224 = vpow2.f32 %v3994_v62 }
 0x4d8   : > { %v4032_v38 = vsel %vm1401_vm6, %v8753_v26, 0.0  ;;  %v8759_v0 = vpop.eup %5214  ;;  %5226 = vpow2.f32 %v3964_v18 }
 0x4d9   : > { %4036 = vadd.xlane.f32.xlu1 %v4035_v24  ;;  %4033 = vadd.xlane.f32.xlu0 %v4032_v38  ;;  %v4041_v21 = vsel %vm1401_vm6, %v8759_v0, 0.0  ;;  %5228 = vpow2.f32 %v3968_v51 }
 0x4da   : > { %5230 = vpow2.f32 %v3966_v15 }
 0x4db   : > { %v8761_v30 = vpop.eup %5216  ;;  %5232 = vpow2.f32 %v3970_v33 }
 0x4dc   : > { %v4038_v9 = vsel %vm1401_vm6, %v8761_v30, 0.0  ;;  %v8767_v6 = vpop.eup %5218  ;;  %5234 = vpow2.f32 %v3972_v56 }
 0x4dd   : > { %4042 = vadd.xlane.f32.xlu1 %v4041_v21  ;;  %4039 = vadd.xlane.f32.xlu0 %v4038_v9  ;;  %v4047_v1 = vsel %vm1401_vm6, %v8767_v6, 0.0 }
 0x4df   : > { %v8771_v16 = vpop.eup %5220 }
 0x4e0   : > { %v4044_v43 = vsel %vm1401_vm6, %v8771_v16, 0.0 }
 0x4e1   : > { %4048 = vadd.xlane.f32.xlu0 %v4047_v1 }
 0x4e3   : > { %v8773_v8 = vpop.eup %5222 }
 0x4e4   : > { %v4050_v53 = vsel %vm1401_vm6, %v8773_v8, 0.0  ;;  %v8779_v5 = vpop.eup %5224 }
 0x4e5   : > { %4051 = vadd.xlane.f32.xlu1 %v4050_v53  ;;  %4045 = vadd.xlane.f32.xlu0 %v4044_v43  ;;  %v4053_v12 = vsel %vm3932_vm13, %v8779_v5, 0.0  ;;  %v8807_v27 = vpop.eup %5226 }
 0x4e6   : > { %v4008_v61 = vsel %vm1401_vm6, %v8807_v27, 0.0  ;;  %v8811_v20 = vpop.eup %5228 }
 0x4e7   : > { %v8813_v37 = vpop.eup %5230  ;;  %v4014_v42 = vsel %vm1401_vm6, %v8811_v20, 0.0 }
 0x4e8   : > { %v8817_v25 = vpop.eup %5232  ;;  %v4011_v50 = vsel %vm1401_vm6, %v8813_v37, 0.0 }
 0x4e9   : > { %4054 = vadd.xlane.f32.xlu0 %v4053_v12  ;;  %v8821_v63 = vpop.eup %5234  ;;  %v4017_v14 = vsel %vm1401_vm6, %v8817_v25, 0.0 }
 0x4ea   : > { %v4020_v52 = vsel %vm1401_vm6, %v8821_v63, 0.0 }
 0x4f6   : > { %4150 = vrot.lane.b32.xlu1 %v8786_v31, %s5371_s29 }
 0x4ff   : > { %4148 = vrot.lane.b32.xlu0 %v8793_v29, %s5371_s29 }
 0x51a   : > { %4009 = vadd.xlane.f32.xlu1 %v4008_v61 }
 0x51e   : > { %4015 = vadd.xlane.f32.xlu1 %v4014_v42  ;;  %4012 = vadd.xlane.f32.xlu0 %v4011_v50 }
 0x522   : > { %4018 = vadd.xlane.f32.xlu1 %v4017_v14  ;;  %4021 = vadd.xlane.f32.xlu0 %v4020_v52 }
 0x533   : > { %4677 = vperm.xlu1 %5192, %v4673_v28  }
 0x537   : > { %5193 = vset.pattern.permute.xlu1 %v5372_v54 }
 0x543   : > { %v4001_v47 = vpop.xlane.xlu0 %4000 }
 0x545   : > { %v3998_v35 = vpop.xlane.xlu1 %3997 }
 0x547   : > { %v8834_v57 = vpop.xlane.xlu0 %4006 }
 0x549   : > { %v8832_v49 = vpop.xlane.xlu1 %4003 }
 0x555   : > { %v4025_v45 = vpop.xlane.xlu1 %4024 }
 0x556   : > { %5236 = vrcp.f32 %v4025_v45 }
 0x559   : > { %v4028_v3 = vpop.xlane.xlu0 %4027 }
 0x55a   : > { %5238 = vrcp.f32 %v4028_v3 }
 0x55e   : > { %v4031_v62 = vpop.xlane.xlu1 %4030 }
 0x55f   : > { %5240 = vrcp.f32 %v4031_v62 }
 0x562   : > { %v4037_v60 = vpop.xlane.xlu1 %4036  ;;  %v4034_v58 = vpop.xlane.xlu0 %4033 }
 0x563   : > { %v5237_v24 = vpop.eup %5236  ;;  %5242 = vrcp.f32 %v4037_v60 }
 0x564   : > { %5244 = vrcp.f32 %v4034_v58  ;;  %v8837_v9 = vmul.f32 %v5237_v24, %v8736_v23 }
 0x566   : > { %v4043_v38 = vpop.xlane.xlu1 %4042  ;;  %v4040_v21 = vpop.xlane.xlu0 %4039  ;;  %v4117_v12 = vrot.slane %v8837_v9, 6 }
 0x567   : > { %v5239_v1 = vpop.eup %5238  ;;  %5246 = vrcp.f32 %v4043_v38 }
 0x568   : > { %5248 = vrcp.f32 %v4040_v21  ;;  %v4086_v53 = vmul.f32 %v5239_v1, %v8741_v22 }
 0x56a   : > { %v4049_v43 = vpop.xlane.xlu0 %4048  ;;  %v4118_v44 = vrot.slane %v4086_v53, 6 }
 0x56b   : > { %5250 = vrcp.f32 %v4049_v43 }
 0x56c   : > { %v4119_v18 = vsel %vm1684_vm5, %v4117_v12, %v4118_v44  ;;  %v5241_v46 = vpop.eup %5240 }
 0x56d   : > { %5075 = vmatprep.mubr.msk.f32.mxu1 %vm1401_vm6, %v4119_v18  ;;  %v4087_v51 = vmul.f32 %v5241_v46, %v8747_v2 }
 0x56e   : > { %v4052_v39 = vpop.xlane.xlu1 %4051  ;;  %v4046_v59 = vpop.xlane.xlu0 %4045 }
 0x56f   : > { %5252 = vrcp.f32 %v4052_v39  ;;  %v4120_v61 = vrot.slane %v4087_v51, 6 }
 0x570   : > { %5254 = vrcp.f32 %v4046_v59  ;;  %v5243_v23 = vpop.eup %5242 }
 0x571   : > { %v5245_v15 = vpop.eup %5244  ;;  %v4089_v42 = vmul.f32 %v5243_v23, %v8751_v41  ;;  %v4121_v2 = vsel %vm1684_vm5, %v4118_v44, %v4120_v61  ;;  %v4685_v23 = vld [vmem:[%s9043_s17] sm:$0x1] }
 0x572   : > { %v4151_v34 = vpop.permute.xlu1 %4150  ;;  %v4055_v22 = vpop.xlane.xlu0 %4054  ;;  %v4088_v33 = vmul.f32 %v5245_v15, %v8753_v26 }
 0x573   : > { %5071 = vmatprep.subr.mxu1 %v4151_v34  ;;  %5256 = vrcp.f32 %v4055_v22  ;;  %v4124_v45 = vrot.slane %v4089_v42, 6 }
 0x574   : > { %5072 = vmatpush3.msra.mxu1 %v4151_v34  ;;  %v5247_v56 = vpop.eup %5246  ;;  %v4122_v14 = vrot.slane %v4088_v33, 6  ;;  %5258 = vrcp.f32 %v3998_v35 }
 0x575   : > { %v5249_v50 = vpop.eup %5248  ;;  %v4091_v3 = vmul.f32 %v5247_v56, %v8759_v0  ;;  %5260 = vrcp.f32 %v4001_v47 }
 0x576   : > { %v4149_v52 = vpop.permute.xlu0 %4148  ;;  %v4090_v28 = vmul.f32 %v5249_v50, %v8761_v30  ;;  %v4123_v41 = vsel %vm1684_vm5, %v4120_v61, %v4122_v14  ;;  %5262 = vrcp.f32 %v8832_v49  ;;  %v4125_v0 = vsel %vm1684_vm5, %v4122_v14, %v4124_v45 }
 0x577   : > { %5073 = vmatprep.subr.mxu1 %v4149_v52  ;;  %v4128_v60 = vrot.slane %v4091_v3, 6  ;;  %5264 = vrcp.f32 %v8834_v57  ;;  %v4489_v3 = vld [vmem:[%s9041_s15 + $0x20] sm:$0xff] }
 0x578   : > { %5074 = vmatpush3.msra.mxu1 %v4149_v52  ;;  %v4126_v26 = vrot.slane %v4090_v28, 6  ;;  %v5251_v62 = vpop.eup %5250  ;;  %v9399_v52 = vmov 0   ;;  %v4477_v28 = vld [vmem:[%s9040_s14] sm:$0xff] }
 0x579   : > { %5076 = vmatmul.mubr.msk.f32.vlgmr.msra.gmra.mxu1 %vm1401_vm6, %v4121_v2  ;;  %5090 = vmatprep.subr.msk.mxu1 %vm1098_vm2, %v8467_v17  ;;  %v4093_v49 = vmul.f32 %v5251_v62, %v8767_v6  ;;  %v4481_v2 = vld [vmem:[%s9040_s14 + $0x20] sm:$0xff] }
 0x57a   : > { %5078 = vmatprep.mubr.msk.f32.mxu1 %vm1401_vm6, %v4123_v41  ;;  %5091 = vmatpush3.msk.msra.mxu1 %vm1098_vm2, %v8467_v17  ;;  %v4127_v58 = vsel %vm1684_vm5, %v4124_v45, %v4126_v26  ;;  %v4129_v38 = vsel %vm1684_vm5, %v4126_v26, %v4128_v60  ;;  %v4485_v45 = vld [vmem:[%s9041_s15] sm:$0xff]  ;;  %v4491_v41 = vld [vmem:[%s9041_s15 + $0x30] sm:$0xff] }
 0x57b   : > { %5092 = vmatprep.subr.mxu1 %v8472_v48  ;;  %v4132_v6 = vrot.slane %v4093_v49, 6  ;;  %5145 = vmatprep.mubr.msk.f32.mxu0 %vm1401_vm6, %v4477_v28 }
 0x57c   : > { %v5253_v30 = vpop.eup %5252  ;;  %5093 = vmatpush3.msra.mxu1 %v8472_v48 }
 0x57d   : > { %v5255_v35 = vpop.eup %5254  ;;  %5079 = vmatmul.mubr.msk.f32.gmra.mxu1 %vm1401_vm6, %v4125_v0  ;;  %5094 = vmatprep.subr.mxu1 %v8486_v11  ;;  %v4094_v47 = vmul.f32 %v5253_v30, %v8773_v8 }
 0x57e   : > { %v4092_v17 = vmul.f32 %v5255_v35, %v8771_v16  ;;  %5081 = vmatprep.mubr.msk.f32.mxu1 %vm1401_vm6, %v4127_v58  ;;  %5095 = vmatpush3.msra.mxu1 %v8486_v11 }
 0x57f   : > { %5096 = vmatprep.subr.mxu1 %v8481_v40  ;;  %v4134_v8 = vrot.slane %v4094_v47, 6 }
 0x580   : > { %v4130_v48 = vrot.slane %v4092_v17, 6  ;;  %v5257_v24 = vpop.eup %5256  ;;  %5097 = vmatpush3.msra.mxu1 %v8481_v40 }
 0x581   : > { %5082 = vmatmul.mubr.msk.f32.gmra.mxu1 %vm1401_vm6, %v4129_v38  ;;  %5098 = vmatprep.subr.mxu1 %v8500_v19  ;;  %v4095_v11 = vmul.f32 %v5257_v24, %v8779_v5  ;;  %v5259_v21 = vpop.eup %5258  ;;  %v4135_v1 = vsel %vm1684_vm5, %v4132_v6, %v4134_v8 }
 0x582   : > { %v4131_v16 = vsel %vm1684_vm5, %v4128_v60, %v4130_v48  ;;  %5099 = vmatpush3.msra.mxu1 %v8500_v19  ;;  %v4133_v40 = vsel %vm1684_vm5, %v4130_v48, %v4132_v6  ;;  %v5261_v19 = vpop.eup %5260  ;;  %v4076_v5 = vmul.f32 %v5259_v21, %v8715_v13 }
 0x583   : > { %5084 = vmatprep.mubr.msk.f32.mxu1 %vm1401_vm6, %v4131_v16  ;;  %5100 = vmatprep.subr.mxu1 %v8495_v36  ;;  %v4136_v57 = vrot.slane %v4095_v11, 6  ;;  %v5263_v53 = vpop.eup %5262 }
 0x584   : > { %5101 = vmatpush3.msra.mxu1 %v8495_v36  ;;  %v5265_v43 = vpop.eup %5264 }
 0x585   : > { %5085 = vmatmul.mubr.msk.f32.gmra.mxu1 %vm1401_vm6, %v4133_v40  ;;  %5102 = vmatprep.subr.mxu1 %v8687_v32  ;;  %v4137_v36 = vsel %vm1684_vm5, %v4134_v8, %v4136_v57  ;;  %v4079_v13 = vmul.f32 %v5265_v43, %v8719_v55 }
 0x586   : > { %5087 = vmatprep.mubr.msk.f32.mxu1 %vm1401_vm6, %v4135_v1  ;;  %5103 = vmatpush3.msra.mxu1 %v8687_v32  ;;  %v4077_v32 = vmul.f32 %v5261_v19, %v8708_v4  ;;  %v4904_v1 = vld [vmem:[%s9039_s13] ss:$0 sm:$0xff] }
 0x587   : > { %5104 = vmatprep.subr.mxu1 %v8694_v10 }
 0x588   : > { %5105 = vmatpush3.msra.mxu1 %v8694_v10  ;;  %v4078_v10 = vmul.f32 %v5263_v53, %v8726_v7  ;;  %v4674_v7 = vld [vmem:[%s9042_s16] sm:$0x1] }
 0x589   : > { %5088 = vmatmul.mubr.msk.f32.gmra.mxu1 %vm1401_vm6, %v4137_v36  ;;  %5106 = vmatprep.subr.mxu1 %v8786_v31 }
 0x58a   : > { %5107 = vmatpush3.msra.mxu1 %v8786_v31  ;;  %5110 = vmatprep.mubr.msk.f32.mxu1 %vm1401_vm6, %v4076_v5 }
 0x58b   : > { %5108 = vmatprep.subr.mxu1 %v8793_v29 }
 0x58c   : > { %5109 = vmatpush3.msra.mxu1 %v8793_v29  ;;  %v9398_v29 = vld [vmem:[#allocation2_spill] sm:$0xff] }
 0x58d   : > { %5111 = vmatmul.mubr.msk.f32.vlgmr.msra.gmra.mxu1 %vm1401_vm6, %v4077_v32  ;;  %v8903_v46 = vsub.s32 0, %v9398_v29 }
 0x58e   : > { %5113 = vmatprep.mubr.msk.f32.mxu1 %vm1401_vm6, %v4078_v10 }
 0x591   : > { %5114 = vmatmul.mubr.msk.f32.gmra.mxu1 %vm1401_vm6, %v4079_v13 }
 0x5a3   : > { %v4010_v31 = vpop.xlane.xlu1 %4009 }
 0x5a4   : > { %5266 = vrcp.f32 %v4010_v31 }
 0x5a7   : > { %v4016_v12 = vpop.xlane.xlu1 %4015  ;;  %v4013_v4 = vpop.xlane.xlu0 %4012 }
 0x5a8   : > { %5268 = vrcp.f32 %v4016_v12 }
 0x5a9   : > { %5270 = vrcp.f32 %v4013_v4 }
 0x5ab   : > { %v4019_v44 = vpop.xlane.xlu1 %4018  ;;  %v4022_v18 = vpop.xlane.xlu0 %4021 }
 0x5ac   : > { %5272 = vrcp.f32 %v4019_v44 }
 0x5ad   : > { %5274 = vrcp.f32 %v4022_v18 }
 0x5af   : > { %v4678_v55 = vpop.permute.xlu1 %4677 }
 0x5b0   : > { %v4683_v39 = vrot.slane %v4678_v55, %v8903_v46 }
 0x5b1   : > { %v5267_v59 = vpop.eup %5266 }
 0x5b2   : > { %v4684_v51 = vmul.f32 %v4683_v39, %v4674_v7  ;;  %v4080_v15 = vmul.f32 %v5267_v59, %v8807_v27 }
 0x5b4   : > { %v4686_v34 = vadd.f32 %v4685_v23, %v4684_v51  ;;  %5116 = vmatprep.mubr.msk.f32.mxu1 %vm1401_vm6, %v4080_v15  ;;  %v4478_v15 = vld [vmem:[%s9040_s14 + $0x8] sm:$0xff] }
 0x5b5   : > { %v5269_v22 = vpop.eup %5268 }
 0x5b6   : > { %v5271_v33 = vpop.eup %5270  ;;  %5276 = vtanh.f32 %v4686_v34  ;;  %v4082_v56 = vmul.f32 %v5269_v22, %v8811_v20  ;;  %v4482_v34 = vld [vmem:[%s9040_s14 + $0x28] sm:$0xff]  ;;  %v4479_v22 = vld [vmem:[%s9040_s14 + $0x10] sm:$0xff] }
 0x5b7   : > { %v4081_v61 = vmul.f32 %v5271_v33, %v8813_v37  ;;  %v4486_v37 = vld [vmem:[%s9041_s15 + $0x8] sm:$0xff]  ;;  %v4483_v33 = vld [vmem:[%s9040_s14 + $0x30] sm:$0xff] }
 0x5b9   : > { %v5273_v42 = vpop.eup %5272  ;;  %5117 = vmatmul.mubr.msk.f32.gmra.mxu1 %vm1401_vm6, %v4081_v61  ;;  %v4484_v61 = vld [vmem:[%s9040_s14 + $0x38] sm:$0xff] }
 0x5ba   : > { %v5275_v50 = vpop.eup %5274  ;;  %5119 = vmatprep.mubr.msk.f32.mxu1 %vm1401_vm6, %v4082_v56  ;;  %v4083_v14 = vmul.f32 %v5273_v42, %v8817_v25  ;;  %v4488_v25 = vld [vmem:[%s9041_s15 + $0x18] sm:$0xff] }
 0x5bb   : > { %v4084_v27 = vmul.f32 %v5275_v50, %v8821_v63  ;;  %v4490_v63 = vld [vmem:[%s9041_s15 + $0x28] sm:$0xff]  ;;  %v4480_v56 = vld [vmem:[%s9040_s14 + $0x18] sm:$0xff] }
 0x5bd   : > { %5120 = vmatmul.mubr.msk.f32.gmra.mxu1 %vm1401_vm6, %v4083_v14 }
 0x5be   : > { %5122 = vmatprep.mubr.msk.f32.mxu1 %vm1401_vm6, %v4084_v27 }
 0x5c1   : > { %5123 = vmatmul.mubr.msk.f32.gmra.mxu1 %vm1401_vm6, %v8837_v9  ;;  %v4492_v9 = vld [vmem:[%s9041_s15 + $0x38] sm:$0xff] }
 0x5c2   : > { %5151 = vmatprep.mubr.msk.f32.mxu1 %vm1401_vm6, %v4481_v2 }
 0x5c3   : > { %v5277_v20 = vpop.eup %5276 }
 0x5c4   : > { %4701 = vperm.xlu1 %5193, %v5277_v20   ;;  %4691 = vperm.xlu0 %5191, %v5277_v20   ;;  %v4699_v20 = vld [vmem:[%s9044_s18 + $0x1] sm:$0x1] }
 0x5c8   : > { %4500 = vperm.xlu0 %5191, %v4486_v37   ;;  %5194 = vset.pattern.permute.xlu1 %v9399_v52  ;;  %v4688_v37 = vld [vmem:[%s9044_s18] sm:$0x1] }
 0x5c9   : > { %4495 = vperm.xlu1 %5194, %v4485_v45  }
 0x5cc   : > { %4510 = vperm.xlu0 %5191, %v4488_v25  }
 0x5d0   : > { %4520 = vperm.xlu0 %5191, %v4490_v63  }
 0x5d4   : > { %4530 = vperm.xlu0 %5191, %v4492_v9   ;;  %v4710_v9 = vld [vmem:[%s9045_s19] sm:$0x1] }
 0x5d8   : > { %5195 = vset.pattern.permute.xlu0 %v5372_v54  ;;  %v4487_v54 = vld [vmem:[%s9041_s15 + $0x10] sm:$0xff] }
 0x5d9   : > { %4505 = vperm.xlu1 %5194, %v4487_v54  }
 0x5dd   : > { %4515 = vperm.xlu1 %5194, %v4489_v3  }
 0x5e1   : > { %4525 = vperm.xlu1 %5194, %v4491_v41  }
 0x639   : > { %v5077_v26 = vpop.f32.mrf.mxu1 }
 0x63b   : > { %v4265_v62 = vpop.f32.mrf.mxu1 }
 0x63d   : > { %v5080_v30 = vpop.f32.mrf.mxu1 }
 0x63f   : > { %v4275_v35 = vpop.f32.mrf.mxu1  ;;  %v4702_v42 = vpop.permute.xlu1 %4701 }
 0x640   : > { %v4692_v50 = vpop.permute.xlu0 %4691  ;;  %v4707_v14 = vrot.slane %v4702_v42, %v8903_v46 }
 0x641   : > { %v5083_v0 = vpop.f32.mrf.mxu1  ;;  %v4697_v27 = vrot.slane %v4692_v50, %v8903_v46 }
 0x642   : > { %v4708_v52 = vmul.f32 %v4707_v14, %v4699_v20 }
 0x643   : > { %v4285_v60 = vpop.f32.mrf.mxu1  ;;  %v4698_v25 = vmul.f32 %v4697_v27, %v4688_v37 }
 0x644   : > { %v4501_v2 = vpop.permute.xlu0 %4500  ;;  %v4496_v45 = vpop.permute.xlu1 %4495 }
 0x645   : > { %v5086_v58 = vpop.f32.mrf.mxu1  ;;  %v4709_v63 = vadd.f32 %v4708_v52, %v4698_v25 }
 0x647   : > { %v4295_v17 = vpop.f32.mrf.mxu1  ;;  %v4711_v28 = vadd.f32 %v4710_v9, %v4709_v63 }
 0x648   : > { %v4511_v54 = vpop.permute.xlu0 %4510 }
 0x649   : > { %v5089_v47 = vpop.f32.mrf.mxu1  ;;  %5278 = vtanh.f32 %v4711_v28 }
 0x64b   : > { %v4305_v49 = vpop.f32.mrf.mxu1 }
 0x64d   : > { %v5112_v48 = vpop.f32.mrf.mxu1 }
 0x64e   : > { %v4417_v7 = vadd.f32 %v5112_v48, %v5077_v26  ;;  %v4521_v26 = vpop.permute.xlu0 %4520 }
 0x64f   : > { %v4411_v24 = vpop.f32.mrf.mxu1 }
 0x650   : > { %v4412_v39 = vadd.f32 %v4411_v24, %v4265_v62  ;;  %v4468_v23 = vadd.f32 %v4904_v1, %v4417_v7 }
 0x651   : > { %v5115_v38 = vpop.f32.mrf.mxu1 }
 0x652   : > { %v4427_v4 = vadd.f32 %v5115_v38, %v5080_v30  ;;  %v4467_v51 = vadd.f32 %v4904_v1, %v4412_v39 }
 0x653   : > { %v4421_v16 = vpop.f32.mrf.mxu1 }
 0x654   : > { %v4422_v18 = vadd.f32 %v4421_v16, %v4275_v35  ;;  %v4470_v55 = vadd.f32 %v4904_v1, %v4427_v4  ;;  %v4506_v3 = vpop.permute.xlu1 %4505 }
 0x656   : > { %v4469_v59 = vadd.f32 %v4904_v1, %v4422_v18  ;;  %v5279_v41 = vpop.eup %5278 }
 0x658   : > { %v4516_v62 = vpop.permute.xlu1 %4515 }
 0x679   : > { %v5118_v8 = vpop.f32.mrf.mxu1 }
 0x67a   : > { %v4437_v10 = vadd.f32 %v5118_v8, %v5083_v0 }
 0x67b   : > { %v4431_v11 = vpop.f32.mrf.mxu1 }
 0x67c   : > { %v4432_v31 = vadd.f32 %v4431_v11, %v4285_v60  ;;  %v4472_v44 = vadd.f32 %v4904_v1, %v4437_v10  ;;  %v4531_v11 = vpop.permute.xlu0 %4530 }
 0x67d   : > { %v5121_v6 = vpop.f32.mrf.mxu1 }
 0x67e   : > { %v4447_v36 = vadd.f32 %v5121_v6, %v5086_v58  ;;  %v4471_v29 = vadd.f32 %v4904_v1, %v4432_v31  ;;  %v4716_v58 = vrot.slane %v5279_v41, %v8903_v46 }
 0x67f   : > { %v4441_v40 = vpop.f32.mrf.mxu1 }
 0x680   : > { %v4442_v32 = vadd.f32 %v4441_v40, %v4295_v17  ;;  %v4474_v13 = vadd.f32 %v4904_v1, %v4447_v36 }
 0x681   : > { %v5124_v57 = vpop.f32.mrf.mxu1 }
 0x682   : > { %v4457_v21 = vadd.f32 %v5124_v57, %v5089_v47  ;;  %v4473_v12 = vadd.f32 %v4904_v1, %v4442_v32 }
 0x683   : > { %v4451_v19 = vpop.f32.mrf.mxu1 }
 0x684   : > { %v4476_v5 = vadd.f32 %v4904_v1, %v4457_v21  ;;  %v4452_v53 = vadd.f32 %v4451_v19, %v4305_v49  ;;  %v4526_v21 = vpop.permute.xlu1 %4525 }
 0x686   : > { %v4475_v43 = vadd.f32 %v4904_v1, %v4452_v53  ;;  %5125 = vmatprep.subr.msk.mxu0 %vm1098_vm2, %v4476_v5  ;;  %5157 = vmatprep.subr.msk.mxu1 %vm1098_vm2, %v4476_v5 }
 0x687   : > { %5126 = vmatpush3.msk.msra.mxu0 %vm1098_vm2, %v4476_v5  ;;  %5167 = vmatpush3.msk.msra.mxu1 %vm1098_vm2, %v4476_v5 }
 0x688   : > { %5127 = vmatprep.subr.mxu0 %v4475_v43  ;;  %5158 = vmatprep.subr.mxu1 %v4475_v43 }
 0x689   : > { %5128 = vmatpush3.msra.mxu0 %v4475_v43  ;;  %5168 = vmatpush3.msra.mxu1 %v4475_v43 }
 0x68a   : > { %5129 = vmatprep.subr.mxu0 %v4474_v13  ;;  %5159 = vmatprep.subr.mxu1 %v4474_v13 }
 0x68b   : > { %5130 = vmatpush3.msra.mxu0 %v4474_v13  ;;  %5169 = vmatpush3.msra.mxu1 %v4474_v13 }
 0x68c   : > { %5131 = vmatprep.subr.mxu0 %v4473_v12  ;;  %5160 = vmatprep.subr.mxu1 %v4473_v12 }
 0x68d   : > { %5132 = vmatpush3.msra.mxu0 %v4473_v12  ;;  %5170 = vmatpush3.msra.mxu1 %v4473_v12 }
 0x68e   : > { %5133 = vmatprep.subr.mxu0 %v4472_v44  ;;  %5161 = vmatprep.subr.mxu1 %v4472_v44 }
 0x68f   : > { %5134 = vmatpush3.msra.mxu0 %v4472_v44  ;;  %5171 = vmatpush3.msra.mxu1 %v4472_v44 }
 0x690   : > { %5135 = vmatprep.subr.mxu0 %v4471_v29  ;;  %5162 = vmatprep.subr.mxu1 %v4471_v29 }
 0x691   : > { %5136 = vmatpush3.msra.mxu0 %v4471_v29  ;;  %5172 = vmatpush3.msra.mxu1 %v4471_v29 }
 0x692   : > { %5137 = vmatprep.subr.mxu0 %v4470_v55  ;;  %5163 = vmatprep.subr.mxu1 %v4470_v55 }
 0x693   : > { %5138 = vmatpush3.msra.mxu0 %v4470_v55  ;;  %5173 = vmatpush3.msra.mxu1 %v4470_v55 }
 0x694   : > { %5139 = vmatprep.subr.mxu0 %v4469_v59  ;;  %5164 = vmatprep.subr.mxu1 %v4469_v59 }
 0x695   : > { %5140 = vmatpush3.msra.mxu0 %v4469_v59  ;;  %5174 = vmatpush3.msra.mxu1 %v4469_v59 }
 0x696   : > { %5141 = vmatprep.subr.mxu0 %v4468_v23  ;;  %5165 = vmatprep.subr.mxu1 %v4468_v23 }
 0x697   : > { %5142 = vmatpush3.msra.mxu0 %v4468_v23  ;;  %5175 = vmatpush3.msra.mxu1 %v4468_v23 }
 0x698   : > { %5143 = vmatprep.subr.mxu0 %v4467_v51  ;;  %5166 = vmatprep.subr.mxu1 %v4467_v51 }
 0x699   : > { %5144 = vmatpush3.msra.mxu0 %v4467_v51  ;;  %5176 = vmatpush3.msra.mxu1 %v4467_v51 }
 0x69a   : > { %5146 = vmatmul.mubr.msk.f32.vlgmr.msra.gmra.mxu0 %vm1401_vm6, %v4478_v15  ;;  %5152 = vmatmul.mubr.msk.f32.vlgmr.msra.gmra.mxu1 %vm1401_vm6, %v4482_v34 }
 0x69b   : > { %5148 = vmatprep.mubr.msk.f32.mxu0 %vm1401_vm6, %v4479_v22  ;;  %5154 = vmatprep.mubr.msk.f32.mxu1 %vm1401_vm6, %v4483_v33 }
 0x69e   : > { %5149 = vmatmul.mubr.msk.f32.gmra.mxu0 %vm1401_vm6, %v4480_v56  ;;  %5155 = vmatmul.mubr.msk.f32.gmra.mxu1 %vm1401_vm6, %v4484_v61 }
 0x75a   : > { %v5147_v30 = vpop.f32.mrf.mxu0  ;;  %v5153_v35 = vpop.f32.mrf.mxu1 }
 0x75b   : > { %v4632_v0 = vadd.f32 %v5147_v30, %v4501_v2  ;;  %v4652_v60 = vadd.f32 %v5153_v35, %v4521_v26 }
 0x75c   : > { %v4626_v17 = vpop.f32.mrf.mxu0  ;;  %v4646_v47 = vpop.f32.mrf.mxu1 }
 0x75d   : > { %v4666_v49 = vmax.f32 %v4632_v0, 0.0  ;;  %v4670_v48 = vmax.f32 %v4652_v60, 0.0  ;;  %v4627_v24 = vadd.f32 %v4626_v17, %v4496_v45  ;;  %v4647_v38 = vadd.f32 %v4646_v47, %v4516_v62 }
 0x75e   : > { %v5150_v16 = vpop.f32.mrf.mxu0  ;;  %v5156_v8 = vpop.f32.mrf.mxu1 }
 0x75f   : > { %v4718_v6 = vmul.f32 %v4716_v58, %v4666_v49  ;;  %v4722_v40 = vmul.f32 %v4716_v58, %v4670_v48  ;;  %v4665_v46 = vmax.f32 %v4627_v24, 0.0  ;;  %v4669_v57 = vmax.f32 %v4647_v38, 0.0 }
 0x760   : > { %v4642_v1 = vadd.f32 %v5150_v16, %v4511_v54  ;;  %v4662_v19 = vadd.f32 %v5156_v8, %v4531_v11  ;;  %v4636_v36 = vpop.f32.mrf.mxu0  ;;  %v4656_v5 = vpop.f32.mrf.mxu1 }
 0x761   : > { %4726 = vst.msk [vmem:[%s9005_s21 + $0x8] sm:$0xff] %vm3619_vm12, %v4718_v6  ;;  %4730 = vst.msk [vmem:[%s9005_s21 + $0x28] sm:$0xff] %vm3619_vm12, %v4722_v40  ;;  %v4717_v53 = vmul.f32 %v4716_v58, %v4665_v46  ;;  %v4721_v32 = vmul.f32 %v4716_v58, %v4669_v57  ;;  %v4637_v43 = vadd.f32 %v4636_v36, %v4506_v3 }
 0x762   : > { %v4657_v10 = vadd.f32 %v4656_v5, %v4526_v21  ;;  %v4668_v13 = vmax.f32 %v4642_v1, 0.0  ;;  %v4672_v31 = vmax.f32 %v4662_v19, 0.0 }
 0x763   : > { %4725 = vst.msk [vmem:[%s9005_s21] sm:$0xff] %vm3619_vm12, %v4717_v53  ;;  %4729 = vst.msk [vmem:[%s9005_s21 + $0x20] sm:$0xff] %vm3619_vm12, %v4721_v32  ;;  %v4667_v12 = vmax.f32 %v4637_v43, 0.0 }
 0x764   : > { %v4671_v4 = vmax.f32 %v4657_v10, 0.0  ;;  %v4720_v44 = vmul.f32 %v4716_v58, %v4668_v13  ;;  %v4724_v18 = vmul.f32 %v4716_v58, %v4672_v31 }
 0x765   : > { %v4719_v29 = vmul.f32 %v4716_v58, %v4667_v12 }
 0x766   : > { %v4723_v7 = vmul.f32 %v4716_v58, %v4671_v4  ;;  %4728 = vst.msk [vmem:[%s9005_s21 + $0x18] sm:$0xff] %vm3619_vm12, %v4720_v44  ;;  %4732 = vst.msk [vmem:[%s9005_s21 + $0x38] sm:$0xff] %vm3619_vm12, %v4724_v18 }
 0x767   : > { %4727 = vst.msk [vmem:[%s9005_s21 + $0x10] sm:$0xff] %vm3619_vm12, %v4719_v29 }
 0x768   : > { %4731 = vst.msk [vmem:[%s9005_s21 + $0x30] sm:$0xff] %vm3619_vm12, %v4723_v7 }
 0x769 PF: > { %s30_s1 = sadd.s32 1, %s5366_s1  }
 0x76a   : > { %p27_p4 = scmp.ge.s32.totalorder %s30_s1, 4  }
 0x76c   :  { %29 = sbr.rel (!%p27_p4) target bundleno = 6 (0x6), region = 133 }

</bundles_post_ra>
